<compile_context>
chip_gen: v6e
topology: v6e:2x2x1
jax: 0.10.0
libtpu: 0.0.40
codegen_flags: <defaults>
</compile_context>

<pallas_src>
import jax
import jax.numpy as jnp
from jax.experimental import pallas as pl
from jax.experimental.pallas import tpu as pltpu


def _lstm_kernel(x_ref, w0_ref, whh0_ref, b0_ref, wih1_ref, whh1_ref, b1_ref,
                 omean_ref, ostd_ref,
                 y_ref,
                 h0_s, c0_s, h1_s, c1_s):
    tc, B, I = x_ref.shape
    H = whh0_ref.shape[0]

    @pl.when(pl.program_id(0) == 0)
    def _():
        h0_s[...] = jnp.zeros_like(h0_s)
        c0_s[...] = jnp.zeros_like(c0_s)
        h1_s[...] = jnp.zeros_like(h1_s)
        c1_s[...] = jnp.zeros_like(c1_s)

    # Hoisted layer-0 input projection for the whole resident chunk.
    # series_encode is folded into w0/b0, so this is x @ w0 + b0 over all
    # Tc*B rows at once; the result stays live in vregs (no scratch bounce).
    x = x_ref[...].reshape(tc * B, I).astype(jnp.bfloat16)
    xg = (jnp.dot(x, w0_ref[...], preferred_element_type=jnp.float32)
          + b0_ref[...]).reshape(tc, B, 4 * H)

    # Hoist small constant operands out of the step loop.
    whh0 = whh0_ref[...]
    wih1 = wih1_ref[...]
    whh1 = whh1_ref[...]
    b1 = b1_ref[...]

    def apply_gates(g, c_prev):
        # PyTorch gate order: [i, f, g, o].  One full-lane sigmoid over the
        # whole (B, 4H) slab + one narrow tanh on the g slice + tanh(c):
        # 3 EUP pushes per layer instead of 5 quarter-width ones.
        sg = jax.nn.sigmoid(g)
        i = sg[:, 0 * H:1 * H]
        f = sg[:, 1 * H:2 * H]
        o = sg[:, 3 * H:4 * H]
        gg = jnp.tanh(g[:, 2 * H:3 * H])
        c = f * c_prev + i * gg
        h = o * jnp.tanh(c)
        return h, c

    h0 = h0_s[...]
    c0 = c0_s[...]
    h1 = h1_s[...]
    c1 = c1_s[...]

    h1_steps = []
    # Static (fully unrolled) time loop: t is a concrete index, so xg[t] is a
    # free static slice and the h1 staging needs no VMEM round-trip.
    for t in range(tc):
        # Layer 0: precomputed input part + recurrent matmul only.
        g0 = xg[t] + jnp.dot(h0.astype(jnp.bfloat16), whh0,
                             preferred_element_type=jnp.float32)
        h0, c0 = apply_gates(g0, c0)
        # Layer 1: two independent dots (no lane-shuffle concat on the
        # critical path); their MXU pushes can overlap in the pipeline.
        g1 = (jnp.dot(h0.astype(jnp.bfloat16), wih1,
                      preferred_element_type=jnp.float32)
              + jnp.dot(h1.astype(jnp.bfloat16), whh1,
                        preferred_element_type=jnp.float32)
              + b1)
        h1, c1 = apply_gates(g1, c1)
        h1_steps.append(h1)

    # series_decode applied once over the whole chunk, then a single
    # (Tc, B, H) block writeback (no per-step scale/cast/masked store).
    hs = jnp.stack(h1_steps, axis=0)                       # (tc, B, H) f32
    y_ref[...] = (hs * ostd_ref[...] + omean_ref[...]).astype(y_ref.dtype)

    # Persist recurrent state once per chunk (not per step).
    h0_s[...] = h0
    c0_s[...] = c0
    h1_s[...] = h1
    c1_s[...] = c1


def lstm_forward_pallas(x, params, *, tc=None):
    """x: (T, B, I) float32.  Returns y: (T, B, H) float32."""
    T, B, I = x.shape
    H = params["omean"].shape[-1]
    if tc is None:
        tc = T                      # one grid step: whole recurrence resident
    assert T % tc == 0, "T must be a multiple of the time-chunk size"
    nc = T // tc

    full = lambda shape: pl.BlockSpec(shape, lambda c: (0,) * len(shape))

    return pl.pallas_call(
        _lstm_kernel,
        out_shape=jax.ShapeDtypeStruct((T, B, H), jnp.float32),
        grid_spec=pltpu.PrefetchScalarGridSpec(
            num_scalar_prefetch=0,
            grid=(nc,),
            in_specs=[
                pl.BlockSpec((tc, B, I), lambda c: (c, 0, 0)),  # x chunk
                full((I, 4 * H)),        # w0   (W_ih l0, norm folded, bf16)
                full((H, 4 * H)),        # whh0 (bf16)
                full((1, 4 * H)),        # b0   (norm folded, f32)
                full((H, 4 * H)),        # wih1 (bf16)
                full((H, 4 * H)),        # whh1 (bf16)
                full((1, 4 * H)),        # b1   (f32)
                full((1, H)),            # output_mean
                full((1, H)),            # output_std
            ],
            out_specs=pl.BlockSpec((tc, B, H), lambda c: (c, 0, 0)),
            scratch_shapes=[
                pltpu.VMEM((B, H), jnp.float32),   # h0
                pltpu.VMEM((B, H), jnp.float32),   # c0
                pltpu.VMEM((B, H), jnp.float32),   # h1
                pltpu.VMEM((B, H), jnp.float32),   # c1
            ],
        ),
        compiler_params=pltpu.CompilerParams(
            dimension_semantics=("arbitrary",),  # sequential recurrence over time
        ),
    )(x, params["w0"], params["whh0"], params["b0"],
      params["wih1"], params["whh1"], params["b1"],
      params["omean"], params["ostd"])


# ----------------------------------------------------------------------------
# Parameter construction / folding
# ----------------------------------------------------------------------------

def init_raw_params(key, input_size, hidden_size):
    """PyTorch-layout raw parameters (uniform(-1/sqrt(H), 1/sqrt(H)))."""
    I, H = input_size, hidden_size
    k = 1.0 / jnp.sqrt(jnp.float32(H))
    keys = jax.random.split(key, 12)
    u = lambda kk, shape: jax.random.uniform(kk, shape, jnp.float32, -k, k)
    return {
        "wih0": u(keys[0], (4 * H, I)),
        "whh0": u(keys[1], (4 * H, H)),
        "bih0": u(keys[2], (4 * H,)),
        "bhh0": u(keys[3], (4 * H,)),
        "wih1": u(keys[4], (4 * H, H)),
        "whh1": u(keys[5], (4 * H, H)),
        "bih1": u(keys[6], (4 * H,)),
        "bhh1": u(keys[7], (4 * H,)),
        "imean": jax.random.normal(keys[8], (I,), jnp.float32) * 0.5,
        "istd": jax.random.uniform(keys[9], (I,), jnp.float32, 0.5, 1.5),
        "omean": jax.random.normal(keys[10], (H,), jnp.float32) * 0.5,
        "ostd": jax.random.uniform(keys[11], (H,), jnp.float32, 0.5, 1.5),
    }


def prepare_params(raw):
    """Fold series_encode into layer-0 weights; transpose; cast weights to bf16."""
    wih0_t = raw["wih0"].T           # (I, 4H)
    whh0_t = raw["whh0"].T           # (H, 4H)
    wih1_t = raw["wih1"].T           # (H, 4H)
    whh1_t = raw["whh1"].T           # (H, 4H)
    inv_std = 1.0 / raw["istd"]      # (I,)

    w0 = (wih0_t * inv_std[:, None]).astype(jnp.bfloat16)
    b0 = ((raw["bih0"] + raw["bhh0"])[None, :]
          - (raw["imean"] * inv_std)[None, :] @ wih0_t)          # (1, 4H) f32
    b1 = (raw["bih1"] + raw["bhh1"])[None, :]                    # (1, 4H) f32

    return {
        "w0": w0, "whh0": whh0_t.astype(jnp.bfloat16), "b0": b0,
        "wih1": wih1_t.astype(jnp.bfloat16), "whh1": whh1_t.astype(jnp.bfloat16),
        "b1": b1,
        "omean": raw["omean"][None, :], "ostd": raw["ostd"][None, :],
    }


# ----------------------------------------------------------------------------
# Pure-JAX f32 reference (original module semantics) for validation
# ----------------------------------------------------------------------------

def lstm_forward_ref(x, raw):
    H = raw["whh0"].shape[1]
    xn = (x - raw["imean"][None, None, :]) / raw["istd"][None, None, :]
    wih0_t, whh0_t = raw["wih0"].T, raw["whh0"].T
    wih1_t, whh1_t = raw["wih1"].T, raw["whh1"].T
    b0 = raw["bih0"] + raw["bhh0"]
    b1 = raw["bih1"] + raw["bhh1"]

    def cell(inp, h, c, wih_t, whh_t, b):
        g = inp @ wih_t + h @ whh_t + b
        i = jax.nn.sigmoid(g[:, 0 * H:1 * H])
        f = jax.nn.sigmoid(g[:, 1 * H:2 * H])
        gg = jnp.tanh(g[:, 2 * H:3 * H])
        o = jax.nn.sigmoid(g[:, 3 * H:4 * H])
        c = f * c + i * gg
        h = o * jnp.tanh(c)
        return h, c

    B = x.shape[1]
    init = tuple(jnp.zeros((B, H), jnp.float32) for _ in range(4))

    def step(carry, x_t):
        h0, c0, h1, c1 = carry
        h0, c0 = cell(x_t, h0, c0, wih0_t, whh0_t, b0)
        h1, c1 = cell(h0, h1, c1, wih1_t, whh1_t, b1)
        return (h0, c0, h1, c1), h1

    _, ys = jax.lax.scan(step, init, xn)
    return ys * raw["ostd"][None, None, :] + raw["omean"][None, None, :]


if __name__ == "__main__":
    T, B, I, H = 16, 8, 16, 32   # seq, batch, input_size, hidden (= output_size)

    key = jax.random.PRNGKey(0)
    kx, kp = jax.random.split(key)
    x = jax.random.normal(kx, (T, B, I), jnp.float32)
    raw = init_raw_params(kp, I, H)
    params = prepare_params(raw)

    y = jax.block_until_ready(lstm_forward_pallas(x, params))   # tc = T, grid=(1,)
    y_ref = jax.block_until_ready(lstm_forward_ref(x, raw))

    assert y.shape == (T, B, H)
    # bf16 MXU operands vs. f32 reference -> loosened tolerance.
    err = jnp.max(jnp.abs(y - y_ref))
    assert err < 3e-2, f"max abs err {err}"

    print("KERNEL_OK")
</pallas_src>

<mosaic_0001>
module attributes {stable_mosaic.version = 11 : i64} {
  func.func @_lstm_kernel(%arg0: i32, %arg1: memref<16x8x16xf32, #tpu.memory_space<vmem>>, %arg2: memref<16x128xbf16, #tpu.memory_space<vmem>>, %arg3: memref<32x128xbf16, #tpu.memory_space<vmem>>, %arg4: memref<1x128xf32, #tpu.memory_space<vmem>>, %arg5: memref<32x128xbf16, #tpu.memory_space<vmem>>, %arg6: memref<32x128xbf16, #tpu.memory_space<vmem>>, %arg7: memref<1x128xf32, #tpu.memory_space<vmem>>, %arg8: memref<1x32xf32, #tpu.memory_space<vmem>>, %arg9: memref<1x32xf32, #tpu.memory_space<vmem>>, %arg10: memref<16x8x32xf32, #tpu.memory_space<vmem>>, %arg11: memref<8x32xf32, #tpu.memory_space<vmem>>, %arg12: memref<8x32xf32, #tpu.memory_space<vmem>>, %arg13: memref<8x32xf32, #tpu.memory_space<vmem>>, %arg14: memref<8x32xf32, #tpu.memory_space<vmem>>) attributes {dimension_semantics = [#tpu.dimension_semantics<arbitrary>], iteration_bounds = array<i64: 1>, scalar_prefetch = 0 : i64, scratch_operands = 4 : i64, tpu.core_type = #tpu.core_type<tc>, window_params = [{transform_indices = @transform_0, window_bounds = array<i64: 16, 8, 16>}, {pipeline_mode = #tpu.pipeline_mode<synchronous>, transform_indices = @transform_1, window_bounds = array<i64: 16, 128>}, {pipeline_mode = #tpu.pipeline_mode<synchronous>, transform_indices = @transform_2, window_bounds = array<i64: 32, 128>}, {pipeline_mode = #tpu.pipeline_mode<synchronous>, transform_indices = @transform_3, window_bounds = array<i64: 1, 128>}, {pipeline_mode = #tpu.pipeline_mode<synchronous>, transform_indices = @transform_4, window_bounds = array<i64: 32, 128>}, {pipeline_mode = #tpu.pipeline_mode<synchronous>, transform_indices = @transform_5, window_bounds = array<i64: 32, 128>}, {pipeline_mode = #tpu.pipeline_mode<synchronous>, transform_indices = @transform_6, window_bounds = array<i64: 1, 128>}, {pipeline_mode = #tpu.pipeline_mode<synchronous>, transform_indices = @transform_7, window_bounds = array<i64: 1, 32>}, {pipeline_mode = #tpu.pipeline_mode<synchronous>, transform_indices = @transform_8, window_bounds = array<i64: 1, 32>}, {transform_indices = @transform_9, window_bounds = array<i64: 16, 8, 32>}]} {
    %c0_i32 = arith.constant 0 : i32
    %0 = arith.cmpi eq, %arg0, %c0_i32 : i32
    %1 = arith.extui %0 : i1 to i32
    %c0_i32_0 = arith.constant 0 : i32
    %2 = arith.cmpi ne, %1, %c0_i32_0 : i32
    scf.if %2 {
      %cst_118 = arith.constant 0.000000e+00 : f32
      %722 = vector.broadcast %cst_118 : f32 to vector<8x32xf32>
      %c0_119 = arith.constant 0 : index
      %c0_120 = arith.constant 0 : index
      %723 = vector.load %arg11[%c0_119, %c0_120] : memref<8x32xf32, #tpu.memory_space<vmem>>, vector<8x32xf32>
      tpu.vector_store %arg11[%c0_119, %c0_120], %722 {strides = array<i32>} : memref<8x32xf32, #tpu.memory_space<vmem>>, vector<8x32xf32>,
      %cst_121 = arith.constant 0.000000e+00 : f32
      %724 = vector.broadcast %cst_121 : f32 to vector<8x32xf32>
      %c0_122 = arith.constant 0 : index
      %c0_123 = arith.constant 0 : index
      %725 = vector.load %arg12[%c0_122, %c0_123] : memref<8x32xf32, #tpu.memory_space<vmem>>, vector<8x32xf32>
      tpu.vector_store %arg12[%c0_122, %c0_123], %724 {strides = array<i32>} : memref<8x32xf32, #tpu.memory_space<vmem>>, vector<8x32xf32>,
      %cst_124 = arith.constant 0.000000e+00 : f32
      %726 = vector.broadcast %cst_124 : f32 to vector<8x32xf32>
      %c0_125 = arith.constant 0 : index
      %c0_126 = arith.constant 0 : index
      %727 = vector.load %arg13[%c0_125, %c0_126] : memref<8x32xf32, #tpu.memory_space<vmem>>, vector<8x32xf32>
      tpu.vector_store %arg13[%c0_125, %c0_126], %726 {strides = array<i32>} : memref<8x32xf32, #tpu.memory_space<vmem>>, vector<8x32xf32>,
      %cst_127 = arith.constant 0.000000e+00 : f32
      %728 = vector.broadcast %cst_127 : f32 to vector<8x32xf32>
      %c0_128 = arith.constant 0 : index
      %c0_129 = arith.constant 0 : index
      %729 = vector.load %arg14[%c0_128, %c0_129] : memref<8x32xf32, #tpu.memory_space<vmem>>, vector<8x32xf32>
      tpu.vector_store %arg14[%c0_128, %c0_129], %728 {strides = array<i32>} : memref<8x32xf32, #tpu.memory_space<vmem>>, vector<8x32xf32>,
    } else {
    }
    %c0 = arith.constant 0 : index
    %c0_1 = arith.constant 0 : index
    %c0_2 = arith.constant 0 : index
    %3 = vector.load %arg1[%c0, %c0_1, %c0_2] : memref<16x8x16xf32, #tpu.memory_space<vmem>>, vector<16x8x16xf32>
    %4 = vector.shape_cast %3 : vector<16x8x16xf32> to vector<128x16xf32>
    %5 = arith.truncf %4 : vector<128x16xf32> to vector<128x16xbf16>
    %c0_3 = arith.constant 0 : index
    %c0_4 = arith.constant 0 : index
    %6 = vector.load %arg2[%c0_3, %c0_4] : memref<16x128xbf16, #tpu.memory_space<vmem>>, vector<16x128xbf16>
    %cst = arith.constant dense<0.000000e+00> : vector<128x128xf32>
    %7 = tpu.matmul %5, %6, %cst {dimension_numbers = #tpu.dot_dimension_numbers<[1], [0], [0], [1], [0, 0, 1, 1], [], []>} : vector<128x16xbf16>, vector<16x128xbf16>, vector<128x128xf32> -> vector<128x128xf32>
    %c0_5 = arith.constant 0 : index
    %c0_6 = arith.constant 0 : index
    %8 = vector.load %arg4[%c0_5, %c0_6] : memref<1x128xf32, #tpu.memory_space<vmem>>, vector<1x128xf32>
    %9 = vector.broadcast %8 : vector<1x128xf32> to vector<128x128xf32>
    %10 = arith.addf %7, %9 : vector<128x128xf32>
    %11 = vector.shape_cast %10 : vector<128x128xf32> to vector<16x8x128xf32>
    %c0_7 = arith.constant 0 : index
    %c0_8 = arith.constant 0 : index
    %12 = vector.load %arg3[%c0_7, %c0_8] : memref<32x128xbf16, #tpu.memory_space<vmem>>, vector<32x128xbf16>
    %c0_9 = arith.constant 0 : index
    %c0_10 = arith.constant 0 : index
    %13 = vector.load %arg5[%c0_9, %c0_10] : memref<32x128xbf16, #tpu.memory_space<vmem>>, vector<32x128xbf16>
    %c0_11 = arith.constant 0 : index
    %c0_12 = arith.constant 0 : index
    %14 = vector.load %arg6[%c0_11, %c0_12] : memref<32x128xbf16, #tpu.memory_space<vmem>>, vector<32x128xbf16>
    %c0_13 = arith.constant 0 : index
    %c0_14 = arith.constant 0 : index
    %15 = vector.load %arg7[%c0_13, %c0_14] : memref<1x128xf32, #tpu.memory_space<vmem>>, vector<1x128xf32>
    %c0_15 = arith.constant 0 : index
    %c0_16 = arith.constant 0 : index
    %16 = vector.load %arg11[%c0_15, %c0_16] : memref<8x32xf32, #tpu.memory_space<vmem>>, vector<8x32xf32>
    %c0_17 = arith.constant 0 : index
    %c0_18 = arith.constant 0 : index
    %17 = vector.load %arg12[%c0_17, %c0_18] : memref<8x32xf32, #tpu.memory_space<vmem>>, vector<8x32xf32>
    %c0_19 = arith.constant 0 : index
    %c0_20 = arith.constant 0 : index
    %18 = vector.load %arg13[%c0_19, %c0_20] : memref<8x32xf32, #tpu.memory_space<vmem>>, vector<8x32xf32>
    %c0_21 = arith.constant 0 : index
    %c0_22 = arith.constant 0 : index
    %19 = vector.load %arg14[%c0_21, %c0_22] : memref<8x32xf32, #tpu.memory_space<vmem>>, vector<8x32xf32>
    %20 = vector.extract_strided_slice %11 {offsets = [0, 0, 0], sizes = [1, 8, 128], strides = [1, 1, 1]} : vector<16x8x128xf32> to vector<1x8x128xf32>
    %21 = vector.shape_cast %20 : vector<1x8x128xf32> to vector<8x128xf32>
    %22 = arith.truncf %16 : vector<8x32xf32> to vector<8x32xbf16>
    %cst_23 = arith.constant dense<0.000000e+00> : vector<8x128xf32>
    %23 = tpu.matmul %22, %12, %cst_23 {dimension_numbers = #tpu.dot_dimension_numbers<[1], [0], [0], [1], [0, 0, 1, 1], [], []>} : vector<8x32xbf16>, vector<32x128xbf16>, vector<8x128xf32> -> vector<8x128xf32>
    %24 = arith.addf %21, %23 : vector<8x128xf32>
    %25 = arith.negf %24 : vector<8x128xf32>
    %26 = math.exp %25 : vector<8x128xf32>
    %cst_24 = arith.constant 1.000000e+00 : f32
    %27 = vector.broadcast %cst_24 : f32 to vector<8x128xf32>
    %28 = arith.addf %27, %26 : vector<8x128xf32>
    %29 = arith.divf %27, %28 : vector<8x128xf32>
    %30 = vector.extract_strided_slice %29 {offsets = [0, 0], sizes = [8, 32], strides = [1, 1]} : vector<8x128xf32> to vector<8x32xf32>
    %31 = vector.extract_strided_slice %29 {offsets = [0, 32], sizes = [8, 32], strides = [1, 1]} : vector<8x128xf32> to vector<8x32xf32>
    %32 = vector.extract_strided_slice %29 {offsets = [0, 96], sizes = [8, 32], strides = [1, 1]} : vector<8x128xf32> to vector<8x32xf32>
    %33 = vector.extract_strided_slice %24 {offsets = [0, 64], sizes = [8, 32], strides = [1, 1]} : vector<8x128xf32> to vector<8x32xf32>
    %34 = math.tanh %33 : vector<8x32xf32>
    %35 = arith.mulf %31, %17 : vector<8x32xf32>
    %36 = arith.mulf %30, %34 : vector<8x32xf32>
    %37 = arith.addf %35, %36 : vector<8x32xf32>
    %38 = math.tanh %37 : vector<8x32xf32>
    %39 = arith.mulf %32, %38 : vector<8x32xf32>
    %40 = arith.truncf %39 : vector<8x32xf32> to vector<8x32xbf16>
    %cst_25 = arith.constant dense<0.000000e+00> : vector<8x128xf32>
    %41 = tpu.matmul %40, %13, %cst_25 {dimension_numbers = #tpu.dot_dimension_numbers<[1], [0], [0], [1], [0, 0, 1, 1], [], []>} : vector<8x32xbf16>, vector<32x128xbf16>, vector<8x128xf32> -> vector<8x128xf32>
    %42 = arith.truncf %18 : vector<8x32xf32> to vector<8x32xbf16>
    %cst_26 = arith.constant dense<0.000000e+00> : vector<8x128xf32>
    %43 = tpu.matmul %42, %14, %cst_26 {dimension_numbers = #tpu.dot_dimension_numbers<[1], [0], [0], [1], [0, 0, 1, 1], [], []>} : vector<8x32xbf16>, vector<32x128xbf16>, vector<8x128xf32> -> vector<8x128xf32>
    %44 = arith.addf %41, %43 : vector<8x128xf32>
    %45 = vector.broadcast %15 : vector<1x128xf32> to vector<8x128xf32>
    %46 = arith.addf %44, %45 : vector<8x128xf32>
    %47 = arith.negf %46 : vector<8x128xf32>
    %48 = math.exp %47 : vector<8x128xf32>
    %cst_27 = arith.constant 1.000000e+00 : f32
    %49 = vector.broadcast %cst_27 : f32 to vector<8x128xf32>
    %50 = arith.addf %49, %48 : vector<8x128xf32>
    %51 = arith.divf %49, %50 : vector<8x128xf32>
    %52 = vector.extract_strided_slice %51 {offsets = [0, 0], sizes = [8, 32], strides = [1, 1]} : vector<8x128xf32> to vector<8x32xf32>
    %53 = vector.extract_strided_slice %51 {offsets = [0, 32], sizes = [8, 32], strides = [1, 1]} : vector<8x128xf32> to vector<8x32xf32>
    %54 = vector.extract_strided_slice %51 {offsets = [0, 96], sizes = [8, 32], strides = [1, 1]} : vector<8x128xf32> to vector<8x32xf32>
    %55 = vector.extract_strided_slice %46 {offsets = [0, 64], sizes = [8, 32], strides = [1, 1]} : vector<8x128xf32> to vector<8x32xf32>
    %56 = math.tanh %55 : vector<8x32xf32>
    %57 = arith.mulf %53, %19 : vector<8x32xf32>
    %58 = arith.mulf %52, %56 : vector<8x32xf32>
    %59 = arith.addf %57, %58 : vector<8x32xf32>
    %60 = math.tanh %59 : vector<8x32xf32>
    %61 = arith.mulf %54, %60 : vector<8x32xf32>
    %62 = vector.extract_strided_slice %11 {offsets = [1, 0, 0], sizes = [1, 8, 128], strides = [1, 1, 1]} : vector<16x8x128xf32> to vector<1x8x128xf32>
    %63 = vector.shape_cast %62 : vector<1x8x128xf32> to vector<8x128xf32>
    %64 = arith.truncf %39 : vector<8x32xf32> to vector<8x32xbf16>
    %cst_28 = arith.constant dense<0.000000e+00> : vector<8x128xf32>
    %65 = tpu.matmul %64, %12, %cst_28 {dimension_numbers = #tpu.dot_dimension_numbers<[1], [0], [0], [1], [0, 0, 1, 1], [], []>} : vector<8x32xbf16>, vector<32x128xbf16>, vector<8x128xf32> -> vector<8x128xf32>
    %66 = arith.addf %63, %65 : vector<8x128xf32>
    %67 = arith.negf %66 : vector<8x128xf32>
    %68 = math.exp %67 : vector<8x128xf32>
    %cst_29 = arith.constant 1.000000e+00 : f32
    %69 = vector.broadcast %cst_29 : f32 to vector<8x128xf32>
    %70 = arith.addf %69, %68 : vector<8x128xf32>
    %71 = arith.divf %69, %70 : vector<8x128xf32>
    %72 = vector.extract_strided_slice %71 {offsets = [0, 0], sizes = [8, 32], strides = [1, 1]} : vector<8x128xf32> to vector<8x32xf32>
    %73 = vector.extract_strided_slice %71 {offsets = [0, 32], sizes = [8, 32], strides = [1, 1]} : vector<8x128xf32> to vector<8x32xf32>
    %74 = vector.extract_strided_slice %71 {offsets = [0, 96], sizes = [8, 32], strides = [1, 1]} : vector<8x128xf32> to vector<8x32xf32>
    %75 = vector.extract_strided_slice %66 {offsets = [0, 64], sizes = [8, 32], strides = [1, 1]} : vector<8x128xf32> to vector<8x32xf32>
    %76 = math.tanh %75 : vector<8x32xf32>
    %77 = arith.mulf %73, %37 : vector<8x32xf32>
    %78 = arith.mulf %72, %76 : vector<8x32xf32>
    %79 = arith.addf %77, %78 : vector<8x32xf32>
    %80 = math.tanh %79 : vector<8x32xf32>
    %81 = arith.mulf %74, %80 : vector<8x32xf32>
    %82 = arith.truncf %81 : vector<8x32xf32> to vector<8x32xbf16>
    %cst_30 = arith.constant dense<0.000000e+00> : vector<8x128xf32>
    %83 = tpu.matmul %82, %13, %cst_30 {dimension_numbers = #tpu.dot_dimension_numbers<[1], [0], [0], [1], [0, 0, 1, 1], [], []>} : vector<8x32xbf16>, vector<32x128xbf16>, vector<8x128xf32> -> vector<8x128xf32>
    %84 = arith.truncf %61 : vector<8x32xf32> to vector<8x32xbf16>
    %cst_31 = arith.constant dense<0.000000e+00> : vector<8x128xf32>
    %85 = tpu.matmul %84, %14, %cst_31 {dimension_numbers = #tpu.dot_dimension_numbers<[1], [0], [0], [1], [0, 0, 1, 1], [], []>} : vector<8x32xbf16>, vector<32x128xbf16>, vector<8x128xf32> -> vector<8x128xf32>
    %86 = arith.addf %83, %85 : vector<8x128xf32>
    %87 = vector.broadcast %15 : vector<1x128xf32> to vector<8x128xf32>
    %88 = arith.addf %86, %87 : vector<8x128xf32>
    %89 = arith.negf %88 : vector<8x128xf32>
    %90 = math.exp %89 : vector<8x128xf32>
    %cst_32 = arith.constant 1.000000e+00 : f32
    %91 = vector.broadcast %cst_32 : f32 to vector<8x128xf32>
    %92 = arith.addf %91, %90 : vector<8x128xf32>
    %93 = arith.divf %91, %92 : vector<8x128xf32>
    %94 = vector.extract_strided_slice %93 {offsets = [0, 0], sizes = [8, 32], strides = [1, 1]} : vector<8x128xf32> to vector<8x32xf32>
    %95 = vector.extract_strided_slice %93 {offsets = [0, 32], sizes = [8, 32], strides = [1, 1]} : vector<8x128xf32> to vector<8x32xf32>
    %96 = vector.extract_strided_slice %93 {offsets = [0, 96], sizes = [8, 32], strides = [1, 1]} : vector<8x128xf32> to vector<8x32xf32>
    %97 = vector.extract_strided_slice %88 {offsets = [0, 64], sizes = [8, 32], strides = [1, 1]} : vector<8x128xf32> to vector<8x32xf32>
    %98 = math.tanh %97 : vector<8x32xf32>
    %99 = arith.mulf %95, %59 : vector<8x32xf32>
    %100 = arith.mulf %94, %98 : vector<8x32xf32>
    %101 = arith.addf %99, %100 : vector<8x32xf32>
    %102 = math.tanh %101 : vector<8x32xf32>
    %103 = arith.mulf %96, %102 : vector<8x32xf32>
    %104 = vector.extract_strided_slice %11 {offsets = [2, 0, 0], sizes = [1, 8, 128], strides = [1, 1, 1]} : vector<16x8x128xf32> to vector<1x8x128xf32>
    %105 = vector.shape_cast %104 : vector<1x8x128xf32> to vector<8x128xf32>
    %106 = arith.truncf %81 : vector<8x32xf32> to vector<8x32xbf16>
    %cst_33 = arith.constant dense<0.000000e+00> : vector<8x128xf32>
    %107 = tpu.matmul %106, %12, %cst_33 {dimension_numbers = #tpu.dot_dimension_numbers<[1], [0], [0], [1], [0, 0, 1, 1], [], []>} : vector<8x32xbf16>, vector<32x128xbf16>, vector<8x128xf32> -> vector<8x128xf32>
    %108 = arith.addf %105, %107 : vector<8x128xf32>
    %109 = arith.negf %108 : vector<8x128xf32>
    %110 = math.exp %109 : vector<8x128xf32>
    %cst_34 = arith.constant 1.000000e+00 : f32
    %111 = vector.broadcast %cst_34 : f32 to vector<8x128xf32>
    %112 = arith.addf %111, %110 : vector<8x128xf32>
    %113 = arith.divf %111, %112 : vector<8x128xf32>
    %114 = vector.extract_strided_slice %113 {offsets = [0, 0], sizes = [8, 32], strides = [1, 1]} : vector<8x128xf32> to vector<8x32xf32>
    %115 = vector.extract_strided_slice %113 {offsets = [0, 32], sizes = [8, 32], strides = [1, 1]} : vector<8x128xf32> to vector<8x32xf32>
    %116 = vector.extract_strided_slice %113 {offsets = [0, 96], sizes = [8, 32], strides = [1, 1]} : vector<8x128xf32> to vector<8x32xf32>
    %117 = vector.extract_strided_slice %108 {offsets = [0, 64], sizes = [8, 32], strides = [1, 1]} : vector<8x128xf32> to vector<8x32xf32>
    %118 = math.tanh %117 : vector<8x32xf32>
    %119 = arith.mulf %115, %79 : vector<8x32xf32>
    %120 = arith.mulf %114, %118 : vector<8x32xf32>
    %121 = arith.addf %119, %120 : vector<8x32xf32>
    %122 = math.tanh %121 : vector<8x32xf32>
    %123 = arith.mulf %116, %122 : vector<8x32xf32>
    %124 = arith.truncf %123 : vector<8x32xf32> to vector<8x32xbf16>
    %cst_35 = arith.constant dense<0.000000e+00> : vector<8x128xf32>
    %125 = tpu.matmul %124, %13, %cst_35 {dimension_numbers = #tpu.dot_dimension_numbers<[1], [0], [0], [1], [0, 0, 1, 1], [], []>} : vector<8x32xbf16>, vector<32x128xbf16>, vector<8x128xf32> -> vector<8x128xf32>
    %126 = arith.truncf %103 : vector<8x32xf32> to vector<8x32xbf16>
    %cst_36 = arith.constant dense<0.000000e+00> : vector<8x128xf32>
    %127 = tpu.matmul %126, %14, %cst_36 {dimension_numbers = #tpu.dot_dimension_numbers<[1], [0], [0], [1], [0, 0, 1, 1], [], []>} : vector<8x32xbf16>, vector<32x128xbf16>, vector<8x128xf32> -> vector<8x128xf32>
    %128 = arith.addf %125, %127 : vector<8x128xf32>
    %129 = vector.broadcast %15 : vector<1x128xf32> to vector<8x128xf32>
    %130 = arith.addf %128, %129 : vector<8x128xf32>
    %131 = arith.negf %130 : vector<8x128xf32>
    %132 = math.exp %131 : vector<8x128xf32>
    %cst_37 = arith.constant 1.000000e+00 : f32
    %133 = vector.broadcast %cst_37 : f32 to vector<8x128xf32>
    %134 = arith.addf %133, %132 : vector<8x128xf32>
    %135 = arith.divf %133, %134 : vector<8x128xf32>
    %136 = vector.extract_strided_slice %135 {offsets = [0, 0], sizes = [8, 32], strides = [1, 1]} : vector<8x128xf32> to vector<8x32xf32>
    %137 = vector.extract_strided_slice %135 {offsets = [0, 32], sizes = [8, 32], strides = [1, 1]} : vector<8x128xf32> to vector<8x32xf32>
    %138 = vector.extract_strided_slice %135 {offsets = [0, 96], sizes = [8, 32], strides = [1, 1]} : vector<8x128xf32> to vector<8x32xf32>
    %139 = vector.extract_strided_slice %130 {offsets = [0, 64], sizes = [8, 32], strides = [1, 1]} : vector<8x128xf32> to vector<8x32xf32>
    %140 = math.tanh %139 : vector<8x32xf32>
    %141 = arith.mulf %137, %101 : vector<8x32xf32>
    %142 = arith.mulf %136, %140 : vector<8x32xf32>
    %143 = arith.addf %141, %142 : vector<8x32xf32>
    %144 = math.tanh %143 : vector<8x32xf32>
    %145 = arith.mulf %138, %144 : vector<8x32xf32>
    %146 = vector.extract_strided_slice %11 {offsets = [3, 0, 0], sizes = [1, 8, 128], strides = [1, 1, 1]} : vector<16x8x128xf32> to vector<1x8x128xf32>
    %147 = vector.shape_cast %146 : vector<1x8x128xf32> to vector<8x128xf32>
    %148 = arith.truncf %123 : vector<8x32xf32> to vector<8x32xbf16>
    %cst_38 = arith.constant dense<0.000000e+00> : vector<8x128xf32>
    %149 = tpu.matmul %148, %12, %cst_38 {dimension_numbers = #tpu.dot_dimension_numbers<[1], [0], [0], [1], [0, 0, 1, 1], [], []>} : vector<8x32xbf16>, vector<32x128xbf16>, vector<8x128xf32> -> vector<8x128xf32>
    %150 = arith.addf %147, %149 : vector<8x128xf32>
    %151 = arith.negf %150 : vector<8x128xf32>
    %152 = math.exp %151 : vector<8x128xf32>
    %cst_39 = arith.constant 1.000000e+00 : f32
    %153 = vector.broadcast %cst_39 : f32 to vector<8x128xf32>
    %154 = arith.addf %153, %152 : vector<8x128xf32>
    %155 = arith.divf %153, %154 : vector<8x128xf32>
    %156 = vector.extract_strided_slice %155 {offsets = [0, 0], sizes = [8, 32], strides = [1, 1]} : vector<8x128xf32> to vector<8x32xf32>
    %157 = vector.extract_strided_slice %155 {offsets = [0, 32], sizes = [8, 32], strides = [1, 1]} : vector<8x128xf32> to vector<8x32xf32>
    %158 = vector.extract_strided_slice %155 {offsets = [0, 96], sizes = [8, 32], strides = [1, 1]} : vector<8x128xf32> to vector<8x32xf32>
    %159 = vector.extract_strided_slice %150 {offsets = [0, 64], sizes = [8, 32], strides = [1, 1]} : vector<8x128xf32> to vector<8x32xf32>
    %160 = math.tanh %159 : vector<8x32xf32>
    %161 = arith.mulf %157, %121 : vector<8x32xf32>
    %162 = arith.mulf %156, %160 : vector<8x32xf32>
    %163 = arith.addf %161, %162 : vector<8x32xf32>
    %164 = math.tanh %163 : vector<8x32xf32>
    %165 = arith.mulf %158, %164 : vector<8x32xf32>
    %166 = arith.truncf %165 : vector<8x32xf32> to vector<8x32xbf16>
    %cst_40 = arith.constant dense<0.000000e+00> : vector<8x128xf32>
    %167 = tpu.matmul %166, %13, %cst_40 {dimension_numbers = #tpu.dot_dimension_numbers<[1], [0], [0], [1], [0, 0, 1, 1], [], []>} : vector<8x32xbf16>, vector<32x128xbf16>, vector<8x128xf32> -> vector<8x128xf32>
    %168 = arith.truncf %145 : vector<8x32xf32> to vector<8x32xbf16>
    %cst_41 = arith.constant dense<0.000000e+00> : vector<8x128xf32>
    %169 = tpu.matmul %168, %14, %cst_41 {dimension_numbers = #tpu.dot_dimension_numbers<[1], [0], [0], [1], [0, 0, 1, 1], [], []>} : vector<8x32xbf16>, vector<32x128xbf16>, vector<8x128xf32> -> vector<8x128xf32>
    %170 = arith.addf %167, %169 : vector<8x128xf32>
    %171 = vector.broadcast %15 : vector<1x128xf32> to vector<8x128xf32>
    %172 = arith.addf %170, %171 : vector<8x128xf32>
    %173 = arith.negf %172 : vector<8x128xf32>
    %174 = math.exp %173 : vector<8x128xf32>
    %cst_42 = arith.constant 1.000000e+00 : f32
    %175 = vector.broadcast %cst_42 : f32 to vector<8x128xf32>
    %176 = arith.addf %175, %174 : vector<8x128xf32>
    %177 = arith.divf %175, %176 : vector<8x128xf32>
    %178 = vector.extract_strided_slice %177 {offsets = [0, 0], sizes = [8, 32], strides = [1, 1]} : vector<8x128xf32> to vector<8x32xf32>
    %179 = vector.extract_strided_slice %177 {offsets = [0, 32], sizes = [8, 32], strides = [1, 1]} : vector<8x128xf32> to vector<8x32xf32>
    %180 = vector.extract_strided_slice %177 {offsets = [0, 96], sizes = [8, 32], strides = [1, 1]} : vector<8x128xf32> to vector<8x32xf32>
    %181 = vector.extract_strided_slice %172 {offsets = [0, 64], sizes = [8, 32], strides = [1, 1]} : vector<8x128xf32> to vector<8x32xf32>
    %182 = math.tanh %181 : vector<8x32xf32>
    %183 = arith.mulf %179, %143 : vector<8x32xf32>
    %184 = arith.mulf %178, %182 : vector<8x32xf32>
    %185 = arith.addf %183, %184 : vector<8x32xf32>
    %186 = math.tanh %185 : vector<8x32xf32>
    %187 = arith.mulf %180, %186 : vector<8x32xf32>
    %188 = vector.extract_strided_slice %11 {offsets = [4, 0, 0], sizes = [1, 8, 128], strides = [1, 1, 1]} : vector<16x8x128xf32> to vector<1x8x128xf32>
    %189 = vector.shape_cast %188 : vector<1x8x128xf32> to vector<8x128xf32>
    %190 = arith.truncf %165 : vector<8x32xf32> to vector<8x32xbf16>
    %cst_43 = arith.constant dense<0.000000e+00> : vector<8x128xf32>
    %191 = tpu.matmul %190, %12, %cst_43 {dimension_numbers = #tpu.dot_dimension_numbers<[1], [0], [0], [1], [0, 0, 1, 1], [], []>} : vector<8x32xbf16>, vector<32x128xbf16>, vector<8x128xf32> -> vector<8x128xf32>
    %192 = arith.addf %189, %191 : vector<8x128xf32>
    %193 = arith.negf %192 : vector<8x128xf32>
    %194 = math.exp %193 : vector<8x128xf32>
    %cst_44 = arith.constant 1.000000e+00 : f32
    %195 = vector.broadcast %cst_44 : f32 to vector<8x128xf32>
    %196 = arith.addf %195, %194 : vector<8x128xf32>
    %197 = arith.divf %195, %196 : vector<8x128xf32>
    %198 = vector.extract_strided_slice %197 {offsets = [0, 0], sizes = [8, 32], strides = [1, 1]} : vector<8x128xf32> to vector<8x32xf32>
    %199 = vector.extract_strided_slice %197 {offsets = [0, 32], sizes = [8, 32], strides = [1, 1]} : vector<8x128xf32> to vector<8x32xf32>
    %200 = vector.extract_strided_slice %197 {offsets = [0, 96], sizes = [8, 32], strides = [1, 1]} : vector<8x128xf32> to vector<8x32xf32>
    %201 = vector.extract_strided_slice %192 {offsets = [0, 64], sizes = [8, 32], strides = [1, 1]} : vector<8x128xf32> to vector<8x32xf32>
    %202 = math.tanh %201 : vector<8x32xf32>
    %203 = arith.mulf %199, %163 : vector<8x32xf32>
    %204 = arith.mulf %198, %202 : vector<8x32xf32>
    %205 = arith.addf %203, %204 : vector<8x32xf32>
    %206 = math.tanh %205 : vector<8x32xf32>
    %207 = arith.mulf %200, %206 : vector<8x32xf32>
    %208 = arith.truncf %207 : vector<8x32xf32> to vector<8x32xbf16>
    %cst_45 = arith.constant dense<0.000000e+00> : vector<8x128xf32>
    %209 = tpu.matmul %208, %13, %cst_45 {dimension_numbers = #tpu.dot_dimension_numbers<[1], [0], [0], [1], [0, 0, 1, 1], [], []>} : vector<8x32xbf16>, vector<32x128xbf16>, vector<8x128xf32> -> vector<8x128xf32>
    %210 = arith.truncf %187 : vector<8x32xf32> to vector<8x32xbf16>
    %cst_46 = arith.constant dense<0.000000e+00> : vector<8x128xf32>
    %211 = tpu.matmul %210, %14, %cst_46 {dimension_numbers = #tpu.dot_dimension_numbers<[1], [0], [0], [1], [0, 0, 1, 1], [], []>} : vector<8x32xbf16>, vector<32x128xbf16>, vector<8x128xf32> -> vector<8x128xf32>
    %212 = arith.addf %209, %211 : vector<8x128xf32>
    %213 = vector.broadcast %15 : vector<1x128xf32> to vector<8x128xf32>
    %214 = arith.addf %212, %213 : vector<8x128xf32>
    %215 = arith.negf %214 : vector<8x128xf32>
    %216 = math.exp %215 : vector<8x128xf32>
    %cst_47 = arith.constant 1.000000e+00 : f32
    %217 = vector.broadcast %cst_47 : f32 to vector<8x128xf32>
    %218 = arith.addf %217, %216 : vector<8x128xf32>
    %219 = arith.divf %217, %218 : vector<8x128xf32>
    %220 = vector.extract_strided_slice %219 {offsets = [0, 0], sizes = [8, 32], strides = [1, 1]} : vector<8x128xf32> to vector<8x32xf32>
    %221 = vector.extract_strided_slice %219 {offsets = [0, 32], sizes = [8, 32], strides = [1, 1]} : vector<8x128xf32> to vector<8x32xf32>
    %222 = vector.extract_strided_slice %219 {offsets = [0, 96], sizes = [8, 32], strides = [1, 1]} : vector<8x128xf32> to vector<8x32xf32>
    %223 = vector.extract_strided_slice %214 {offsets = [0, 64], sizes = [8, 32], strides = [1, 1]} : vector<8x128xf32> to vector<8x32xf32>
    %224 = math.tanh %223 : vector<8x32xf32>
    %225 = arith.mulf %221, %185 : vector<8x32xf32>
    %226 = arith.mulf %220, %224 : vector<8x32xf32>
    %227 = arith.addf %225, %226 : vector<8x32xf32>
    %228 = math.tanh %227 : vector<8x32xf32>
    %229 = arith.mulf %222, %228 : vector<8x32xf32>
    %230 = vector.extract_strided_slice %11 {offsets = [5, 0, 0], sizes = [1, 8, 128], strides = [1, 1, 1]} : vector<16x8x128xf32> to vector<1x8x128xf32>
    %231 = vector.shape_cast %230 : vector<1x8x128xf32> to vector<8x128xf32>
    %232 = arith.truncf %207 : vector<8x32xf32> to vector<8x32xbf16>
    %cst_48 = arith.constant dense<0.000000e+00> : vector<8x128xf32>
    %233 = tpu.matmul %232, %12, %cst_48 {dimension_numbers = #tpu.dot_dimension_numbers<[1], [0], [0], [1], [0, 0, 1, 1], [], []>} : vector<8x32xbf16>, vector<32x128xbf16>, vector<8x128xf32> -> vector<8x128xf32>
    %234 = arith.addf %231, %233 : vector<8x128xf32>
    %235 = arith.negf %234 : vector<8x128xf32>
    %236 = math.exp %235 : vector<8x128xf32>
    %cst_49 = arith.constant 1.000000e+00 : f32
    %237 = vector.broadcast %cst_49 : f32 to vector<8x128xf32>
    %238 = arith.addf %237, %236 : vector<8x128xf32>
    %239 = arith.divf %237, %238 : vector<8x128xf32>
    %240 = vector.extract_strided_slice %239 {offsets = [0, 0], sizes = [8, 32], strides = [1, 1]} : vector<8x128xf32> to vector<8x32xf32>
    %241 = vector.extract_strided_slice %239 {offsets = [0, 32], sizes = [8, 32], strides = [1, 1]} : vector<8x128xf32> to vector<8x32xf32>
    %242 = vector.extract_strided_slice %239 {offsets = [0, 96], sizes = [8, 32], strides = [1, 1]} : vector<8x128xf32> to vector<8x32xf32>
    %243 = vector.extract_strided_slice %234 {offsets = [0, 64], sizes = [8, 32], strides = [1, 1]} : vector<8x128xf32> to vector<8x32xf32>
    %244 = math.tanh %243 : vector<8x32xf32>
    %245 = arith.mulf %241, %205 : vector<8x32xf32>
    %246 = arith.mulf %240, %244 : vector<8x32xf32>
    %247 = arith.addf %245, %246 : vector<8x32xf32>
    %248 = math.tanh %247 : vector<8x32xf32>
    %249 = arith.mulf %242, %248 : vector<8x32xf32>
    %250 = arith.truncf %249 : vector<8x32xf32> to vector<8x32xbf16>
    %cst_50 = arith.constant dense<0.000000e+00> : vector<8x128xf32>
    %251 = tpu.matmul %250, %13, %cst_50 {dimension_numbers = #tpu.dot_dimension_numbers<[1], [0], [0], [1], [0, 0, 1, 1], [], []>} : vector<8x32xbf16>, vector<32x128xbf16>, vector<8x128xf32> -> vector<8x128xf32>
    %252 = arith.truncf %229 : vector<8x32xf32> to vector<8x32xbf16>
    %cst_51 = arith.constant dense<0.000000e+00> : vector<8x128xf32>
    %253 = tpu.matmul %252, %14, %cst_51 {dimension_numbers = #tpu.dot_dimension_numbers<[1], [0], [0], [1], [0, 0, 1, 1], [], []>} : vector<8x32xbf16>, vector<32x128xbf16>, vector<8x128xf32> -> vector<8x128xf32>
    %254 = arith.addf %251, %253 : vector<8x128xf32>
    %255 = vector.broadcast %15 : vector<1x128xf32> to vector<8x128xf32>
    %256 = arith.addf %254, %255 : vector<8x128xf32>
    %257 = arith.negf %256 : vector<8x128xf32>
    %258 = math.exp %257 : vector<8x128xf32>
    %cst_52 = arith.constant 1.000000e+00 : f32
    %259 = vector.broadcast %cst_52 : f32 to vector<8x128xf32>
    %260 = arith.addf %259, %258 : vector<8x128xf32>
    %261 = arith.divf %259, %260 : vector<8x128xf32>
    %262 = vector.extract_strided_slice %261 {offsets = [0, 0], sizes = [8, 32], strides = [1, 1]} : vector<8x128xf32> to vector<8x32xf32>
    %263 = vector.extract_strided_slice %261 {offsets = [0, 32], sizes = [8, 32], strides = [1, 1]} : vector<8x128xf32> to vector<8x32xf32>
    %264 = vector.extract_strided_slice %261 {offsets = [0, 96], sizes = [8, 32], strides = [1, 1]} : vector<8x128xf32> to vector<8x32xf32>
    %265 = vector.extract_strided_slice %256 {offsets = [0, 64], sizes = [8, 32], strides = [1, 1]} : vector<8x128xf32> to vector<8x32xf32>
    %266 = math.tanh %265 : vector<8x32xf32>
    %267 = arith.mulf %263, %227 : vector<8x32xf32>
    %268 = arith.mulf %262, %266 : vector<8x32xf32>
    %269 = arith.addf %267, %268 : vector<8x32xf32>
    %270 = math.tanh %269 : vector<8x32xf32>
    %271 = arith.mulf %264, %270 : vector<8x32xf32>
    %272 = vector.extract_strided_slice %11 {offsets = [6, 0, 0], sizes = [1, 8, 128], strides = [1, 1, 1]} : vector<16x8x128xf32> to vector<1x8x128xf32>
    %273 = vector.shape_cast %272 : vector<1x8x128xf32> to vector<8x128xf32>
    %274 = arith.truncf %249 : vector<8x32xf32> to vector<8x32xbf16>
    %cst_53 = arith.constant dense<0.000000e+00> : vector<8x128xf32>
    %275 = tpu.matmul %274, %12, %cst_53 {dimension_numbers = #tpu.dot_dimension_numbers<[1], [0], [0], [1], [0, 0, 1, 1], [], []>} : vector<8x32xbf16>, vector<32x128xbf16>, vector<8x128xf32> -> vector<8x128xf32>
    %276 = arith.addf %273, %275 : vector<8x128xf32>
    %277 = arith.negf %276 : vector<8x128xf32>
    %278 = math.exp %277 : vector<8x128xf32>
    %cst_54 = arith.constant 1.000000e+00 : f32
    %279 = vector.broadcast %cst_54 : f32 to vector<8x128xf32>
    %280 = arith.addf %279, %278 : vector<8x128xf32>
    %281 = arith.divf %279, %280 : vector<8x128xf32>
    %282 = vector.extract_strided_slice %281 {offsets = [0, 0], sizes = [8, 32], strides = [1, 1]} : vector<8x128xf32> to vector<8x32xf32>
    %283 = vector.extract_strided_slice %281 {offsets = [0, 32], sizes = [8, 32], strides = [1, 1]} : vector<8x128xf32> to vector<8x32xf32>
    %284 = vector.extract_strided_slice %281 {offsets = [0, 96], sizes = [8, 32], strides = [1, 1]} : vector<8x128xf32> to vector<8x32xf32>
    %285 = vector.extract_strided_slice %276 {offsets = [0, 64], sizes = [8, 32], strides = [1, 1]} : vector<8x128xf32> to vector<8x32xf32>
    %286 = math.tanh %285 : vector<8x32xf32>
    %287 = arith.mulf %283, %247 : vector<8x32xf32>
    %288 = arith.mulf %282, %286 : vector<8x32xf32>
    %289 = arith.addf %287, %288 : vector<8x32xf32>
    %290 = math.tanh %289 : vector<8x32xf32>
    %291 = arith.mulf %284, %290 : vector<8x32xf32>
    %292 = arith.truncf %291 : vector<8x32xf32> to vector<8x32xbf16>
    %cst_55 = arith.constant dense<0.000000e+00> : vector<8x128xf32>
    %293 = tpu.matmul %292, %13, %cst_55 {dimension_numbers = #tpu.dot_dimension_numbers<[1], [0], [0], [1], [0, 0, 1, 1], [], []>} : vector<8x32xbf16>, vector<32x128xbf16>, vector<8x128xf32> -> vector<8x128xf32>
    %294 = arith.truncf %271 : vector<8x32xf32> to vector<8x32xbf16>
    %cst_56 = arith.constant dense<0.000000e+00> : vector<8x128xf32>
    %295 = tpu.matmul %294, %14, %cst_56 {dimension_numbers = #tpu.dot_dimension_numbers<[1], [0], [0], [1], [0, 0, 1, 1], [], []>} : vector<8x32xbf16>, vector<32x128xbf16>, vector<8x128xf32> -> vector<8x128xf32>
    %296 = arith.addf %293, %295 : vector<8x128xf32>
    %297 = vector.broadcast %15 : vector<1x128xf32> to vector<8x128xf32>
    %298 = arith.addf %296, %297 : vector<8x128xf32>
    %299 = arith.negf %298 : vector<8x128xf32>
    %300 = math.exp %299 : vector<8x128xf32>
    %cst_57 = arith.constant 1.000000e+00 : f32
    %301 = vector.broadcast %cst_57 : f32 to vector<8x128xf32>
    %302 = arith.addf %301, %300 : vector<8x128xf32>
    %303 = arith.divf %301, %302 : vector<8x128xf32>
    %304 = vector.extract_strided_slice %303 {offsets = [0, 0], sizes = [8, 32], strides = [1, 1]} : vector<8x128xf32> to vector<8x32xf32>
    %305 = vector.extract_strided_slice %303 {offsets = [0, 32], sizes = [8, 32], strides = [1, 1]} : vector<8x128xf32> to vector<8x32xf32>
    %306 = vector.extract_strided_slice %303 {offsets = [0, 96], sizes = [8, 32], strides = [1, 1]} : vector<8x128xf32> to vector<8x32xf32>
    %307 = vector.extract_strided_slice %298 {offsets = [0, 64], sizes = [8, 32], strides = [1, 1]} : vector<8x128xf32> to vector<8x32xf32>
    %308 = math.tanh %307 : vector<8x32xf32>
    %309 = arith.mulf %305, %269 : vector<8x32xf32>
    %310 = arith.mulf %304, %308 : vector<8x32xf32>
    %311 = arith.addf %309, %310 : vector<8x32xf32>
    %312 = math.tanh %311 : vector<8x32xf32>
    %313 = arith.mulf %306, %312 : vector<8x32xf32>
    %314 = vector.extract_strided_slice %11 {offsets = [7, 0, 0], sizes = [1, 8, 128], strides = [1, 1, 1]} : vector<16x8x128xf32> to vector<1x8x128xf32>
    %315 = vector.shape_cast %314 : vector<1x8x128xf32> to vector<8x128xf32>
    %316 = arith.truncf %291 : vector<8x32xf32> to vector<8x32xbf16>
    %cst_58 = arith.constant dense<0.000000e+00> : vector<8x128xf32>
    %317 = tpu.matmul %316, %12, %cst_58 {dimension_numbers = #tpu.dot_dimension_numbers<[1], [0], [0], [1], [0, 0, 1, 1], [], []>} : vector<8x32xbf16>, vector<32x128xbf16>, vector<8x128xf32> -> vector<8x128xf32>
    %318 = arith.addf %315, %317 : vector<8x128xf32>
    %319 = arith.negf %318 : vector<8x128xf32>
    %320 = math.exp %319 : vector<8x128xf32>
    %cst_59 = arith.constant 1.000000e+00 : f32
    %321 = vector.broadcast %cst_59 : f32 to vector<8x128xf32>
    %322 = arith.addf %321, %320 : vector<8x128xf32>
    %323 = arith.divf %321, %322 : vector<8x128xf32>
    %324 = vector.extract_strided_slice %323 {offsets = [0, 0], sizes = [8, 32], strides = [1, 1]} : vector<8x128xf32> to vector<8x32xf32>
    %325 = vector.extract_strided_slice %323 {offsets = [0, 32], sizes = [8, 32], strides = [1, 1]} : vector<8x128xf32> to vector<8x32xf32>
    %326 = vector.extract_strided_slice %323 {offsets = [0, 96], sizes = [8, 32], strides = [1, 1]} : vector<8x128xf32> to vector<8x32xf32>
    %327 = vector.extract_strided_slice %318 {offsets = [0, 64], sizes = [8, 32], strides = [1, 1]} : vector<8x128xf32> to vector<8x32xf32>
    %328 = math.tanh %327 : vector<8x32xf32>
    %329 = arith.mulf %325, %289 : vector<8x32xf32>
    %330 = arith.mulf %324, %328 : vector<8x32xf32>
    %331 = arith.addf %329, %330 : vector<8x32xf32>
    %332 = math.tanh %331 : vector<8x32xf32>
    %333 = arith.mulf %326, %332 : vector<8x32xf32>
    %334 = arith.truncf %333 : vector<8x32xf32> to vector<8x32xbf16>
    %cst_60 = arith.constant dense<0.000000e+00> : vector<8x128xf32>
    %335 = tpu.matmul %334, %13, %cst_60 {dimension_numbers = #tpu.dot_dimension_numbers<[1], [0], [0], [1], [0, 0, 1, 1], [], []>} : vector<8x32xbf16>, vector<32x128xbf16>, vector<8x128xf32> -> vector<8x128xf32>
    %336 = arith.truncf %313 : vector<8x32xf32> to vector<8x32xbf16>
    %cst_61 = arith.constant dense<0.000000e+00> : vector<8x128xf32>
    %337 = tpu.matmul %336, %14, %cst_61 {dimension_numbers = #tpu.dot_dimension_numbers<[1], [0], [0], [1], [0, 0, 1, 1], [], []>} : vector<8x32xbf16>, vector<32x128xbf16>, vector<8x128xf32> -> vector<8x128xf32>
    %338 = arith.addf %335, %337 : vector<8x128xf32>
    %339 = vector.broadcast %15 : vector<1x128xf32> to vector<8x128xf32>
    %340 = arith.addf %338, %339 : vector<8x128xf32>
    %341 = arith.negf %340 : vector<8x128xf32>
    %342 = math.exp %341 : vector<8x128xf32>
    %cst_62 = arith.constant 1.000000e+00 : f32
    %343 = vector.broadcast %cst_62 : f32 to vector<8x128xf32>
    %344 = arith.addf %343, %342 : vector<8x128xf32>
    %345 = arith.divf %343, %344 : vector<8x128xf32>
    %346 = vector.extract_strided_slice %345 {offsets = [0, 0], sizes = [8, 32], strides = [1, 1]} : vector<8x128xf32> to vector<8x32xf32>
    %347 = vector.extract_strided_slice %345 {offsets = [0, 32], sizes = [8, 32], strides = [1, 1]} : vector<8x128xf32> to vector<8x32xf32>
    %348 = vector.extract_strided_slice %345 {offsets = [0, 96], sizes = [8, 32], strides = [1, 1]} : vector<8x128xf32> to vector<8x32xf32>
    %349 = vector.extract_strided_slice %340 {offsets = [0, 64], sizes = [8, 32], strides = [1, 1]} : vector<8x128xf32> to vector<8x32xf32>
    %350 = math.tanh %349 : vector<8x32xf32>
    %351 = arith.mulf %347, %311 : vector<8x32xf32>
    %352 = arith.mulf %346, %350 : vector<8x32xf32>
    %353 = arith.addf %351, %352 : vector<8x32xf32>
    %354 = math.tanh %353 : vector<8x32xf32>
    %355 = arith.mulf %348, %354 : vector<8x32xf32>
    %356 = vector.extract_strided_slice %11 {offsets = [8, 0, 0], sizes = [1, 8, 128], strides = [1, 1, 1]} : vector<16x8x128xf32> to vector<1x8x128xf32>
    %357 = vector.shape_cast %356 : vector<1x8x128xf32> to vector<8x128xf32>
    %358 = arith.truncf %333 : vector<8x32xf32> to vector<8x32xbf16>
    %cst_63 = arith.constant dense<0.000000e+00> : vector<8x128xf32>
    %359 = tpu.matmul %358, %12, %cst_63 {dimension_numbers = #tpu.dot_dimension_numbers<[1], [0], [0], [1], [0, 0, 1, 1], [], []>} : vector<8x32xbf16>, vector<32x128xbf16>, vector<8x128xf32> -> vector<8x128xf32>
    %360 = arith.addf %357, %359 : vector<8x128xf32>
    %361 = arith.negf %360 : vector<8x128xf32>
    %362 = math.exp %361 : vector<8x128xf32>
    %cst_64 = arith.constant 1.000000e+00 : f32
    %363 = vector.broadcast %cst_64 : f32 to vector<8x128xf32>
    %364 = arith.addf %363, %362 : vector<8x128xf32>
    %365 = arith.divf %363, %364 : vector<8x128xf32>
    %366 = vector.extract_strided_slice %365 {offsets = [0, 0], sizes = [8, 32], strides = [1, 1]} : vector<8x128xf32> to vector<8x32xf32>
    %367 = vector.extract_strided_slice %365 {offsets = [0, 32], sizes = [8, 32], strides = [1, 1]} : vector<8x128xf32> to vector<8x32xf32>
    %368 = vector.extract_strided_slice %365 {offsets = [0, 96], sizes = [8, 32], strides = [1, 1]} : vector<8x128xf32> to vector<8x32xf32>
    %369 = vector.extract_strided_slice %360 {offsets = [0, 64], sizes = [8, 32], strides = [1, 1]} : vector<8x128xf32> to vector<8x32xf32>
    %370 = math.tanh %369 : vector<8x32xf32>
    %371 = arith.mulf %367, %331 : vector<8x32xf32>
    %372 = arith.mulf %366, %370 : vector<8x32xf32>
    %373 = arith.addf %371, %372 : vector<8x32xf32>
    %374 = math.tanh %373 : vector<8x32xf32>
    %375 = arith.mulf %368, %374 : vector<8x32xf32>
    %376 = arith.truncf %375 : vector<8x32xf32> to vector<8x32xbf16>
    %cst_65 = arith.constant dense<0.000000e+00> : vector<8x128xf32>
    %377 = tpu.matmul %376, %13, %cst_65 {dimension_numbers = #tpu.dot_dimension_numbers<[1], [0], [0], [1], [0, 0, 1, 1], [], []>} : vector<8x32xbf16>, vector<32x128xbf16>, vector<8x128xf32> -> vector<8x128xf32>
    %378 = arith.truncf %355 : vector<8x32xf32> to vector<8x32xbf16>
    %cst_66 = arith.constant dense<0.000000e+00> : vector<8x128xf32>
    %379 = tpu.matmul %378, %14, %cst_66 {dimension_numbers = #tpu.dot_dimension_numbers<[1], [0], [0], [1], [0, 0, 1, 1], [], []>} : vector<8x32xbf16>, vector<32x128xbf16>, vector<8x128xf32> -> vector<8x128xf32>
    %380 = arith.addf %377, %379 : vector<8x128xf32>
    %381 = vector.broadcast %15 : vector<1x128xf32> to vector<8x128xf32>
    %382 = arith.addf %380, %381 : vector<8x128xf32>
    %383 = arith.negf %382 : vector<8x128xf32>
    %384 = math.exp %383 : vector<8x128xf32>
    %cst_67 = arith.constant 1.000000e+00 : f32
    %385 = vector.broadcast %cst_67 : f32 to vector<8x128xf32>
    %386 = arith.addf %385, %384 : vector<8x128xf32>
    %387 = arith.divf %385, %386 : vector<8x128xf32>
    %388 = vector.extract_strided_slice %387 {offsets = [0, 0], sizes = [8, 32], strides = [1, 1]} : vector<8x128xf32> to vector<8x32xf32>
    %389 = vector.extract_strided_slice %387 {offsets = [0, 32], sizes = [8, 32], strides = [1, 1]} : vector<8x128xf32> to vector<8x32xf32>
    %390 = vector.extract_strided_slice %387 {offsets = [0, 96], sizes = [8, 32], strides = [1, 1]} : vector<8x128xf32> to vector<8x32xf32>
    %391 = vector.extract_strided_slice %382 {offsets = [0, 64], sizes = [8, 32], strides = [1, 1]} : vector<8x128xf32> to vector<8x32xf32>
    %392 = math.tanh %391 : vector<8x32xf32>
    %393 = arith.mulf %389, %353 : vector<8x32xf32>
    %394 = arith.mulf %388, %392 : vector<8x32xf32>
    %395 = arith.addf %393, %394 : vector<8x32xf32>
    %396 = math.tanh %395 : vector<8x32xf32>
    %397 = arith.mulf %390, %396 : vector<8x32xf32>
    %398 = vector.extract_strided_slice %11 {offsets = [9, 0, 0], sizes = [1, 8, 128], strides = [1, 1, 1]} : vector<16x8x128xf32> to vector<1x8x128xf32>
    %399 = vector.shape_cast %398 : vector<1x8x128xf32> to vector<8x128xf32>
    %400 = arith.truncf %375 : vector<8x32xf32> to vector<8x32xbf16>
    %cst_68 = arith.constant dense<0.000000e+00> : vector<8x128xf32>
    %401 = tpu.matmul %400, %12, %cst_68 {dimension_numbers = #tpu.dot_dimension_numbers<[1], [0], [0], [1], [0, 0, 1, 1], [], []>} : vector<8x32xbf16>, vector<32x128xbf16>, vector<8x128xf32> -> vector<8x128xf32>
    %402 = arith.addf %399, %401 : vector<8x128xf32>
    %403 = arith.negf %402 : vector<8x128xf32>
    %404 = math.exp %403 : vector<8x128xf32>
    %cst_69 = arith.constant 1.000000e+00 : f32
    %405 = vector.broadcast %cst_69 : f32 to vector<8x128xf32>
    %406 = arith.addf %405, %404 : vector<8x128xf32>
    %407 = arith.divf %405, %406 : vector<8x128xf32>
    %408 = vector.extract_strided_slice %407 {offsets = [0, 0], sizes = [8, 32], strides = [1, 1]} : vector<8x128xf32> to vector<8x32xf32>
    %409 = vector.extract_strided_slice %407 {offsets = [0, 32], sizes = [8, 32], strides = [1, 1]} : vector<8x128xf32> to vector<8x32xf32>
    %410 = vector.extract_strided_slice %407 {offsets = [0, 96], sizes = [8, 32], strides = [1, 1]} : vector<8x128xf32> to vector<8x32xf32>
    %411 = vector.extract_strided_slice %402 {offsets = [0, 64], sizes = [8, 32], strides = [1, 1]} : vector<8x128xf32> to vector<8x32xf32>
    %412 = math.tanh %411 : vector<8x32xf32>
    %413 = arith.mulf %409, %373 : vector<8x32xf32>
    %414 = arith.mulf %408, %412 : vector<8x32xf32>
    %415 = arith.addf %413, %414 : vector<8x32xf32>
    %416 = math.tanh %415 : vector<8x32xf32>
    %417 = arith.mulf %410, %416 : vector<8x32xf32>
    %418 = arith.truncf %417 : vector<8x32xf32> to vector<8x32xbf16>
    %cst_70 = arith.constant dense<0.000000e+00> : vector<8x128xf32>
    %419 = tpu.matmul %418, %13, %cst_70 {dimension_numbers = #tpu.dot_dimension_numbers<[1], [0], [0], [1], [0, 0, 1, 1], [], []>} : vector<8x32xbf16>, vector<32x128xbf16>, vector<8x128xf32> -> vector<8x128xf32>
    %420 = arith.truncf %397 : vector<8x32xf32> to vector<8x32xbf16>
    %cst_71 = arith.constant dense<0.000000e+00> : vector<8x128xf32>
    %421 = tpu.matmul %420, %14, %cst_71 {dimension_numbers = #tpu.dot_dimension_numbers<[1], [0], [0], [1], [0, 0, 1, 1], [], []>} : vector<8x32xbf16>, vector<32x128xbf16>, vector<8x128xf32> -> vector<8x128xf32>
    %422 = arith.addf %419, %421 : vector<8x128xf32>
    %423 = vector.broadcast %15 : vector<1x128xf32> to vector<8x128xf32>
    %424 = arith.addf %422, %423 : vector<8x128xf32>
    %425 = arith.negf %424 : vector<8x128xf32>
    %426 = math.exp %425 : vector<8x128xf32>
    %cst_72 = arith.constant 1.000000e+00 : f32
    %427 = vector.broadcast %cst_72 : f32 to vector<8x128xf32>
    %428 = arith.addf %427, %426 : vector<8x128xf32>
    %429 = arith.divf %427, %428 : vector<8x128xf32>
    %430 = vector.extract_strided_slice %429 {offsets = [0, 0], sizes = [8, 32], strides = [1, 1]} : vector<8x128xf32> to vector<8x32xf32>
    %431 = vector.extract_strided_slice %429 {offsets = [0, 32], sizes = [8, 32], strides = [1, 1]} : vector<8x128xf32> to vector<8x32xf32>
    %432 = vector.extract_strided_slice %429 {offsets = [0, 96], sizes = [8, 32], strides = [1, 1]} : vector<8x128xf32> to vector<8x32xf32>
    %433 = vector.extract_strided_slice %424 {offsets = [0, 64], sizes = [8, 32], strides = [1, 1]} : vector<8x128xf32> to vector<8x32xf32>
    %434 = math.tanh %433 : vector<8x32xf32>
    %435 = arith.mulf %431, %395 : vector<8x32xf32>
    %436 = arith.mulf %430, %434 : vector<8x32xf32>
    %437 = arith.addf %435, %436 : vector<8x32xf32>
    %438 = math.tanh %437 : vector<8x32xf32>
    %439 = arith.mulf %432, %438 : vector<8x32xf32>
    %440 = vector.extract_strided_slice %11 {offsets = [10, 0, 0], sizes = [1, 8, 128], strides = [1, 1, 1]} : vector<16x8x128xf32> to vector<1x8x128xf32>
    %441 = vector.shape_cast %440 : vector<1x8x128xf32> to vector<8x128xf32>
    %442 = arith.truncf %417 : vector<8x32xf32> to vector<8x32xbf16>
    %cst_73 = arith.constant dense<0.000000e+00> : vector<8x128xf32>
    %443 = tpu.matmul %442, %12, %cst_73 {dimension_numbers = #tpu.dot_dimension_numbers<[1], [0], [0], [1], [0, 0, 1, 1], [], []>} : vector<8x32xbf16>, vector<32x128xbf16>, vector<8x128xf32> -> vector<8x128xf32>
    %444 = arith.addf %441, %443 : vector<8x128xf32>
    %445 = arith.negf %444 : vector<8x128xf32>
    %446 = math.exp %445 : vector<8x128xf32>
    %cst_74 = arith.constant 1.000000e+00 : f32
    %447 = vector.broadcast %cst_74 : f32 to vector<8x128xf32>
    %448 = arith.addf %447, %446 : vector<8x128xf32>
    %449 = arith.divf %447, %448 : vector<8x128xf32>
    %450 = vector.extract_strided_slice %449 {offsets = [0, 0], sizes = [8, 32], strides = [1, 1]} : vector<8x128xf32> to vector<8x32xf32>
    %451 = vector.extract_strided_slice %449 {offsets = [0, 32], sizes = [8, 32], strides = [1, 1]} : vector<8x128xf32> to vector<8x32xf32>
    %452 = vector.extract_strided_slice %449 {offsets = [0, 96], sizes = [8, 32], strides = [1, 1]} : vector<8x128xf32> to vector<8x32xf32>
    %453 = vector.extract_strided_slice %444 {offsets = [0, 64], sizes = [8, 32], strides = [1, 1]} : vector<8x128xf32> to vector<8x32xf32>
    %454 = math.tanh %453 : vector<8x32xf32>
    %455 = arith.mulf %451, %415 : vector<8x32xf32>
    %456 = arith.mulf %450, %454 : vector<8x32xf32>
    %457 = arith.addf %455, %456 : vector<8x32xf32>
    %458 = math.tanh %457 : vector<8x32xf32>
    %459 = arith.mulf %452, %458 : vector<8x32xf32>
    %460 = arith.truncf %459 : vector<8x32xf32> to vector<8x32xbf16>
    %cst_75 = arith.constant dense<0.000000e+00> : vector<8x128xf32>
    %461 = tpu.matmul %460, %13, %cst_75 {dimension_numbers = #tpu.dot_dimension_numbers<[1], [0], [0], [1], [0, 0, 1, 1], [], []>} : vector<8x32xbf16>, vector<32x128xbf16>, vector<8x128xf32> -> vector<8x128xf32>
    %462 = arith.truncf %439 : vector<8x32xf32> to vector<8x32xbf16>
    %cst_76 = arith.constant dense<0.000000e+00> : vector<8x128xf32>
    %463 = tpu.matmul %462, %14, %cst_76 {dimension_numbers = #tpu.dot_dimension_numbers<[1], [0], [0], [1], [0, 0, 1, 1], [], []>} : vector<8x32xbf16>, vector<32x128xbf16>, vector<8x128xf32> -> vector<8x128xf32>
    %464 = arith.addf %461, %463 : vector<8x128xf32>
    %465 = vector.broadcast %15 : vector<1x128xf32> to vector<8x128xf32>
    %466 = arith.addf %464, %465 : vector<8x128xf32>
    %467 = arith.negf %466 : vector<8x128xf32>
    %468 = math.exp %467 : vector<8x128xf32>
    %cst_77 = arith.constant 1.000000e+00 : f32
    %469 = vector.broadcast %cst_77 : f32 to vector<8x128xf32>
    %470 = arith.addf %469, %468 : vector<8x128xf32>
    %471 = arith.divf %469, %470 : vector<8x128xf32>
    %472 = vector.extract_strided_slice %471 {offsets = [0, 0], sizes = [8, 32], strides = [1, 1]} : vector<8x128xf32> to vector<8x32xf32>
    %473 = vector.extract_strided_slice %471 {offsets = [0, 32], sizes = [8, 32], strides = [1, 1]} : vector<8x128xf32> to vector<8x32xf32>
    %474 = vector.extract_strided_slice %471 {offsets = [0, 96], sizes = [8, 32], strides = [1, 1]} : vector<8x128xf32> to vector<8x32xf32>
    %475 = vector.extract_strided_slice %466 {offsets = [0, 64], sizes = [8, 32], strides = [1, 1]} : vector<8x128xf32> to vector<8x32xf32>
    %476 = math.tanh %475 : vector<8x32xf32>
    %477 = arith.mulf %473, %437 : vector<8x32xf32>
    %478 = arith.mulf %472, %476 : vector<8x32xf32>
    %479 = arith.addf %477, %478 : vector<8x32xf32>
    %480 = math.tanh %479 : vector<8x32xf32>
    %481 = arith.mulf %474, %480 : vector<8x32xf32>
    %482 = vector.extract_strided_slice %11 {offsets = [11, 0, 0], sizes = [1, 8, 128], strides = [1, 1, 1]} : vector<16x8x128xf32> to vector<1x8x128xf32>
    %483 = vector.shape_cast %482 : vector<1x8x128xf32> to vector<8x128xf32>
    %484 = arith.truncf %459 : vector<8x32xf32> to vector<8x32xbf16>
    %cst_78 = arith.constant dense<0.000000e+00> : vector<8x128xf32>
    %485 = tpu.matmul %484, %12, %cst_78 {dimension_numbers = #tpu.dot_dimension_numbers<[1], [0], [0], [1], [0, 0, 1, 1], [], []>} : vector<8x32xbf16>, vector<32x128xbf16>, vector<8x128xf32> -> vector<8x128xf32>
    %486 = arith.addf %483, %485 : vector<8x128xf32>
    %487 = arith.negf %486 : vector<8x128xf32>
    %488 = math.exp %487 : vector<8x128xf32>
    %cst_79 = arith.constant 1.000000e+00 : f32
    %489 = vector.broadcast %cst_79 : f32 to vector<8x128xf32>
    %490 = arith.addf %489, %488 : vector<8x128xf32>
    %491 = arith.divf %489, %490 : vector<8x128xf32>
    %492 = vector.extract_strided_slice %491 {offsets = [0, 0], sizes = [8, 32], strides = [1, 1]} : vector<8x128xf32> to vector<8x32xf32>
    %493 = vector.extract_strided_slice %491 {offsets = [0, 32], sizes = [8, 32], strides = [1, 1]} : vector<8x128xf32> to vector<8x32xf32>
    %494 = vector.extract_strided_slice %491 {offsets = [0, 96], sizes = [8, 32], strides = [1, 1]} : vector<8x128xf32> to vector<8x32xf32>
    %495 = vector.extract_strided_slice %486 {offsets = [0, 64], sizes = [8, 32], strides = [1, 1]} : vector<8x128xf32> to vector<8x32xf32>
    %496 = math.tanh %495 : vector<8x32xf32>
    %497 = arith.mulf %493, %457 : vector<8x32xf32>
    %498 = arith.mulf %492, %496 : vector<8x32xf32>
    %499 = arith.addf %497, %498 : vector<8x32xf32>
    %500 = math.tanh %499 : vector<8x32xf32>
    %501 = arith.mulf %494, %500 : vector<8x32xf32>
    %502 = arith.truncf %501 : vector<8x32xf32> to vector<8x32xbf16>
    %cst_80 = arith.constant dense<0.000000e+00> : vector<8x128xf32>
    %503 = tpu.matmul %502, %13, %cst_80 {dimension_numbers = #tpu.dot_dimension_numbers<[1], [0], [0], [1], [0, 0, 1, 1], [], []>} : vector<8x32xbf16>, vector<32x128xbf16>, vector<8x128xf32> -> vector<8x128xf32>
    %504 = arith.truncf %481 : vector<8x32xf32> to vector<8x32xbf16>
    %cst_81 = arith.constant dense<0.000000e+00> : vector<8x128xf32>
    %505 = tpu.matmul %504, %14, %cst_81 {dimension_numbers = #tpu.dot_dimension_numbers<[1], [0], [0], [1], [0, 0, 1, 1], [], []>} : vector<8x32xbf16>, vector<32x128xbf16>, vector<8x128xf32> -> vector<8x128xf32>
    %506 = arith.addf %503, %505 : vector<8x128xf32>
    %507 = vector.broadcast %15 : vector<1x128xf32> to vector<8x128xf32>
    %508 = arith.addf %506, %507 : vector<8x128xf32>
    %509 = arith.negf %508 : vector<8x128xf32>
    %510 = math.exp %509 : vector<8x128xf32>
    %cst_82 = arith.constant 1.000000e+00 : f32
    %511 = vector.broadcast %cst_82 : f32 to vector<8x128xf32>
    %512 = arith.addf %511, %510 : vector<8x128xf32>
    %513 = arith.divf %511, %512 : vector<8x128xf32>
    %514 = vector.extract_strided_slice %513 {offsets = [0, 0], sizes = [8, 32], strides = [1, 1]} : vector<8x128xf32> to vector<8x32xf32>
    %515 = vector.extract_strided_slice %513 {offsets = [0, 32], sizes = [8, 32], strides = [1, 1]} : vector<8x128xf32> to vector<8x32xf32>
    %516 = vector.extract_strided_slice %513 {offsets = [0, 96], sizes = [8, 32], strides = [1, 1]} : vector<8x128xf32> to vector<8x32xf32>
    %517 = vector.extract_strided_slice %508 {offsets = [0, 64], sizes = [8, 32], strides = [1, 1]} : vector<8x128xf32> to vector<8x32xf32>
    %518 = math.tanh %517 : vector<8x32xf32>
    %519 = arith.mulf %515, %479 : vector<8x32xf32>
    %520 = arith.mulf %514, %518 : vector<8x32xf32>
    %521 = arith.addf %519, %520 : vector<8x32xf32>
    %522 = math.tanh %521 : vector<8x32xf32>
    %523 = arith.mulf %516, %522 : vector<8x32xf32>
    %524 = vector.extract_strided_slice %11 {offsets = [12, 0, 0], sizes = [1, 8, 128], strides = [1, 1, 1]} : vector<16x8x128xf32> to vector<1x8x128xf32>
    %525 = vector.shape_cast %524 : vector<1x8x128xf32> to vector<8x128xf32>
    %526 = arith.truncf %501 : vector<8x32xf32> to vector<8x32xbf16>
    %cst_83 = arith.constant dense<0.000000e+00> : vector<8x128xf32>
    %527 = tpu.matmul %526, %12, %cst_83 {dimension_numbers = #tpu.dot_dimension_numbers<[1], [0], [0], [1], [0, 0, 1, 1], [], []>} : vector<8x32xbf16>, vector<32x128xbf16>, vector<8x128xf32> -> vector<8x128xf32>
    %528 = arith.addf %525, %527 : vector<8x128xf32>
    %529 = arith.negf %528 : vector<8x128xf32>
    %530 = math.exp %529 : vector<8x128xf32>
    %cst_84 = arith.constant 1.000000e+00 : f32
    %531 = vector.broadcast %cst_84 : f32 to vector<8x128xf32>
    %532 = arith.addf %531, %530 : vector<8x128xf32>
    %533 = arith.divf %531, %532 : vector<8x128xf32>
    %534 = vector.extract_strided_slice %533 {offsets = [0, 0], sizes = [8, 32], strides = [1, 1]} : vector<8x128xf32> to vector<8x32xf32>
    %535 = vector.extract_strided_slice %533 {offsets = [0, 32], sizes = [8, 32], strides = [1, 1]} : vector<8x128xf32> to vector<8x32xf32>
    %536 = vector.extract_strided_slice %533 {offsets = [0, 96], sizes = [8, 32], strides = [1, 1]} : vector<8x128xf32> to vector<8x32xf32>
    %537 = vector.extract_strided_slice %528 {offsets = [0, 64], sizes = [8, 32], strides = [1, 1]} : vector<8x128xf32> to vector<8x32xf32>
    %538 = math.tanh %537 : vector<8x32xf32>
    %539 = arith.mulf %535, %499 : vector<8x32xf32>
    %540 = arith.mulf %534, %538 : vector<8x32xf32>
    %541 = arith.addf %539, %540 : vector<8x32xf32>
    %542 = math.tanh %541 : vector<8x32xf32>
    %543 = arith.mulf %536, %542 : vector<8x32xf32>
    %544 = arith.truncf %543 : vector<8x32xf32> to vector<8x32xbf16>
    %cst_85 = arith.constant dense<0.000000e+00> : vector<8x128xf32>
    %545 = tpu.matmul %544, %13, %cst_85 {dimension_numbers = #tpu.dot_dimension_numbers<[1], [0], [0], [1], [0, 0, 1, 1], [], []>} : vector<8x32xbf16>, vector<32x128xbf16>, vector<8x128xf32> -> vector<8x128xf32>
    %546 = arith.truncf %523 : vector<8x32xf32> to vector<8x32xbf16>
    %cst_86 = arith.constant dense<0.000000e+00> : vector<8x128xf32>
    %547 = tpu.matmul %546, %14, %cst_86 {dimension_numbers = #tpu.dot_dimension_numbers<[1], [0], [0], [1], [0, 0, 1, 1], [], []>} : vector<8x32xbf16>, vector<32x128xbf16>, vector<8x128xf32> -> vector<8x128xf32>
    %548 = arith.addf %545, %547 : vector<8x128xf32>
    %549 = vector.broadcast %15 : vector<1x128xf32> to vector<8x128xf32>
    %550 = arith.addf %548, %549 : vector<8x128xf32>
    %551 = arith.negf %550 : vector<8x128xf32>
    %552 = math.exp %551 : vector<8x128xf32>
    %cst_87 = arith.constant 1.000000e+00 : f32
    %553 = vector.broadcast %cst_87 : f32 to vector<8x128xf32>
    %554 = arith.addf %553, %552 : vector<8x128xf32>
    %555 = arith.divf %553, %554 : vector<8x128xf32>
    %556 = vector.extract_strided_slice %555 {offsets = [0, 0], sizes = [8, 32], strides = [1, 1]} : vector<8x128xf32> to vector<8x32xf32>
    %557 = vector.extract_strided_slice %555 {offsets = [0, 32], sizes = [8, 32], strides = [1, 1]} : vector<8x128xf32> to vector<8x32xf32>
    %558 = vector.extract_strided_slice %555 {offsets = [0, 96], sizes = [8, 32], strides = [1, 1]} : vector<8x128xf32> to vector<8x32xf32>
    %559 = vector.extract_strided_slice %550 {offsets = [0, 64], sizes = [8, 32], strides = [1, 1]} : vector<8x128xf32> to vector<8x32xf32>
    %560 = math.tanh %559 : vector<8x32xf32>
    %561 = arith.mulf %557, %521 : vector<8x32xf32>
    %562 = arith.mulf %556, %560 : vector<8x32xf32>
    %563 = arith.addf %561, %562 : vector<8x32xf32>
    %564 = math.tanh %563 : vector<8x32xf32>
    %565 = arith.mulf %558, %564 : vector<8x32xf32>
    %566 = vector.extract_strided_slice %11 {offsets = [13, 0, 0], sizes = [1, 8, 128], strides = [1, 1, 1]} : vector<16x8x128xf32> to vector<1x8x128xf32>
    %567 = vector.shape_cast %566 : vector<1x8x128xf32> to vector<8x128xf32>
    %568 = arith.truncf %543 : vector<8x32xf32> to vector<8x32xbf16>
    %cst_88 = arith.constant dense<0.000000e+00> : vector<8x128xf32>
    %569 = tpu.matmul %568, %12, %cst_88 {dimension_numbers = #tpu.dot_dimension_numbers<[1], [0], [0], [1], [0, 0, 1, 1], [], []>} : vector<8x32xbf16>, vector<32x128xbf16>, vector<8x128xf32> -> vector<8x128xf32>
    %570 = arith.addf %567, %569 : vector<8x128xf32>
    %571 = arith.negf %570 : vector<8x128xf32>
    %572 = math.exp %571 : vector<8x128xf32>
    %cst_89 = arith.constant 1.000000e+00 : f32
    %573 = vector.broadcast %cst_89 : f32 to vector<8x128xf32>
    %574 = arith.addf %573, %572 : vector<8x128xf32>
    %575 = arith.divf %573, %574 : vector<8x128xf32>
    %576 = vector.extract_strided_slice %575 {offsets = [0, 0], sizes = [8, 32], strides = [1, 1]} : vector<8x128xf32> to vector<8x32xf32>
    %577 = vector.extract_strided_slice %575 {offsets = [0, 32], sizes = [8, 32], strides = [1, 1]} : vector<8x128xf32> to vector<8x32xf32>
    %578 = vector.extract_strided_slice %575 {offsets = [0, 96], sizes = [8, 32], strides = [1, 1]} : vector<8x128xf32> to vector<8x32xf32>
    %579 = vector.extract_strided_slice %570 {offsets = [0, 64], sizes = [8, 32], strides = [1, 1]} : vector<8x128xf32> to vector<8x32xf32>
    %580 = math.tanh %579 : vector<8x32xf32>
    %581 = arith.mulf %577, %541 : vector<8x32xf32>
    %582 = arith.mulf %576, %580 : vector<8x32xf32>
    %583 = arith.addf %581, %582 : vector<8x32xf32>
    %584 = math.tanh %583 : vector<8x32xf32>
    %585 = arith.mulf %578, %584 : vector<8x32xf32>
    %586 = arith.truncf %585 : vector<8x32xf32> to vector<8x32xbf16>
    %cst_90 = arith.constant dense<0.000000e+00> : vector<8x128xf32>
    %587 = tpu.matmul %586, %13, %cst_90 {dimension_numbers = #tpu.dot_dimension_numbers<[1], [0], [0], [1], [0, 0, 1, 1], [], []>} : vector<8x32xbf16>, vector<32x128xbf16>, vector<8x128xf32> -> vector<8x128xf32>
    %588 = arith.truncf %565 : vector<8x32xf32> to vector<8x32xbf16>
    %cst_91 = arith.constant dense<0.000000e+00> : vector<8x128xf32>
    %589 = tpu.matmul %588, %14, %cst_91 {dimension_numbers = #tpu.dot_dimension_numbers<[1], [0], [0], [1], [0, 0, 1, 1], [], []>} : vector<8x32xbf16>, vector<32x128xbf16>, vector<8x128xf32> -> vector<8x128xf32>
    %590 = arith.addf %587, %589 : vector<8x128xf32>
    %591 = vector.broadcast %15 : vector<1x128xf32> to vector<8x128xf32>
    %592 = arith.addf %590, %591 : vector<8x128xf32>
    %593 = arith.negf %592 : vector<8x128xf32>
    %594 = math.exp %593 : vector<8x128xf32>
    %cst_92 = arith.constant 1.000000e+00 : f32
    %595 = vector.broadcast %cst_92 : f32 to vector<8x128xf32>
    %596 = arith.addf %595, %594 : vector<8x128xf32>
    %597 = arith.divf %595, %596 : vector<8x128xf32>
    %598 = vector.extract_strided_slice %597 {offsets = [0, 0], sizes = [8, 32], strides = [1, 1]} : vector<8x128xf32> to vector<8x32xf32>
    %599 = vector.extract_strided_slice %597 {offsets = [0, 32], sizes = [8, 32], strides = [1, 1]} : vector<8x128xf32> to vector<8x32xf32>
    %600 = vector.extract_strided_slice %597 {offsets = [0, 96], sizes = [8, 32], strides = [1, 1]} : vector<8x128xf32> to vector<8x32xf32>
    %601 = vector.extract_strided_slice %592 {offsets = [0, 64], sizes = [8, 32], strides = [1, 1]} : vector<8x128xf32> to vector<8x32xf32>
    %602 = math.tanh %601 : vector<8x32xf32>
    %603 = arith.mulf %599, %563 : vector<8x32xf32>
    %604 = arith.mulf %598, %602 : vector<8x32xf32>
    %605 = arith.addf %603, %604 : vector<8x32xf32>
    %606 = math.tanh %605 : vector<8x32xf32>
    %607 = arith.mulf %600, %606 : vector<8x32xf32>
    %608 = vector.extract_strided_slice %11 {offsets = [14, 0, 0], sizes = [1, 8, 128], strides = [1, 1, 1]} : vector<16x8x128xf32> to vector<1x8x128xf32>
    %609 = vector.shape_cast %608 : vector<1x8x128xf32> to vector<8x128xf32>
    %610 = arith.truncf %585 : vector<8x32xf32> to vector<8x32xbf16>
    %cst_93 = arith.constant dense<0.000000e+00> : vector<8x128xf32>
    %611 = tpu.matmul %610, %12, %cst_93 {dimension_numbers = #tpu.dot_dimension_numbers<[1], [0], [0], [1], [0, 0, 1, 1], [], []>} : vector<8x32xbf16>, vector<32x128xbf16>, vector<8x128xf32> -> vector<8x128xf32>
    %612 = arith.addf %609, %611 : vector<8x128xf32>
    %613 = arith.negf %612 : vector<8x128xf32>
    %614 = math.exp %613 : vector<8x128xf32>
    %cst_94 = arith.constant 1.000000e+00 : f32
    %615 = vector.broadcast %cst_94 : f32 to vector<8x128xf32>
    %616 = arith.addf %615, %614 : vector<8x128xf32>
    %617 = arith.divf %615, %616 : vector<8x128xf32>
    %618 = vector.extract_strided_slice %617 {offsets = [0, 0], sizes = [8, 32], strides = [1, 1]} : vector<8x128xf32> to vector<8x32xf32>
    %619 = vector.extract_strided_slice %617 {offsets = [0, 32], sizes = [8, 32], strides = [1, 1]} : vector<8x128xf32> to vector<8x32xf32>
    %620 = vector.extract_strided_slice %617 {offsets = [0, 96], sizes = [8, 32], strides = [1, 1]} : vector<8x128xf32> to vector<8x32xf32>
    %621 = vector.extract_strided_slice %612 {offsets = [0, 64], sizes = [8, 32], strides = [1, 1]} : vector<8x128xf32> to vector<8x32xf32>
    %622 = math.tanh %621 : vector<8x32xf32>
    %623 = arith.mulf %619, %583 : vector<8x32xf32>
    %624 = arith.mulf %618, %622 : vector<8x32xf32>
    %625 = arith.addf %623, %624 : vector<8x32xf32>
    %626 = math.tanh %625 : vector<8x32xf32>
    %627 = arith.mulf %620, %626 : vector<8x32xf32>
    %628 = arith.truncf %627 : vector<8x32xf32> to vector<8x32xbf16>
    %cst_95 = arith.constant dense<0.000000e+00> : vector<8x128xf32>
    %629 = tpu.matmul %628, %13, %cst_95 {dimension_numbers = #tpu.dot_dimension_numbers<[1], [0], [0], [1], [0, 0, 1, 1], [], []>} : vector<8x32xbf16>, vector<32x128xbf16>, vector<8x128xf32> -> vector<8x128xf32>
    %630 = arith.truncf %607 : vector<8x32xf32> to vector<8x32xbf16>
    %cst_96 = arith.constant dense<0.000000e+00> : vector<8x128xf32>
    %631 = tpu.matmul %630, %14, %cst_96 {dimension_numbers = #tpu.dot_dimension_numbers<[1], [0], [0], [1], [0, 0, 1, 1], [], []>} : vector<8x32xbf16>, vector<32x128xbf16>, vector<8x128xf32> -> vector<8x128xf32>
    %632 = arith.addf %629, %631 : vector<8x128xf32>
    %633 = vector.broadcast %15 : vector<1x128xf32> to vector<8x128xf32>
    %634 = arith.addf %632, %633 : vector<8x128xf32>
    %635 = arith.negf %634 : vector<8x128xf32>
    %636 = math.exp %635 : vector<8x128xf32>
    %cst_97 = arith.constant 1.000000e+00 : f32
    %637 = vector.broadcast %cst_97 : f32 to vector<8x128xf32>
    %638 = arith.addf %637, %636 : vector<8x128xf32>
    %639 = arith.divf %637, %638 : vector<8x128xf32>
    %640 = vector.extract_strided_slice %639 {offsets = [0, 0], sizes = [8, 32], strides = [1, 1]} : vector<8x128xf32> to vector<8x32xf32>
    %641 = vector.extract_strided_slice %639 {offsets = [0, 32], sizes = [8, 32], strides = [1, 1]} : vector<8x128xf32> to vector<8x32xf32>
    %642 = vector.extract_strided_slice %639 {offsets = [0, 96], sizes = [8, 32], strides = [1, 1]} : vector<8x128xf32> to vector<8x32xf32>
    %643 = vector.extract_strided_slice %634 {offsets = [0, 64], sizes = [8, 32], strides = [1, 1]} : vector<8x128xf32> to vector<8x32xf32>
    %644 = math.tanh %643 : vector<8x32xf32>
    %645 = arith.mulf %641, %605 : vector<8x32xf32>
    %646 = arith.mulf %640, %644 : vector<8x32xf32>
    %647 = arith.addf %645, %646 : vector<8x32xf32>
    %648 = math.tanh %647 : vector<8x32xf32>
    %649 = arith.mulf %642, %648 : vector<8x32xf32>
    %650 = vector.extract_strided_slice %11 {offsets = [15, 0, 0], sizes = [1, 8, 128], strides = [1, 1, 1]} : vector<16x8x128xf32> to vector<1x8x128xf32>
    %651 = vector.shape_cast %650 : vector<1x8x128xf32> to vector<8x128xf32>
    %652 = arith.truncf %627 : vector<8x32xf32> to vector<8x32xbf16>
    %cst_98 = arith.constant dense<0.000000e+00> : vector<8x128xf32>
    %653 = tpu.matmul %652, %12, %cst_98 {dimension_numbers = #tpu.dot_dimension_numbers<[1], [0], [0], [1], [0, 0, 1, 1], [], []>} : vector<8x32xbf16>, vector<32x128xbf16>, vector<8x128xf32> -> vector<8x128xf32>
    %654 = arith.addf %651, %653 : vector<8x128xf32>
    %655 = arith.negf %654 : vector<8x128xf32>
    %656 = math.exp %655 : vector<8x128xf32>
    %cst_99 = arith.constant 1.000000e+00 : f32
    %657 = vector.broadcast %cst_99 : f32 to vector<8x128xf32>
    %658 = arith.addf %657, %656 : vector<8x128xf32>
    %659 = arith.divf %657, %658 : vector<8x128xf32>
    %660 = vector.extract_strided_slice %659 {offsets = [0, 0], sizes = [8, 32], strides = [1, 1]} : vector<8x128xf32> to vector<8x32xf32>
    %661 = vector.extract_strided_slice %659 {offsets = [0, 32], sizes = [8, 32], strides = [1, 1]} : vector<8x128xf32> to vector<8x32xf32>
    %662 = vector.extract_strided_slice %659 {offsets = [0, 96], sizes = [8, 32], strides = [1, 1]} : vector<8x128xf32> to vector<8x32xf32>
    %663 = vector.extract_strided_slice %654 {offsets = [0, 64], sizes = [8, 32], strides = [1, 1]} : vector<8x128xf32> to vector<8x32xf32>
    %664 = math.tanh %663 : vector<8x32xf32>
    %665 = arith.mulf %661, %625 : vector<8x32xf32>
    %666 = arith.mulf %660, %664 : vector<8x32xf32>
    %667 = arith.addf %665, %666 : vector<8x32xf32>
    %668 = math.tanh %667 : vector<8x32xf32>
    %669 = arith.mulf %662, %668 : vector<8x32xf32>
    %670 = arith.truncf %669 : vector<8x32xf32> to vector<8x32xbf16>
    %cst_100 = arith.constant dense<0.000000e+00> : vector<8x128xf32>
    %671 = tpu.matmul %670, %13, %cst_100 {dimension_numbers = #tpu.dot_dimension_numbers<[1], [0], [0], [1], [0, 0, 1, 1], [], []>} : vector<8x32xbf16>, vector<32x128xbf16>, vector<8x128xf32> -> vector<8x128xf32>
    %672 = arith.truncf %649 : vector<8x32xf32> to vector<8x32xbf16>
    %cst_101 = arith.constant dense<0.000000e+00> : vector<8x128xf32>
    %673 = tpu.matmul %672, %14, %cst_101 {dimension_numbers = #tpu.dot_dimension_numbers<[1], [0], [0], [1], [0, 0, 1, 1], [], []>} : vector<8x32xbf16>, vector<32x128xbf16>, vector<8x128xf32> -> vector<8x128xf32>
    %674 = arith.addf %671, %673 : vector<8x128xf32>
    %675 = vector.broadcast %15 : vector<1x128xf32> to vector<8x128xf32>
    %676 = arith.addf %674, %675 : vector<8x128xf32>
    %677 = arith.negf %676 : vector<8x128xf32>
    %678 = math.exp %677 : vector<8x128xf32>
    %cst_102 = arith.constant 1.000000e+00 : f32
    %679 = vector.broadcast %cst_102 : f32 to vector<8x128xf32>
    %680 = arith.addf %679, %678 : vector<8x128xf32>
    %681 = arith.divf %679, %680 : vector<8x128xf32>
    %682 = vector.extract_strided_slice %681 {offsets = [0, 0], sizes = [8, 32], strides = [1, 1]} : vector<8x128xf32> to vector<8x32xf32>
    %683 = vector.extract_strided_slice %681 {offsets = [0, 32], sizes = [8, 32], strides = [1, 1]} : vector<8x128xf32> to vector<8x32xf32>
    %684 = vector.extract_strided_slice %681 {offsets = [0, 96], sizes = [8, 32], strides = [1, 1]} : vector<8x128xf32> to vector<8x32xf32>
    %685 = vector.extract_strided_slice %676 {offsets = [0, 64], sizes = [8, 32], strides = [1, 1]} : vector<8x128xf32> to vector<8x32xf32>
    %686 = math.tanh %685 : vector<8x32xf32>
    %687 = arith.mulf %683, %647 : vector<8x32xf32>
    %688 = arith.mulf %682, %686 : vector<8x32xf32>
    %689 = arith.addf %687, %688 : vector<8x32xf32>
    %690 = math.tanh %689 : vector<8x32xf32>
    %691 = arith.mulf %684, %690 : vector<8x32xf32>
    %692 = vector.shape_cast %61 : vector<8x32xf32> to vector<1x8x32xf32>
    %693 = vector.shape_cast %103 : vector<8x32xf32> to vector<1x8x32xf32>
    %694 = vector.shape_cast %145 : vector<8x32xf32> to vector<1x8x32xf32>
    %695 = vector.shape_cast %187 : vector<8x32xf32> to vector<1x8x32xf32>
    %696 = vector.shape_cast %229 : vector<8x32xf32> to vector<1x8x32xf32>
    %697 = vector.shape_cast %271 : vector<8x32xf32> to vector<1x8x32xf32>
    %698 = vector.shape_cast %313 : vector<8x32xf32> to vector<1x8x32xf32>
    %699 = vector.shape_cast %355 : vector<8x32xf32> to vector<1x8x32xf32>
    %700 = vector.shape_cast %397 : vector<8x32xf32> to vector<1x8x32xf32>
    %701 = vector.shape_cast %439 : vector<8x32xf32> to vector<1x8x32xf32>
    %702 = vector.shape_cast %481 : vector<8x32xf32> to vector<1x8x32xf32>
    %703 = vector.shape_cast %523 : vector<8x32xf32> to vector<1x8x32xf32>
    %704 = vector.shape_cast %565 : vector<8x32xf32> to vector<1x8x32xf32>
    %705 = vector.shape_cast %607 : vector<8x32xf32> to vector<1x8x32xf32>
    %706 = vector.shape_cast %649 : vector<8x32xf32> to vector<1x8x32xf32>
    %707 = vector.shape_cast %691 : vector<8x32xf32> to vector<1x8x32xf32>
    %708 = tpu.concatenate %692, %693, %694, %695, %696, %697, %698, %699, %700, %701, %702, %703, %704, %705, %706, %707 in 0 : vector<1x8x32xf32>, vector<1x8x32xf32>, vector<1x8x32xf32>, vector<1x8x32xf32>, vector<1x8x32xf32>, vector<1x8x32xf32>, vector<1x8x32xf32>, vector<1x8x32xf32>, vector<1x8x32xf32>, vector<1x8x32xf32>, vector<1x8x32xf32>, vector<1x8x32xf32>, vector<1x8x32xf32>, vector<1x8x32xf32>, vector<1x8x32xf32>, vector<1x8x32xf32> -> vector<16x8x32xf32>
    %c0_103 = arith.constant 0 : index
    %c0_104 = arith.constant 0 : index
    %709 = vector.load %arg9[%c0_103, %c0_104] : memref<1x32xf32, #tpu.memory_space<vmem>>, vector<1x32xf32>
    %710 = vector.shape_cast %709 : vector<1x32xf32> to vector<1x1x32xf32>
    %711 = vector.broadcast %710 : vector<1x1x32xf32> to vector<16x8x32xf32>
    %712 = arith.mulf %708, %711 : vector<16x8x32xf32>
    %c0_105 = arith.constant 0 : index
    %c0_106 = arith.constant 0 : index
    %713 = vector.load %arg8[%c0_105, %c0_106] : memref<1x32xf32, #tpu.memory_space<vmem>>, vector<1x32xf32>
    %714 = vector.shape_cast %713 : vector<1x32xf32> to vector<1x1x32xf32>
    %715 = vector.broadcast %714 : vector<1x1x32xf32> to vector<16x8x32xf32>
    %716 = arith.addf %712, %715 : vector<16x8x32xf32>
    %c0_107 = arith.constant 0 : index
    %c0_108 = arith.constant 0 : index
    %c0_109 = arith.constant 0 : index
    %717 = vector.load %arg10[%c0_107, %c0_108, %c0_109] : memref<16x8x32xf32, #tpu.memory_space<vmem>>, vector<16x8x32xf32>
    tpu.vector_store %arg10[%c0_107, %c0_108, %c0_109], %716 {strides = array<i32>} : memref<16x8x32xf32, #tpu.memory_space<vmem>>, vector<16x8x32xf32>,
    %c0_110 = arith.constant 0 : index
    %c0_111 = arith.constant 0 : index
    %718 = vector.load %arg11[%c0_110, %c0_111] : memref<8x32xf32, #tpu.memory_space<vmem>>, vector<8x32xf32>
    tpu.vector_store %arg11[%c0_110, %c0_111], %669 {strides = array<i32>} : memref<8x32xf32, #tpu.memory_space<vmem>>, vector<8x32xf32>,
    %c0_112 = arith.constant 0 : index
    %c0_113 = arith.constant 0 : index
    %719 = vector.load %arg12[%c0_112, %c0_113] : memref<8x32xf32, #tpu.memory_space<vmem>>, vector<8x32xf32>
    tpu.vector_store %arg12[%c0_112, %c0_113], %667 {strides = array<i32>} : memref<8x32xf32, #tpu.memory_space<vmem>>, vector<8x32xf32>,
    %c0_114 = arith.constant 0 : index
    %c0_115 = arith.constant 0 : index
    %720 = vector.load %arg13[%c0_114, %c0_115] : memref<8x32xf32, #tpu.memory_space<vmem>>, vector<8x32xf32>
    tpu.vector_store %arg13[%c0_114, %c0_115], %691 {strides = array<i32>} : memref<8x32xf32, #tpu.memory_space<vmem>>, vector<8x32xf32>,
    %c0_116 = arith.constant 0 : index
    %c0_117 = arith.constant 0 : index
    %721 = vector.load %arg14[%c0_116, %c0_117] : memref<8x32xf32, #tpu.memory_space<vmem>>, vector<8x32xf32>
    tpu.vector_store %arg14[%c0_116, %c0_117], %689 {strides = array<i32>} : memref<8x32xf32, #tpu.memory_space<vmem>>, vector<8x32xf32>,
    return
  }
  func.func @transform_0(%arg0: i32) -> (i32, i32, i32) {
    %c0_i32 = arith.constant 0 : i32
    %c0_i32_0 = arith.constant 0 : i32
    %c0_i32_1 = arith.constant 0 : i32
    return %arg0, %c0_i32, %c0_i32_0 : i32, i32, i32
  }
  func.func @transform_1(%arg0: i32) -> (i32, i32) {
    %c0_i32 = arith.constant 0 : i32
    %c0_i32_0 = arith.constant 0 : i32
    %c0_i32_1 = arith.constant 0 : i32
    return %c0_i32, %c0_i32_0 : i32, i32
  }
  func.func @transform_2(%arg0: i32) -> (i32, i32) {
    %c0_i32 = arith.constant 0 : i32
    %c0_i32_0 = arith.constant 0 : i32
    %c0_i32_1 = arith.constant 0 : i32
    return %c0_i32, %c0_i32_0 : i32, i32
  }
  func.func @transform_3(%arg0: i32) -> (i32, i32) {
    %c0_i32 = arith.constant 0 : i32
    %c0_i32_0 = arith.constant 0 : i32
    %c0_i32_1 = arith.constant 0 : i32
    return %c0_i32, %c0_i32_0 : i32, i32
  }
  func.func @transform_4(%arg0: i32) -> (i32, i32) {
    %c0_i32 = arith.constant 0 : i32
    %c0_i32_0 = arith.constant 0 : i32
    %c0_i32_1 = arith.constant 0 : i32
    return %c0_i32, %c0_i32_0 : i32, i32
  }
  func.func @transform_5(%arg0: i32) -> (i32, i32) {
    %c0_i32 = arith.constant 0 : i32
    %c0_i32_0 = arith.constant 0 : i32
    %c0_i32_1 = arith.constant 0 : i32
    return %c0_i32, %c0_i32_0 : i32, i32
  }
  func.func @transform_6(%arg0: i32) -> (i32, i32) {
    %c0_i32 = arith.constant 0 : i32
    %c0_i32_0 = arith.constant 0 : i32
    %c0_i32_1 = arith.constant 0 : i32
    return %c0_i32, %c0_i32_0 : i32, i32
  }
  func.func @transform_7(%arg0: i32) -> (i32, i32) {
    %c0_i32 = arith.constant 0 : i32
    %c0_i32_0 = arith.constant 0 : i32
    %c0_i32_1 = arith.constant 0 : i32
    return %c0_i32, %c0_i32_0 : i32, i32
  }
  func.func @transform_8(%arg0: i32) -> (i32, i32) {
    %c0_i32 = arith.constant 0 : i32
    %c0_i32_0 = arith.constant 0 : i32
    %c0_i32_1 = arith.constant 0 : i32
    return %c0_i32, %c0_i32_0 : i32, i32
  }
  func.func @transform_9(%arg0: i32) -> (i32, i32, i32) {
    %c0_i32 = arith.constant 0 : i32
    %c0_i32_0 = arith.constant 0 : i32
    %c0_i32_1 = arith.constant 0 : i32
    return %arg0, %c0_i32, %c0_i32_0 : i32, i32, i32
  }
}

</mosaic_0001>

<bundles_post_ra>
// kernel: tpu_custom_call.1
= control target key start
LH: loop header
LB: loop body
LE: loop exit
PB: predicated region body
PF: predicated region fallthrough
CT: control target
= control target key end

     0   :  { %14 = vsyncpa [#allocation7], 0  ;;  %s5498_s0 = inlined_call_operand.hbm [shape: f32[16,8,16], index: 0, kind: input, shape index: {}]   ;;  %s5499_s1 = inlined_call_operand.hbm [shape: bf16[16,128], index: 1, kind: input, shape index: {}]   ;;  %s5500_s2 = inlined_call_operand.hbm [shape: bf16[32,128], index: 2, kind: input, shape index: {}]   ;;  %s5501_s3 = inlined_call_operand.vmem [shape: f32[1,128], index: 3, kind: input, shape index: {}]   ;;  %s5502_s4 = inlined_call_operand.hbm [shape: bf16[32,128], index: 4, kind: input, shape index: {}]   ;;  %s5503_s5 = inlined_call_operand.hbm [shape: bf16[32,128], index: 5, kind: input, shape index: {}]   ;;  %s5504_s6 = inlined_call_operand.vmem [shape: f32[1,128], index: 6, kind: input, shape index: {}]   ;;  %s5505_s7 = inlined_call_operand.vmem [shape: f32[1,32], index: 7, kind: input, shape index: {}]   ;;  %s5506_s8 = inlined_call_operand.vmem [shape: f32[1,32], index: 8, kind: input, shape index: {}]   ;;  %s5507_s9 = inlined_call_operand.hbm [shape: f32[16,8,32], index: 9, kind: output, shape index: {}]  }
   0x1   :  { %15 = vsyncpa [#allocation10], 0 }
   0x2   :  { %16 = vsyncpa [#allocation13], 0 }
   0x3   :  { %17 = vsyncpa [#allocation8], 0  ;;  %s4529_s30 = smov [#allocation9]  }
   0x4   :  { %s35_s10 = sshll.u32 %s4529_s30, 4  ;;  %s36_s10 = int_to_ptr.vmem [resolvable:$true] %s35_s10 }
   0x5   :  { %s4409_s11 = scalar_lea.vmem %s36_s10, 128  ;;  %p4414_p1 = scmp.lt.s32.totalorder %s36_s10, %s36_s10 }
   0x6   :  { %p4410_p0 = scmp.ne.s32.totalorder %s36_s10, %s4409_s11  ;;  %p4415_p2 = scmp.lt.s32.totalorder %s4409_s11, %s4409_s11 }
   0x8   :  { %p4416_p3 = por %p4415_p2, %p4414_p1 }
   0xa   :  { %p4417_p4 = pnand %p4416_p3, %p4410_p0 }
   0xc   :  { %4420 = shalt.err (!%p4417_p4)
}
   0xd   :  { %s4530_s12 = smov 64   ;;  %s4531_s13 = smov 4  }
   0xe   :  { %41 = dma.hbm_to_vmem [thread:$0]  %s5499_s1, 128, %s36_s10, [#allocation10], %s4530_s12, %s4530_s12, %s4531_s13  }
   0xf   :  { %s4532_s16 = smov [#allocation12]   ;;  %s4533_s18 = smov [#allocation6]  }
  0x10   :  { %s61_s17 = sshll.u32 %s4532_s16, 4  ;;  %s23_s19 = sshll.u32 %s4533_s18, 4  ;;  %s62_s17 = int_to_ptr.vmem [resolvable:$true] %s61_s17  ;;  %s24_s19 = int_to_ptr.vmem [resolvable:$true] %s23_s19 }
  0x11   :  { %s4429_s20 = scalar_lea.vmem %s62_s17, 256  ;;  %p4434_p6 = scmp.lt.s32.totalorder %s62_s17, %s62_s17 }
  0x12   :  { %p4430_p5 = scmp.ne.s32.totalorder %s62_s17, %s4429_s20  ;;  %p4435_p7 = scmp.lt.s32.totalorder %s4429_s20, %s4429_s20 }
  0x14   :  { %p4436_p8 = por %p4435_p7, %p4434_p6 }
  0x16   :  { %p4437_p9 = pnand %p4436_p8, %p4430_p5 }
  0x18   :  { %4440 = shalt.err (!%p4437_p9)
}
  0x19   :  { %67 = dma.hbm_to_vmem [thread:$0]  %s5502_s4, 256, %s62_s17, [#allocation13], %s4530_s12, %s4530_s12, %s4531_s13  }
  0x1a   :  { %s4449_s1 = scalar_lea.vmem %s24_s19, 2048  ;;  %p4454_p11 = scmp.lt.s32.totalorder %s24_s19, %s24_s19 }
  0x1b   :  { %p4450_p10 = scmp.ne.s32.totalorder %s24_s19, %s4449_s1  ;;  %p4455_p12 = scmp.lt.s32.totalorder %s4449_s1, %s4449_s1 }
  0x1d   :  { %p4456_p13 = por %p4455_p12, %p4454_p11 }
  0x1f   :  { %p4457_p0 = pnand %p4456_p13, %p4450_p10 }
  0x21   :  { %4460 = shalt.err (!%p4457_p0)
}
  0x22   :  { %s4534_s23 = smov 128   ;;  %s4535_s24 = smov 8  }
  0x23   :  { %29 = dma.hbm_to_vmem [thread:$0]  %s5498_s0, 2048, %s24_s19, [#allocation7], %s4534_s23, %s4534_s23, %s4535_s24  }
  0x24   :  { %s4536_s27 = smov [#allocation11]   ;;  %s4537_s4 = smov [#allocation14]  }
  0x25   :  { %s47_s28 = sshll.u32 %s4536_s27, 4  ;;  %s73_s29 = sshll.u32 %s4537_s4, 4  ;;  %s48_s28 = int_to_ptr.vmem [resolvable:$true] %s47_s28  ;;  %s74_s29 = int_to_ptr.vmem [resolvable:$true] %s73_s29 }
  0x26   :  { %s4469_s30 = scalar_lea.vmem %s48_s28, 256  ;;  %p4474_p2 = scmp.lt.s32.totalorder %s48_s28, %s48_s28 }
  0x27   :  { %p4470_p1 = scmp.ne.s32.totalorder %s48_s28, %s4469_s30  ;;  %p4475_p3 = scmp.lt.s32.totalorder %s4469_s30, %s4469_s30 }
  0x29   :  { %p4476_p4 = por %p4475_p3, %p4474_p2 }
  0x2b   :  { %p4477_p5 = pnand %p4476_p4, %p4470_p1 }
  0x2d   :  { %4480 = shalt.err (!%p4477_p5)
}
  0x2e   :  { %53 = dma.hbm_to_vmem [thread:$0]  %s5500_s2, 256, %s48_s28, [#allocation10], %s4530_s12, %s4530_s12, %s4531_s13  }
  0x2f   :  { %s4489_s0 = scalar_lea.vmem %s74_s29, 256  ;;  %p4494_p7 = scmp.lt.s32.totalorder %s74_s29, %s74_s29 }
  0x30   :  { %p4490_p6 = scmp.ne.s32.totalorder %s74_s29, %s4489_s0  ;;  %p4495_p8 = scmp.lt.s32.totalorder %s4489_s0, %s4489_s0 }
  0x32   :  { %p4496_p9 = por %p4495_p8, %p4494_p7 }
  0x34   :  { %p4497_p10 = pnand %p4496_p9, %p4490_p6 }
  0x36   :  { %4500 = shalt.err (!%p4497_p10)
}
  0x37   :  { %79 = dma.hbm_to_vmem [thread:$0]  %s5503_s5, 256, %s74_s29, [#allocation13], %s4530_s12, %s4530_s12, %s4531_s13  }
  0x38   :  { %4521 = dma.done.wait [#allocation7], 2048  }
  0x39   :  { %4522 = vsyncadd [#allocation7], 4294965248 }
  0x3a   :  { %4523 = dma.done.wait [#allocation10], 384  }
  0x3b   :  { %4524 = vsyncadd [#allocation10], 4294966912 }
  0x3c   :  { %4525 = dma.done.wait [#allocation13], 512  }
  0x3d   :  { %4526 = vsyncadd [#allocation13], 4294966784  ;;  %vm106_vm0 = vcmask 261120   ;;  %v4538_v0 = vmov 0.0   ;;  %vm4539_vm1 = vmmov 0   ;;  %v4122_v1 = vld [vmem:[#allocation9] sm:$0xff]  }
  0x3e   :  { %3724 = vmatprep.subr.bf16.mxu1 %v4538_v0  ;;  %3728 = vmatprep.mubr.msk.bf16.mxu1 %vm4539_vm1, %v4538_v0  ;;  %107 = vst.msk [vmem:[#allocation2] sm:$0xff] %vm106_vm0, %v4538_v0  ;;  %108 = vst.msk [vmem:[#allocation3] sm:$0xff] %vm106_vm0, %v4538_v0  ;;  %v4634_v2 = vld [vmem:[#allocation11 + $0x8] sm:$0xff]   ;;  %v111_v3 = vld [vmem:[#allocation6] sm:$0xff]  ;;  %vm150_vm2 = vcmask 130048   ;;  %s4540_s13 = smov 32  }
  0x3f   :  { %109 = vst.msk [vmem:[#allocation4] sm:$0xff] %vm106_vm0, %v4538_v0  ;;  %110 = vst.msk [vmem:[#allocation5] sm:$0xff] %vm106_vm0, %v4538_v0  ;;  %3706 = vmatprep.subr.bf16.mxu0 %v4122_v1  ;;  %v112_v4 = vld [vmem:[#allocation6 + $0x8] sm:$0xff]  ;;  %v113_v5 = vld [vmem:[#allocation6 + $0x10] sm:$0xff]  ;;  %3725 = vmatpush3.bf16.msra.mxu1 %v4634_v2  ;;  %s4541_s27 = smov 96  }
  0x40   :  { %3707 = vmatpush3.bf16.msra.mxu0 %v4122_v1  ;;  %v127_v6 = vpack.c.bf16 %v112_v4, %v111_v3  ;;  %v114_v7 = vld [vmem:[#allocation6 + $0x18] sm:$0xff]  ;;  %3726 = vmatprep.subr.bf16.mxu1 %v4538_v0  ;;  %v4638_v9 = vld [vmem:[#allocation11] sm:$0xff]   ;;  %v4653_v13 = vld [vmem:[%s5501_s3] ss:$0 sm:$0xff] }
  0x41   :  { %v128_v8 = vpack.c.bf16 %v114_v7, %v113_v5  ;;  %3756 = vmatprep.subr.bf16.mxu0 %v4538_v0  ;;  %v4662_v33 = vld [vmem:[#allocation14 + $0x8] sm:$0xff]   ;;  %v4665_v34 = vld [vmem:[#allocation14] sm:$0xff]   ;;  %v4671_v37 = vld [vmem:[#allocation12 + $0x8] sm:$0xff]  }
  0x42   :  { %3708 = vmatprep.mubr.msk.bf16.mxu0 %vm150_vm2, %v127_v6  ;;  %v4679_v39 = vld [vmem:[#allocation12] sm:$0xff]   ;;  %v4706_v49 = vld [vmem:[%s5504_s6] ss:$0 sm:$0xff] }
  0x43   :  { %3709 = vmatmul.mubr.msk.bf16.vlgmr.msra.gmra.mxu0 %vm150_vm2, %v128_v8  ;;  %3727 = vmatpush3.bf16.msra.mxu1 %v4638_v9 }
  0x44   :  { %3732 = vmatprep.subr.bf16.mxu1 %v4538_v0  ;;  %3757 = vmatpush3.bf16.msra.mxu0 %v4662_v33 }
  0x45   :  { %v285_v10 = vld [vmem:[#allocation2] sm:$0xff]  ;;  %v286_v22 = vld [vmem:[#allocation3] sm:$0xff]  ;;  %3758 = vmatprep.subr.bf16.mxu0 %v4538_v0 }
  0x46   :  { %v289_v11 = vpack.c.bf16 %v285_v10, %v285_v10  ;;  %v287_v35 = vld [vmem:[#allocation4] sm:$0xff]  ;;  %v288_v1 = vld [vmem:[#allocation5] sm:$0xff] }
  0x47   :  { %v376_v36 = vpack.c.bf16 %v287_v35, %v287_v35  ;;  %v120_v35 = vld [vmem:[#allocation6 + $0x48] sm:$0xff] }
  0x48   :  { %3729 = vmatmul.mubr.msk.bf16.vlgmr.msra.gmra.mxu1 %vm106_vm0, %v289_v11  ;;  %3759 = vmatpush3.bf16.msra.mxu0 %v4665_v34 }
  0x49   :  { %3736 = vmatprep.mubr.msk.bf16.mxu1 %vm4539_vm1, %v4538_v0  ;;  %3733 = vmatpush3.bf16.msra.mxu1 %v4662_v33 }
  0x4a   :  { %3734 = vmatprep.subr.bf16.mxu1 %v4538_v0  ;;  %3772 = vmatprep.subr.bf16.mxu0 %v4538_v0 }
  0x4d   :  { %3735 = vmatpush3.bf16.msra.mxu1 %v4665_v34 }
  0x4e   :  { %3740 = vmatprep.subr.bf16.mxu1 %v4538_v0 }
  0x50   :  { %3737 = vmatmul.mubr.msk.bf16.vlgmr.msra.gmra.mxu1 %vm106_vm0, %v376_v36 }
  0x51   :  { %3741 = vmatpush3.bf16.msra.mxu1 %v4671_v37  ;;  %3744 = vmatprep.mubr.msk.bf16.mxu1 %vm4539_vm1, %v4538_v0 }
  0x52   :  { %3742 = vmatprep.subr.bf16.mxu1 %v4538_v0 }
  0x55   :  { %3743 = vmatpush3.bf16.msra.mxu1 %v4679_v39 }
  0x56   :  { %3748 = vmatprep.subr.bf16.mxu1 %v4538_v0 }
 0x103   :  { %v4648_v12 = vpop.f32.mrf.mxu0 }
 0x105   :  { %v209_v14 = vpop.f32.mrf.mxu0 }
 0x106   :  { %v210_v15 = vadd.f32 %v4653_v13, %v209_v14 }
 0x107   :  { %v4701_v48 = vpop.f32.mrf.mxu0 }
 0x108   :  { %v340_v16 = vpop.f32.mrf.mxu1 }
 0x109   :  { %v346_v17 = vadd.f32 %v340_v16, %v210_v15  ;;  %v212_v54 = vpop.f32.mrf.mxu0 }
 0x10a   :  { %v3730_v18 = vpop.f32.mrf.mxu1  ;;  %v213_v57 = vadd.f32 %v4653_v13, %v212_v54 }
 0x10b   :  { %4129 = vtanh.f32 %v346_v17  ;;  %v3467_v23 = vmul.f32 -1.442695, %v346_v17 }
 0x10c   :  { %v343_v19 = vpop.f32.mrf.mxu1 }
 0x10d   :  { %4131 = vpow2.f32 %v3467_v23 }
 0x10e   :  { %v3731_v20 = vpop.f32.mrf.mxu1 }
 0x110   :  { %v426_v43 = vpop.f32.mrf.mxu1 }
 0x112   :  { %v3738_v44 = vpop.f32.mrf.mxu1 }
 0x114   :  { %v429_v45 = vpop.f32.mrf.mxu1 }
 0x116   :  { %v3739_v46 = vpop.f32.mrf.mxu1 }
 0x118   :  { %v4130_v21 = vpop.eup %4129 }
 0x119   :  { %360 = vrot.lane.b32.xlu0 %v4130_v21, %s4530_s12 }
 0x11a   :  { %v4132_v24 = vpop.eup %4131 }
 0x11b   :  { %v350_v25 = vadd.f32 1.0, %v4132_v24 }
 0x11d   :  { %355 = vrot.lane.b32.xlu0 %v286_v22, %s4540_s13  ;;  %4133 = vrcp.f32 %v350_v25 }
 0x12a   :  { %v4134_v26 = vpop.eup %4133 }
 0x18b   :  { %v361_v27 = vpop.permute.xlu0 %360 }
 0x18c   :  { %v363_v28 = vmul.f32 %v4134_v26, %v361_v27  ;;  %v116_v27 = vld [vmem:[#allocation6 + $0x28] sm:$0xff] }
 0x18e   :  { %365 = vrot.lane.b32.xlu1 %v363_v28, %s4540_s13  ;;  %v117_v28 = vld [vmem:[#allocation6 + $0x30] sm:$0xff] }
 0x18f   :  { %v356_v29 = vpop.permute.xlu0 %355 }
 0x190   :  { %v358_v30 = vmul.f32 %v4134_v26, %v356_v29 }
 0x200   :  { %v366_v31 = vpop.permute.xlu1 %365 }
 0x201   :  { %v4659_v32 = vadd.f32 %v366_v31, %v358_v30  ;;  %v118_v30 = vld [vmem:[#allocation6 + $0x38] sm:$0xff]  ;;  %v119_v31 = vld [vmem:[#allocation6 + $0x40] sm:$0xff] }
 0x203   :  { %4135 = vtanh.f32 %v4659_v32 }
 0x210   :  { %v4136_v38 = vpop.eup %4135 }
 0x211   :  { %371 = vrot.lane.b32.xlu1 %v4136_v38, %s4530_s12  ;;  %v130_v38 = vpack.c.bf16 %v118_v30, %v117_v28 }
 0x283   :  { %v372_v40 = vpop.permute.xlu1 %371 }
 0x284   :  { %v374_v41 = vmul.f32 %v4134_v26, %v372_v40  ;;  %v115_v26 = vld [vmem:[#allocation6 + $0x20] sm:$0xff]  ;;  %v131_v40 = vpack.c.bf16 %v120_v35, %v119_v31 }
 0x285   :  { %v129_v29 = vpack.c.bf16 %v116_v27, %v115_v26 }
 0x286   :  { %v375_v42 = vpack.c.bf16 %v374_v41, %v374_v41  ;;  %v122_v41 = vld [vmem:[#allocation6 + $0x58] sm:$0xff] }
 0x287   :  { %3712 = vmatprep.mubr.msk.bf16.mxu0 %vm150_vm2, %v129_v29 }
 0x288   :  { %433 = vrot.lane.b32.xlu0 %v375_v42, %s4540_s13  ;;  %3713 = vmatmul.mubr.msk.bf16.gmra.mxu0 %vm150_vm2, %v130_v38  ;;  %v123_v42 = vld [vmem:[#allocation6 + $0x60] sm:$0xff] }
 0x289   :  { %3716 = vmatprep.mubr.msk.bf16.mxu0 %vm150_vm2, %v131_v40 }
 0x2fa   :  { %v434_v47 = vpop.permute.xlu0 %433 }
 0x2fb   :  { %3745 = vmatmul.mubr.msk.bf16.vlgmr.msra.gmra.mxu1 %vm106_vm0, %v434_v47 }
 0x2fc   :  { %3749 = vmatpush3.bf16.msra.mxu1 %v4634_v2  ;;  %3752 = vmatprep.mubr.msk.bf16.mxu1 %vm4539_vm1, %v4538_v0 }
 0x2fd   :  { %3750 = vmatprep.subr.bf16.mxu1 %v4538_v0 }
 0x300   :  { %3751 = vmatpush3.bf16.msra.mxu1 %v4638_v9 }
 0x301   :  { %3764 = vmatprep.subr.bf16.mxu1 %v4538_v0 }
 0x303   :  { %3753 = vmatmul.mubr.msk.bf16.vlgmr.msra.gmra.mxu1 %vm106_vm0, %v434_v47  ;;  %v125_v47 = vld [vmem:[#allocation6 + $0x70] sm:$0xff] }
 0x304   :  { %3765 = vmatpush3.bf16.msra.mxu1 %v4671_v37  ;;  %3768 = vmatprep.mubr.msk.bf16.mxu1 %vm4539_vm1, %v4538_v0 }
 0x305   :  { %3766 = vmatprep.subr.bf16.mxu1 %v4538_v0 }
 0x308   :  { %3767 = vmatpush3.bf16.msra.mxu1 %v4679_v39 }
 0x309   :  { %3780 = vmatprep.subr.bf16.mxu1 %v4538_v0 }
 0x3bb   :  { %v484_v50 = vpop.f32.mrf.mxu1 }
 0x3bc   :  { %v485_v51 = vadd.f32 %v484_v50, %v426_v43  ;;  %v124_v43 = vld [vmem:[#allocation6 + $0x68] sm:$0xff]  ;;  %v126_v50 = vld [vmem:[#allocation6 + $0x78] sm:$0xff] }
 0x3bd   :  { %v3746_v52 = vpop.f32.mrf.mxu1  ;;  %v133_v46 = vpack.c.bf16 %v124_v43, %v123_v42 }
 0x3be   :  { %v496_v53 = vadd.f32 %v4706_v49, %v485_v51  ;;  %v134_v51 = vpack.c.bf16 %v126_v50, %v125_v47 }
 0x3bf   :  { %v487_v55 = vpop.f32.mrf.mxu1 }
 0x3c0   :  { %4137 = vtanh.f32 %v496_v53  ;;  %v3475_v4 = vmul.f32 -1.442695, %v496_v53 }
 0x3c1   :  { %v3747_v56 = vpop.f32.mrf.mxu1 }
 0x3c3   :  { %v559_v58 = vpop.f32.mrf.mxu1 }
 0x3c4   :  { %v565_v59 = vadd.f32 %v559_v58, %v213_v57 }
 0x3c5   :  { %v3754_v60 = vpop.f32.mrf.mxu1 }
 0x3c6   :  { %4139 = vtanh.f32 %v565_v59  ;;  %v3477_v5 = vmul.f32 -1.442695, %v565_v59  ;;  %v4759_v60 = vpop.f32.mrf.mxu0 }
 0x3c7   :  { %v562_v61 = vpop.f32.mrf.mxu1  ;;  %4141 = vpow2.f32 %v3475_v4 }
 0x3c8   :  { %4143 = vpow2.f32 %v3477_v5  ;;  %v4761_v61 = vpop.f32.mrf.mxu0 }
 0x3c9   :  { %v3755_v62 = vpop.f32.mrf.mxu1 }
 0x3ca   :  { %v4763_v62 = vpop.f32.mrf.mxu0 }
 0x3cd   :  { %v4138_v63 = vpop.eup %4137 }
 0x3ce   :  { %510 = vrot.lane.b32.xlu1 %v4138_v63, %s4530_s12  ;;  %v4765_v63 = vpop.f32.mrf.mxu0 }
 0x3d2   :  { %505 = vrot.lane.b32.xlu1 %v288_v1, %s4540_s13 }
 0x3d3   :  { %v4140_v3 = vpop.eup %4139 }
 0x3d4   :  { %575 = vrot.lane.b32.xlu0 %v4140_v3, %s4530_s12  ;;  %v4142_v6 = vpop.eup %4141 }
 0x3d5   :  { %v500_v7 = vadd.f32 1.0, %v4142_v6  ;;  %v4144_v8 = vpop.eup %4143 }
 0x3d6   :  { %v569_v10 = vadd.f32 1.0, %v4144_v8 }
 0x3d7   :  { %4145 = vrcp.f32 %v500_v7 }
 0x3d8   :  { %4147 = vrcp.f32 %v569_v10 }
 0x3e4   :  { %v4146_v11 = vpop.eup %4145 }
 0x3e5   :  { %v4148_v16 = vpop.eup %4147 }
 0x3e6   :  { %v573_v23 = vmul.f32 %v4148_v16, %v4659_v32  ;;  %v121_v32 = vld [vmem:[#allocation6 + $0x50] sm:$0xff] }
 0x3e7   :  { %v132_v45 = vpack.c.bf16 %v122_v41, %v121_v32 }
 0x3e9   :  { %3717 = vmatmul.mubr.msk.bf16.gmra.mxu0 %vm150_vm2, %v132_v45 }
 0x3ea   :  { %3720 = vmatprep.mubr.msk.bf16.mxu0 %vm150_vm2, %v133_v46 }
 0x3f1   :  { %3721 = vmatmul.mubr.msk.bf16.gmra.mxu0 %vm150_vm2, %v134_v51 }
 0x3f2   :  { %3760 = vmatprep.mubr.msk.bf16.mxu0 %vm4539_vm1, %v4538_v0 }
 0x440   :  { %v511_v14 = vpop.permute.xlu1 %510 }
 0x441   :  { %v513_v15 = vmul.f32 %v4146_v11, %v511_v14 }
 0x443   :  { %515 = vrot.lane.b32.xlu0 %v513_v15, %s4540_s13 }
 0x444   :  { %v506_v19 = vpop.permute.xlu1 %505 }
 0x445   :  { %v508_v20 = vmul.f32 %v4146_v11, %v506_v19 }
 0x446   :  { %v576_v17 = vpop.permute.xlu0 %575 }
 0x447   :  { %v578_v18 = vmul.f32 %v4148_v16, %v576_v17 }
 0x449   :  { %580 = vrot.lane.b32.xlu1 %v578_v18, %s4540_s13  ;;  %v218_v18 = vadd.f32 %v4648_v12, %v4653_v13 }
 0x4a9   :  { %v4767_v1 = vpop.f32.mrf.mxu0 }
 0x4ab   :  { %v4769_v3 = vpop.f32.mrf.mxu0 }
 0x4ad   :  { %v4771_v4 = vpop.f32.mrf.mxu0 }
 0x4af   :  { %v4773_v5 = vpop.f32.mrf.mxu0 }
 0x4b1   :  { %v4775_v6 = vpop.f32.mrf.mxu0 }
 0x4b3   :  { %v4777_v7 = vpop.f32.mrf.mxu0 }
 0x4b5   :  { %v516_v21 = vpop.permute.xlu0 %515  ;;  %v4779_v8 = vpop.f32.mrf.mxu0 }
 0x4b6   :  { %v4715_v22 = vadd.f32 %v516_v21, %v508_v20 }
 0x4b7   :  { %v4781_v10 = vpop.f32.mrf.mxu0 }
 0x4b8   :  { %4149 = vtanh.f32 %v4715_v22 }
 0x4bb   :  { %v581_v24 = vpop.permute.xlu1 %580 }
 0x4bc   :  { %v4719_v25 = vadd.f32 %v581_v24, %v573_v23 }
 0x4be   :  { %4151 = vtanh.f32 %v4719_v25 }
 0x4c5   :  { %v4150_v36 = vpop.eup %4149 }
 0x4c6   :  { %521 = vrot.lane.b32.xlu0 %v4150_v36, %s4530_s12 }
 0x4cb   :  { %v4152_v44 = vpop.eup %4151 }
 0x4cc   :  { %586 = vrot.lane.b32.xlu1 %v4152_v44, %s4530_s12 }
 0x538   :  { %v522_v52 = vpop.permute.xlu0 %521 }
 0x539   :  { %v4732_v53 = vmul.f32 %v4146_v11, %v522_v52 }
 0x53b   :  { %v591_v54 = vpack.c.bf16 %v4732_v53, %v4732_v53 }
 0x53d   :  { %593 = vrot.lane.b32.xlu0 %v591_v54, %s4540_s13 }
 0x53e   :  { %v587_v55 = vpop.permute.xlu1 %586 }
 0x53f   :  { %v589_v56 = vmul.f32 %v4148_v16, %v587_v55 }
 0x541   :  { %v590_v57 = vpack.c.bf16 %v589_v56, %v589_v56 }
 0x543   :  { %639 = vrot.lane.b32.xlu1 %v590_v57, %s4540_s13 }
 0x5af   :  { %v594_v58 = vpop.permute.xlu0 %593 }
 0x5b0   :  { %3761 = vmatmul.mubr.msk.bf16.vlgmr.msra.gmra.mxu0 %vm106_vm0, %v594_v58 }
 0x5b1   :  { %3773 = vmatpush3.bf16.msra.mxu0 %v4634_v2  ;;  %3776 = vmatprep.mubr.msk.bf16.mxu0 %vm4539_vm1, %v4538_v0 }
 0x5b2   :  { %3774 = vmatprep.subr.bf16.mxu0 %v4538_v0 }
 0x5b5   :  { %3775 = vmatpush3.bf16.msra.mxu0 %v4638_v9  ;;  %v640_v59 = vpop.permute.xlu1 %639 }
 0x5b6   :  { %3769 = vmatmul.mubr.msk.bf16.vlgmr.msra.gmra.mxu1 %vm106_vm0, %v640_v59  ;;  %3788 = vmatprep.subr.bf16.mxu0 %v4538_v0 }
 0x5b7   :  { %3781 = vmatpush3.bf16.msra.mxu1 %v4662_v33  ;;  %3784 = vmatprep.mubr.msk.bf16.mxu1 %vm4539_vm1, %v4538_v0 }
 0x5b8   :  { %3777 = vmatmul.mubr.msk.bf16.vlgmr.msra.gmra.mxu0 %vm106_vm0, %v640_v59  ;;  %3782 = vmatprep.subr.bf16.mxu1 %v4538_v0 }
 0x5b9   :  { %3789 = vmatpush3.bf16.msra.mxu0 %v4671_v37  ;;  %3792 = vmatprep.mubr.msk.bf16.mxu0 %vm4539_vm1, %v4538_v0 }
 0x5ba   :  { %3790 = vmatprep.subr.bf16.mxu0 %v4538_v0 }
 0x5bb   :  { %3783 = vmatpush3.bf16.msra.mxu1 %v4665_v34 }
 0x5bc   :  { %3796 = vmatprep.subr.bf16.mxu1 %v4538_v0 }
 0x5bd   :  { %3791 = vmatpush3.bf16.msra.mxu0 %v4679_v39 }
 0x5be   :  { %3804 = vmatprep.subr.bf16.mxu0 %v4538_v0 }
 0x670   :  { %v632_v11 = vpop.f32.mrf.mxu0 }
 0x672   :  { %v3762_v14 = vpop.f32.mrf.mxu0 }
 0x674   :  { %v635_v15 = vpop.f32.mrf.mxu0 }
 0x676   :  { %v3763_v16 = vpop.f32.mrf.mxu0  ;;  %v678_v17 = vpop.f32.mrf.mxu1 }
 0x677   :  { %v679_v19 = vadd.f32 %v678_v17, %v632_v11 }
 0x678   :  { %v3770_v20 = vpop.f32.mrf.mxu1  ;;  %v743_v21 = vpop.f32.mrf.mxu0 }
 0x679   :  { %v684_v23 = vadd.f32 %v4706_v49, %v679_v19  ;;  %v749_v24 = vadd.f32 %v743_v21, %v218_v18 }
 0x67a   :  { %v681_v26 = vpop.f32.mrf.mxu1  ;;  %v3778_v27 = vpop.f32.mrf.mxu0 }
 0x67b   :  { %4153 = vtanh.f32 %v684_v23  ;;  %v3480_v12 = vmul.f32 -1.442695, %v684_v23  ;;  %v3482_v36 = vmul.f32 -1.442695, %v749_v24 }
 0x67c   :  { %4155 = vtanh.f32 %v749_v24  ;;  %v3771_v28 = vpop.f32.mrf.mxu1  ;;  %v746_v29 = vpop.f32.mrf.mxu0 }
 0x67d   :  { %4157 = vpow2.f32 %v3480_v12  ;;  %v221_v29 = vadd.f32 %v4701_v48, %v4653_v13 }
 0x67e   :  { %v3779_v30 = vpop.f32.mrf.mxu0  ;;  %4159 = vpow2.f32 %v3482_v36 }
 0x688   :  { %v4154_v31 = vpop.eup %4153 }
 0x689   :  { %v4156_v35 = vpop.eup %4155  ;;  %694 = vrot.lane.b32.xlu0 %v4154_v31, %s4530_s12 }
 0x68a   :  { %759 = vrot.lane.b32.xlu1 %v4156_v35, %s4530_s12  ;;  %v4158_v38 = vpop.eup %4157 }
 0x68b   :  { %v4160_v40 = vpop.eup %4159  ;;  %v688_v32 = vadd.f32 1.0, %v4158_v38 }
 0x68c   :  { %v753_v41 = vadd.f32 1.0, %v4160_v40 }
 0x68d   :  { %4161 = vrcp.f32 %v688_v32 }
 0x68e   :  { %4163 = vrcp.f32 %v753_v41 }
 0x69a   :  { %v4162_v42 = vpop.eup %4161 }
 0x69b   :  { %v4164_v44 = vpop.eup %4163  ;;  %v692_v50 = vmul.f32 %v4162_v42, %v4715_v22 }
 0x69c   :  { %v757_v51 = vmul.f32 %v4164_v44, %v4719_v25 }
 0x6fb   :  { %v695_v43 = vpop.permute.xlu0 %694 }
 0x6fc   :  { %v760_v45 = vpop.permute.xlu1 %759  ;;  %v697_v46 = vmul.f32 %v4162_v42, %v695_v43 }
 0x6fd   :  { %v762_v47 = vmul.f32 %v4164_v44, %v760_v45 }
 0x6fe   :  { %699 = vrot.lane.b32.xlu0 %v697_v46, %s4540_s13 }
 0x6ff   :  { %764 = vrot.lane.b32.xlu1 %v762_v47, %s4540_s13 }
 0x770   :  { %v700_v52 = vpop.permute.xlu0 %699 }
 0x771   :  { %v765_v54 = vpop.permute.xlu1 %764  ;;  %v4792_v55 = vadd.f32 %v700_v52, %v692_v50 }
 0x772   :  { %v4794_v56 = vadd.f32 %v765_v54, %v757_v51 }
 0x773   :  { %4165 = vtanh.f32 %v4792_v55 }
 0x774   :  { %4167 = vtanh.f32 %v4794_v56 }
 0x780   :  { %v4166_v57 = vpop.eup %4165 }
 0x781   :  { %v4168_v58 = vpop.eup %4167  ;;  %705 = vrot.lane.b32.xlu0 %v4166_v57, %s4530_s12 }
 0x782   :  { %770 = vrot.lane.b32.xlu1 %v4168_v58, %s4530_s12 }
 0x7f3   :  { %v706_v59 = vpop.permute.xlu0 %705 }
 0x7f4   :  { %v771_v22 = vpop.permute.xlu1 %770  ;;  %v4800_v11 = vmul.f32 %v4162_v42, %v706_v59 }
 0x7f5   :  { %v773_v25 = vmul.f32 %v4164_v44, %v771_v22 }
 0x7f6   :  { %v775_v14 = vpack.c.bf16 %v4800_v11, %v4800_v11 }
 0x7f7   :  { %v774_v15 = vpack.c.bf16 %v773_v25, %v773_v25 }
 0x7f8   :  { %777 = vrot.lane.b32.xlu0 %v775_v14, %s4540_s13 }
 0x7f9   :  { %823 = vrot.lane.b32.xlu1 %v774_v15, %s4540_s13 }
 0x86a   :  { %v778_v16 = vpop.permute.xlu0 %777 }
 0x86b   :  { %v824_v17 = vpop.permute.xlu1 %823  ;;  %3785 = vmatmul.mubr.msk.bf16.vlgmr.msra.gmra.mxu1 %vm106_vm0, %v778_v16 }
 0x86c   :  { %3793 = vmatmul.mubr.msk.bf16.vlgmr.msra.gmra.mxu0 %vm106_vm0, %v824_v17  ;;  %3797 = vmatpush3.bf16.msra.mxu1 %v4634_v2 }
 0x86d   :  { %3798 = vmatprep.subr.bf16.mxu1 %v4538_v0  ;;  %3800 = vmatprep.mubr.msk.bf16.mxu1 %vm4539_vm1, %v4538_v0 }
 0x86e   :  { %3805 = vmatpush3.bf16.msra.mxu0 %v4662_v33  ;;  %3808 = vmatprep.mubr.msk.bf16.mxu0 %vm4539_vm1, %v4538_v0 }
 0x86f   :  { %3806 = vmatprep.subr.bf16.mxu0 %v4538_v0 }
 0x870   :  { %3799 = vmatpush3.bf16.msra.mxu1 %v4638_v9 }
 0x871   :  { %3812 = vmatprep.subr.bf16.mxu1 %v4538_v0 }
 0x872   :  { %3807 = vmatpush3.bf16.msra.mxu0 %v4665_v34 }
 0x873   :  { %3801 = vmatmul.mubr.msk.bf16.vlgmr.msra.gmra.mxu1 %vm106_vm0, %v824_v17  ;;  %3820 = vmatprep.subr.bf16.mxu0 %v4538_v0 }
 0x874   :  { %3813 = vmatpush3.bf16.msra.mxu1 %v4671_v37  ;;  %3816 = vmatprep.mubr.msk.bf16.mxu1 %vm4539_vm1, %v4538_v0 }
 0x875   :  { %3814 = vmatprep.subr.bf16.mxu1 %v4538_v0 }
 0x878   :  { %3815 = vmatpush3.bf16.msra.mxu1 %v4679_v39 }
 0x879   :  { %3828 = vmatprep.subr.bf16.mxu1 %v4538_v0 }
 0x92b   :  { %v816_v18 = vpop.f32.mrf.mxu1 }
 0x92c   :  { %v862_v19 = vpop.f32.mrf.mxu0 }
 0x92d   :  { %v863_v20 = vadd.f32 %v862_v19, %v816_v18  ;;  %v3786_v21 = vpop.f32.mrf.mxu1 }
 0x92e   :  { %v3794_v23 = vpop.f32.mrf.mxu0 }
 0x92f   :  { %v868_v24 = vadd.f32 %v4706_v49, %v863_v20  ;;  %v819_v26 = vpop.f32.mrf.mxu1 }
 0x930   :  { %v865_v27 = vpop.f32.mrf.mxu0 }
 0x931   :  { %4169 = vtanh.f32 %v868_v24  ;;  %v3787_v28 = vpop.f32.mrf.mxu1  ;;  %v3485_v41 = vmul.f32 -1.442695, %v868_v24 }
 0x932   :  { %v3795_v30 = vpop.f32.mrf.mxu0 }
 0x933   :  { %v927_v31 = vpop.f32.mrf.mxu1 }
 0x934   :  { %v933_v35 = vadd.f32 %v927_v31, %v221_v29  ;;  %v226_v31 = vadd.f32 %v4653_v13, %v4761_v61 }
 0x935   :  { %v3802_v12 = vpop.f32.mrf.mxu1 }
 0x936   :  { %4171 = vtanh.f32 %v933_v35  ;;  %v3487_v42 = vmul.f32 -1.442695, %v933_v35 }
 0x937   :  { %v930_v36 = vpop.f32.mrf.mxu1  ;;  %4173 = vpow2.f32 %v3485_v41 }
 0x938   :  { %4175 = vpow2.f32 %v3487_v42 }
 0x939   :  { %v3803_v38 = vpop.f32.mrf.mxu1 }
 0x93e   :  { %v4170_v40 = vpop.eup %4169 }
 0x93f   :  { %878 = vrot.lane.b32.xlu0 %v4170_v40, %s4530_s12 }
 0x943   :  { %v4172_v32 = vpop.eup %4171 }
 0x944   :  { %943 = vrot.lane.b32.xlu1 %v4172_v32, %s4530_s12  ;;  %v4174_v43 = vpop.eup %4173 }
 0x945   :  { %v872_v44 = vadd.f32 1.0, %v4174_v43  ;;  %v4176_v48 = vpop.eup %4175 }
 0x946   :  { %v937_v45 = vadd.f32 1.0, %v4176_v48 }
 0x947   :  { %4177 = vrcp.f32 %v872_v44 }
 0x948   :  { %4179 = vrcp.f32 %v937_v45 }
 0x954   :  { %v4178_v46 = vpop.eup %4177 }
 0x955   :  { %v4180_v51 = vpop.eup %4179  ;;  %v876_v57 = vmul.f32 %v4178_v46, %v4792_v55 }
 0x956   :  { %v941_v22 = vmul.f32 %v4180_v51, %v4794_v56 }
 0x9b1   :  { %v879_v47 = vpop.permute.xlu0 %878 }
 0x9b2   :  { %v881_v50 = vmul.f32 %v4178_v46, %v879_v47 }
 0x9b4   :  { %883 = vrot.lane.b32.xlu0 %v881_v50, %s4540_s13 }
 0x9b6   :  { %v944_v52 = vpop.permute.xlu1 %943 }
 0x9b7   :  { %v946_v54 = vmul.f32 %v4180_v51, %v944_v52 }
 0x9b9   :  { %948 = vrot.lane.b32.xlu1 %v946_v54, %s4540_s13 }
 0xa26   :  { %v884_v58 = vpop.permute.xlu0 %883 }
 0xa27   :  { %v4835_v59 = vadd.f32 %v884_v58, %v876_v57 }
 0xa29   :  { %4181 = vtanh.f32 %v4835_v59 }
 0xa2b   :  { %v949_v25 = vpop.permute.xlu1 %948 }
 0xa2c   :  { %v4839_v14 = vadd.f32 %v949_v25, %v941_v22 }
 0xa2e   :  { %4183 = vtanh.f32 %v4839_v14 }
 0xa36   :  { %v4182_v15 = vpop.eup %4181 }
 0xa37   :  { %889 = vrot.lane.b32.xlu0 %v4182_v15, %s4530_s12 }
 0xa3b   :  { %v4184_v16 = vpop.eup %4183 }
 0xa3c   :  { %954 = vrot.lane.b32.xlu1 %v4184_v16, %s4530_s12 }
 0xaa9   :  { %v890_v17 = vpop.permute.xlu0 %889 }
 0xaaa   :  { %v4844_v55 = vmul.f32 %v4178_v46, %v890_v17 }
 0xaac   :  { %v959_v18 = vpack.c.bf16 %v4844_v55, %v4844_v55 }
 0xaae   :  { %961 = vrot.lane.b32.xlu0 %v959_v18, %s4540_s13  ;;  %v955_v56 = vpop.permute.xlu1 %954 }
 0xaaf   :  { %v957_v19 = vmul.f32 %v4180_v51, %v955_v56 }
 0xab1   :  { %v958_v20 = vpack.c.bf16 %v957_v19, %v957_v19 }
 0xab3   :  { %1007 = vrot.lane.b32.xlu1 %v958_v20, %s4540_s13 }
 0xb20   :  { %v962_v21 = vpop.permute.xlu0 %961 }
 0xb21   :  { %3809 = vmatmul.mubr.msk.bf16.vlgmr.msra.gmra.mxu0 %vm106_vm0, %v962_v21 }
 0xb22   :  { %3821 = vmatpush3.bf16.msra.mxu0 %v4634_v2  ;;  %3824 = vmatprep.mubr.msk.bf16.mxu0 %vm4539_vm1, %v4538_v0 }
 0xb23   :  { %3822 = vmatprep.subr.bf16.mxu0 %v4538_v0 }
 0xb25   :  { %v1008_v23 = vpop.permute.xlu1 %1007 }
 0xb26   :  { %3823 = vmatpush3.bf16.msra.mxu0 %v4638_v9  ;;  %3817 = vmatmul.mubr.msk.bf16.vlgmr.msra.gmra.mxu1 %vm106_vm0, %v1008_v23 }
 0xb27   :  { %3829 = vmatpush3.bf16.msra.mxu1 %v4662_v33  ;;  %3836 = vmatprep.subr.bf16.mxu0 %v4538_v0 }
 0xb28   :  { %3830 = vmatprep.subr.bf16.mxu1 %v4538_v0  ;;  %3832 = vmatprep.mubr.msk.bf16.mxu1 %vm4539_vm1, %v4538_v0 }
 0xb29   :  { %3825 = vmatmul.mubr.msk.bf16.vlgmr.msra.gmra.mxu0 %vm106_vm0, %v1008_v23 }
 0xb2a   :  { %3837 = vmatpush3.bf16.msra.mxu0 %v4671_v37  ;;  %3840 = vmatprep.mubr.msk.bf16.mxu0 %vm4539_vm1, %v4538_v0 }
 0xb2b   :  { %3831 = vmatpush3.bf16.msra.mxu1 %v4665_v34  ;;  %3838 = vmatprep.subr.bf16.mxu0 %v4538_v0 }
 0xb2c   :  { %3844 = vmatprep.subr.bf16.mxu1 %v4538_v0 }
 0xb2e   :  { %3839 = vmatpush3.bf16.msra.mxu0 %v4679_v39 }
 0xb2f   :  { %3852 = vmatprep.subr.bf16.mxu0 %v4538_v0 }
 0xbe1   :  { %v1000_v24 = vpop.f32.mrf.mxu0 }
 0xbe3   :  { %v3810_v26 = vpop.f32.mrf.mxu0 }
 0xbe5   :  { %v1003_v27 = vpop.f32.mrf.mxu0 }
 0xbe6   :  { %v1046_v28 = vpop.f32.mrf.mxu1 }
 0xbe7   :  { %v3811_v29 = vpop.f32.mrf.mxu0  ;;  %v1047_v30 = vadd.f32 %v1046_v28, %v1000_v24 }
 0xbe8   :  { %v3818_v35 = vpop.f32.mrf.mxu1 }
 0xbe9   :  { %v1052_v12 = vadd.f32 %v4706_v49, %v1047_v30  ;;  %v1111_v36 = vpop.f32.mrf.mxu0 }
 0xbea   :  { %v1117_v38 = vadd.f32 %v1111_v36, %v226_v31  ;;  %v1049_v40 = vpop.f32.mrf.mxu1 }
 0xbeb   :  { %4185 = vtanh.f32 %v1052_v12  ;;  %v3826_v32 = vpop.f32.mrf.mxu0  ;;  %v3490_v45 = vmul.f32 -1.442695, %v1052_v12 }
 0xbec   :  { %4187 = vtanh.f32 %v1117_v38  ;;  %v3819_v41 = vpop.f32.mrf.mxu1  ;;  %v3492_v61 = vmul.f32 -1.442695, %v1117_v38  ;;  %v229_v32 = vadd.f32 %v4653_v13, %v4765_v63 }
 0xbed   :  { %v1114_v42 = vpop.f32.mrf.mxu0  ;;  %4189 = vpow2.f32 %v3490_v45 }
 0xbee   :  { %4191 = vpow2.f32 %v3492_v61 }
 0xbef   :  { %v3827_v43 = vpop.f32.mrf.mxu0 }
 0xbf8   :  { %v4186_v44 = vpop.eup %4185 }
 0xbf9   :  { %v4188_v48 = vpop.eup %4187  ;;  %1062 = vrot.lane.b32.xlu0 %v4186_v44, %s4530_s12 }
 0xbfa   :  { %1127 = vrot.lane.b32.xlu1 %v4188_v48, %s4530_s12  ;;  %v4190_v46 = vpop.eup %4189 }
 0xbfb   :  { %v4192_v47 = vpop.eup %4191  ;;  %v1056_v50 = vadd.f32 1.0, %v4190_v46 }
 0xbfc   :  { %v1121_v51 = vadd.f32 1.0, %v4192_v47 }
 0xbfd   :  { %4193 = vrcp.f32 %v1056_v50 }
 0xbfe   :  { %4195 = vrcp.f32 %v1121_v51 }
 0xc0a   :  { %v4194_v52 = vpop.eup %4193 }
 0xc0b   :  { %v4196_v57 = vpop.eup %4195  ;;  %v1060_v15 = vmul.f32 %v4194_v52, %v4835_v59 }
 0xc0c   :  { %v1125_v16 = vmul.f32 %v4196_v57, %v4839_v14 }
 0xc6b   :  { %v1063_v54 = vpop.permute.xlu0 %1062 }
 0xc6c   :  { %v1128_v58 = vpop.permute.xlu1 %1127  ;;  %v1065_v22 = vmul.f32 %v4194_v52, %v1063_v54 }
 0xc6d   :  { %v1130_v25 = vmul.f32 %v4196_v57, %v1128_v58 }
 0xc6e   :  { %1067 = vrot.lane.b32.xlu0 %v1065_v22, %s4540_s13 }
 0xc6f   :  { %1132 = vrot.lane.b32.xlu1 %v1130_v25, %s4540_s13 }
 0xce0   :  { %v1068_v17 = vpop.permute.xlu0 %1067 }
 0xce1   :  { %v1133_v18 = vpop.permute.xlu1 %1132  ;;  %v4880_v56 = vadd.f32 %v1068_v17, %v1060_v15 }
 0xce2   :  { %v4882_v19 = vadd.f32 %v1133_v18, %v1125_v16 }
 0xce3   :  { %4197 = vtanh.f32 %v4880_v56 }
 0xce4   :  { %4199 = vtanh.f32 %v4882_v19 }
 0xcf0   :  { %v4198_v20 = vpop.eup %4197 }
 0xcf1   :  { %v4200_v21 = vpop.eup %4199  ;;  %1073 = vrot.lane.b32.xlu0 %v4198_v20, %s4530_s12 }
 0xcf2   :  { %1138 = vrot.lane.b32.xlu1 %v4200_v21, %s4530_s12 }
 0xd63   :  { %v1074_v23 = vpop.permute.xlu0 %1073 }
 0xd64   :  { %v1139_v59 = vpop.permute.xlu1 %1138  ;;  %v4888_v24 = vmul.f32 %v4194_v52, %v1074_v23 }
 0xd65   :  { %v1141_v14 = vmul.f32 %v4196_v57, %v1139_v59 }
 0xd66   :  { %v1143_v26 = vpack.c.bf16 %v4888_v24, %v4888_v24 }
 0xd67   :  { %v1142_v27 = vpack.c.bf16 %v1141_v14, %v1141_v14 }
 0xd68   :  { %1145 = vrot.lane.b32.xlu0 %v1143_v26, %s4540_s13 }
 0xd69   :  { %1191 = vrot.lane.b32.xlu1 %v1142_v27, %s4540_s13 }
 0xdda   :  { %v1146_v28 = vpop.permute.xlu0 %1145 }
 0xddb   :  { %v1192_v29 = vpop.permute.xlu1 %1191  ;;  %3833 = vmatmul.mubr.msk.bf16.vlgmr.msra.gmra.mxu1 %vm106_vm0, %v1146_v28 }
 0xddc   :  { %3841 = vmatmul.mubr.msk.bf16.vlgmr.msra.gmra.mxu0 %vm106_vm0, %v1192_v29  ;;  %3845 = vmatpush3.bf16.msra.mxu1 %v4634_v2 }
 0xddd   :  { %3846 = vmatprep.subr.bf16.mxu1 %v4538_v0  ;;  %3848 = vmatprep.mubr.msk.bf16.mxu1 %vm4539_vm1, %v4538_v0 }
 0xdde   :  { %3853 = vmatpush3.bf16.msra.mxu0 %v4662_v33  ;;  %3856 = vmatprep.mubr.msk.bf16.mxu0 %vm4539_vm1, %v4538_v0 }
 0xddf   :  { %3854 = vmatprep.subr.bf16.mxu0 %v4538_v0 }
 0xde0   :  { %3847 = vmatpush3.bf16.msra.mxu1 %v4638_v9 }
 0xde1   :  { %3860 = vmatprep.subr.bf16.mxu1 %v4538_v0 }
 0xde2   :  { %3855 = vmatpush3.bf16.msra.mxu0 %v4665_v34 }
 0xde3   :  { %3849 = vmatmul.mubr.msk.bf16.vlgmr.msra.gmra.mxu1 %vm106_vm0, %v1192_v29  ;;  %3868 = vmatprep.subr.bf16.mxu0 %v4538_v0 }
 0xde4   :  { %3861 = vmatpush3.bf16.msra.mxu1 %v4671_v37  ;;  %3864 = vmatprep.mubr.msk.bf16.mxu1 %vm4539_vm1, %v4538_v0 }
 0xde5   :  { %3862 = vmatprep.subr.bf16.mxu1 %v4538_v0 }
 0xde8   :  { %3863 = vmatpush3.bf16.msra.mxu1 %v4679_v39 }
 0xde9   :  { %3876 = vmatprep.subr.bf16.mxu1 %v4538_v0 }
 0xe9b   :  { %v1184_v2 = vpop.f32.mrf.mxu1 }
 0xe9c   :  { %v1230_v9 = vpop.f32.mrf.mxu0 }
 0xe9d   :  { %v1231_v30 = vadd.f32 %v1230_v9, %v1184_v2  ;;  %v3834_v31 = vpop.f32.mrf.mxu1  ;;  %v4939_v9 = vld [vmem:[#allocation11 + $0x8] sm:$0xff]  }
 0xe9e   :  { %v3842_v35 = vpop.f32.mrf.mxu0  ;;  %v4945_v31 = vld [vmem:[#allocation11] sm:$0xff]  }
 0xe9f   :  { %v1236_v12 = vadd.f32 %v4706_v49, %v1231_v30  ;;  %v1187_v36 = vpop.f32.mrf.mxu1 }
 0xea0   :  { %v1233_v38 = vpop.f32.mrf.mxu0 }
 0xea1   :  { %4201 = vtanh.f32 %v1236_v12  ;;  %v3835_v40 = vpop.f32.mrf.mxu1  ;;  %v3495_v47 = vmul.f32 -1.442695, %v1236_v12 }
 0xea2   :  { %v3843_v41 = vpop.f32.mrf.mxu0 }
 0xea3   :  { %v1295_v42 = vpop.f32.mrf.mxu1 }
 0xea4   :  { %v1301_v43 = vadd.f32 %v1295_v42, %v229_v32 }
 0xea5   :  { %v3850_v44 = vpop.f32.mrf.mxu1 }
 0xea6   :  { %4203 = vtanh.f32 %v1301_v43  ;;  %v3497_v50 = vmul.f32 -1.442695, %v1301_v43 }
 0xea7   :  { %v1298_v48 = vpop.f32.mrf.mxu1  ;;  %4205 = vpow2.f32 %v3495_v47 }
 0xea8   :  { %4207 = vpow2.f32 %v3497_v50 }
 0xea9   :  { %v3851_v45 = vpop.f32.mrf.mxu1 }
 0xeae   :  { %v4202_v61 = vpop.eup %4201 }
 0xeaf   :  { %1246 = vrot.lane.b32.xlu0 %v4202_v61, %s4530_s12 }
 0xeb3   :  { %v4204_v46 = vpop.eup %4203 }
 0xeb4   :  { %1311 = vrot.lane.b32.xlu1 %v4204_v46, %s4530_s12  ;;  %v4206_v51 = vpop.eup %4205 }
 0xeb5   :  { %v1240_v52 = vadd.f32 1.0, %v4206_v51  ;;  %v4208_v13 = vpop.eup %4207 }
 0xeb6   :  { %v1305_v63 = vadd.f32 1.0, %v4208_v13 }
 0xeb7   :  { %4209 = vrcp.f32 %v1240_v52 }
 0xeb8   :  { %4211 = vrcp.f32 %v1305_v63 }
 0xec4   :  { %v4210_v54 = vpop.eup %4209 }
 0xec5   :  { %v4212_v22 = vpop.eup %4211  ;;  %v1244_v16 = vmul.f32 %v4210_v54, %v4880_v56 }
 0xec6   :  { %v1309_v20 = vmul.f32 %v4212_v22, %v4882_v19 }
 0xf21   :  { %v1247_v57 = vpop.permute.xlu0 %1246 }
 0xf22   :  { %v1249_v58 = vmul.f32 %v4210_v54, %v1247_v57 }
 0xf24   :  { %1251 = vrot.lane.b32.xlu0 %v1249_v58, %s4540_s13 }
 0xf26   :  { %v1312_v25 = vpop.permute.xlu1 %1311 }
 0xf27   :  { %v1314_v15 = vmul.f32 %v4212_v22, %v1312_v25 }
 0xf29   :  { %1316 = vrot.lane.b32.xlu1 %v1314_v15, %s4540_s13 }
 0xf96   :  { %v1252_v17 = vpop.permute.xlu0 %1251 }
 0xf97   :  { %v4923_v18 = vadd.f32 %v1252_v17, %v1244_v16 }
 0xf99   :  { %4213 = vtanh.f32 %v4923_v18 }
 0xf9b   :  { %v1317_v21 = vpop.permute.xlu1 %1316 }
 0xf9c   :  { %v4927_v23 = vadd.f32 %v1317_v21, %v1309_v20 }
 0xf9e   :  { %4215 = vtanh.f32 %v4927_v23 }
 0xfa6   :  { %v4214_v59 = vpop.eup %4213 }
 0xfa7   :  { %1257 = vrot.lane.b32.xlu0 %v4214_v59, %s4530_s12 }
 0xfab   :  { %v4216_v14 = vpop.eup %4215 }
 0xfac   :  { %1322 = vrot.lane.b32.xlu1 %v4216_v14, %s4530_s12 }
0x1019   :  { %v1258_v26 = vpop.permute.xlu0 %1257 }
0x101a   :  { %v4932_v56 = vmul.f32 %v4210_v54, %v1258_v26 }
0x101c   :  { %v1327_v27 = vpack.c.bf16 %v4932_v56, %v4932_v56 }
0x101e   :  { %1329 = vrot.lane.b32.xlu0 %v1327_v27, %s4540_s13  ;;  %v1323_v19 = vpop.permute.xlu1 %1322 }
0x101f   :  { %v1325_v28 = vmul.f32 %v4212_v22, %v1323_v19 }
0x1021   :  { %v1326_v29 = vpack.c.bf16 %v1325_v28, %v1325_v28 }
0x1023   :  { %1375 = vrot.lane.b32.xlu1 %v1326_v29, %s4540_s13 }
0x1090   :  { %v1330_v2 = vpop.permute.xlu0 %1329 }
0x1091   :  { %3857 = vmatmul.mubr.msk.bf16.vlgmr.msra.gmra.mxu0 %vm106_vm0, %v1330_v2 }
0x1092   :  { %3869 = vmatpush3.bf16.msra.mxu0 %v4939_v9  ;;  %3872 = vmatprep.mubr.msk.bf16.mxu0 %vm4539_vm1, %v4538_v0 }
0x1093   :  { %3870 = vmatprep.subr.bf16.mxu0 %v4538_v0 }
0x1095   :  { %v1376_v30 = vpop.permute.xlu1 %1375 }
0x1096   :  { %3871 = vmatpush3.bf16.msra.mxu0 %v4945_v31  ;;  %3865 = vmatmul.mubr.msk.bf16.vlgmr.msra.gmra.mxu1 %vm106_vm0, %v1376_v30 }
0x1097   :  { %3877 = vmatpush3.bf16.msra.mxu1 %v4662_v33  ;;  %3884 = vmatprep.subr.bf16.mxu0 %v4538_v0 }
0x1098   :  { %3878 = vmatprep.subr.bf16.mxu1 %v4538_v0  ;;  %3880 = vmatprep.mubr.msk.bf16.mxu1 %vm4539_vm1, %v4538_v0 }
0x1099   :  { %3873 = vmatmul.mubr.msk.bf16.vlgmr.msra.gmra.mxu0 %vm106_vm0, %v1376_v30 }
0x109a   :  { %3885 = vmatpush3.bf16.msra.mxu0 %v4671_v37  ;;  %3888 = vmatprep.mubr.msk.bf16.mxu0 %vm4539_vm1, %v4538_v0  ;;  %v4966_v37 = vld [vmem:[%s5501_s3] ss:$0 sm:$0xff] }
0x109b   :  { %3879 = vmatpush3.bf16.msra.mxu1 %v4665_v34  ;;  %3886 = vmatprep.subr.bf16.mxu0 %v4538_v0  ;;  %v234_v34 = vadd.f32 %v4966_v37, %v4759_v60 }
0x109c   :  { %3892 = vmatprep.subr.bf16.mxu1 %v4538_v0 }
0x109e   :  { %3887 = vmatpush3.bf16.msra.mxu0 %v4679_v39 }
0x109f   :  { %3900 = vmatprep.subr.bf16.mxu0 %v4538_v0 }
0x1151   :  { %v1368_v33 = vpop.f32.mrf.mxu0 }
0x1153   :  { %v3858_v35 = vpop.f32.mrf.mxu0 }
0x1154   :  { %v5005_v35 = vld [vmem:[#allocation14] sm:$0xff]  }
0x1155   :  { %v1371_v12 = vpop.f32.mrf.mxu0 }
0x1156   :  { %v1414_v36 = vpop.f32.mrf.mxu1  ;;  %v5010_v12 = vld [vmem:[#allocation12 + $0x8] sm:$0xff]  }
0x1157   :  { %v3859_v38 = vpop.f32.mrf.mxu0  ;;  %v1415_v40 = vadd.f32 %v1414_v36, %v1368_v33  ;;  %v4997_v33 = vld [vmem:[#allocation14 + $0x8] sm:$0xff]   ;;  %v5016_v36 = vld [vmem:[#allocation12] sm:$0xff]  }
0x1158   :  { %v3866_v32 = vpop.f32.mrf.mxu1 }
0x1159   :  { %v1420_v41 = vadd.f32 %v4706_v49, %v1415_v40  ;;  %v1479_v39 = vpop.f32.mrf.mxu0 }
0x115a   :  { %v1485_v42 = vadd.f32 %v1479_v39, %v234_v34  ;;  %v1417_v43 = vpop.f32.mrf.mxu1  ;;  %v5023_v39 = vld [vmem:[%s5504_s6] ss:$0 sm:$0xff] }
0x115b   :  { %4217 = vtanh.f32 %v1420_v41  ;;  %v3874_v44 = vpop.f32.mrf.mxu0  ;;  %v3500_v50 = vmul.f32 -1.442695, %v1420_v41 }
0x115c   :  { %4219 = vtanh.f32 %v1485_v42  ;;  %v3867_v48 = vpop.f32.mrf.mxu1  ;;  %v3502_v60 = vmul.f32 -1.442695, %v1485_v42 }
0x115d   :  { %v1482_v45 = vpop.f32.mrf.mxu0  ;;  %4221 = vpow2.f32 %v3500_v50 }
0x115e   :  { %4223 = vpow2.f32 %v3502_v60  ;;  %v237_v45 = vadd.f32 %v4966_v37, %v4763_v62 }
0x115f   :  { %v3875_v61 = vpop.f32.mrf.mxu0 }
0x1168   :  { %v4218_v46 = vpop.eup %4217 }
0x1169   :  { %v4220_v47 = vpop.eup %4219  ;;  %1430 = vrot.lane.b32.xlu0 %v4218_v46, %s4530_s12 }
0x116a   :  { %1495 = vrot.lane.b32.xlu1 %v4220_v47, %s4530_s12  ;;  %v4222_v49 = vpop.eup %4221 }
0x116b   :  { %v4224_v51 = vpop.eup %4223  ;;  %v1424_v52 = vadd.f32 1.0, %v4222_v49 }
0x116c   :  { %v1489_v13 = vadd.f32 1.0, %v4224_v51 }
0x116d   :  { %4225 = vrcp.f32 %v1424_v52 }
0x116e   :  { %4227 = vrcp.f32 %v1489_v13 }
0x117a   :  { %v4226_v63 = vpop.eup %4225 }
0x117b   :  { %v4228_v57 = vpop.eup %4227  ;;  %v1428_v15 = vmul.f32 %v4226_v63, %v4923_v18 }
0x117c   :  { %v1493_v16 = vmul.f32 %v4228_v57, %v4927_v23 }
0x11db   :  { %v1431_v54 = vpop.permute.xlu0 %1430 }
0x11dc   :  { %v1496_v58 = vpop.permute.xlu1 %1495  ;;  %v1433_v22 = vmul.f32 %v4226_v63, %v1431_v54 }
0x11dd   :  { %v1498_v25 = vmul.f32 %v4228_v57, %v1496_v58 }
0x11de   :  { %1435 = vrot.lane.b32.xlu0 %v1433_v22, %s4540_s13 }
0x11df   :  { %1500 = vrot.lane.b32.xlu1 %v1498_v25, %s4540_s13 }
0x1250   :  { %v1436_v17 = vpop.permute.xlu0 %1435 }
0x1251   :  { %v1501_v20 = vpop.permute.xlu1 %1500  ;;  %v4977_v21 = vadd.f32 %v1436_v17, %v1428_v15 }
0x1252   :  { %v4979_v59 = vadd.f32 %v1501_v20, %v1493_v16 }
0x1253   :  { %4229 = vtanh.f32 %v4977_v21 }
0x1254   :  { %4231 = vtanh.f32 %v4979_v59 }
0x1260   :  { %v4230_v14 = vpop.eup %4229 }
0x1261   :  { %v4232_v26 = vpop.eup %4231  ;;  %1441 = vrot.lane.b32.xlu0 %v4230_v14, %s4530_s12 }
0x1262   :  { %1506 = vrot.lane.b32.xlu1 %v4232_v26, %s4530_s12 }
0x12d3   :  { %v1442_v27 = vpop.permute.xlu0 %1441 }
0x12d4   :  { %v1507_v18 = vpop.permute.xlu1 %1506  ;;  %v4985_v19 = vmul.f32 %v4226_v63, %v1442_v27 }
0x12d5   :  { %v1509_v23 = vmul.f32 %v4228_v57, %v1507_v18 }
0x12d6   :  { %v1511_v28 = vpack.c.bf16 %v4985_v19, %v4985_v19 }
0x12d7   :  { %v1510_v29 = vpack.c.bf16 %v1509_v23, %v1509_v23 }
0x12d8   :  { %1513 = vrot.lane.b32.xlu0 %v1511_v28, %s4540_s13 }
0x12d9   :  { %1559 = vrot.lane.b32.xlu1 %v1510_v29, %s4540_s13 }
0x134a   :  { %v1514_v2 = vpop.permute.xlu0 %1513 }
0x134b   :  { %v1560_v30 = vpop.permute.xlu1 %1559  ;;  %3881 = vmatmul.mubr.msk.bf16.vlgmr.msra.gmra.mxu1 %vm106_vm0, %v1514_v2 }
0x134c   :  { %3889 = vmatmul.mubr.msk.bf16.vlgmr.msra.gmra.mxu0 %vm106_vm0, %v1560_v30  ;;  %3893 = vmatpush3.bf16.msra.mxu1 %v4939_v9 }
0x134d   :  { %3894 = vmatprep.subr.bf16.mxu1 %v4538_v0  ;;  %3896 = vmatprep.mubr.msk.bf16.mxu1 %vm4539_vm1, %v4538_v0 }
0x134e   :  { %3901 = vmatpush3.bf16.msra.mxu0 %v4997_v33  ;;  %3904 = vmatprep.mubr.msk.bf16.mxu0 %vm4539_vm1, %v4538_v0 }
0x134f   :  { %3902 = vmatprep.subr.bf16.mxu0 %v4538_v0 }
0x1350   :  { %3895 = vmatpush3.bf16.msra.mxu1 %v4945_v31 }
0x1351   :  { %3908 = vmatprep.subr.bf16.mxu1 %v4538_v0 }
0x1352   :  { %3903 = vmatpush3.bf16.msra.mxu0 %v5005_v35 }
0x1353   :  { %3897 = vmatmul.mubr.msk.bf16.vlgmr.msra.gmra.mxu1 %vm106_vm0, %v1560_v30  ;;  %3916 = vmatprep.subr.bf16.mxu0 %v4538_v0 }
0x1354   :  { %3909 = vmatpush3.bf16.msra.mxu1 %v5010_v12  ;;  %3912 = vmatprep.mubr.msk.bf16.mxu1 %vm4539_vm1, %v4538_v0 }
0x1355   :  { %3910 = vmatprep.subr.bf16.mxu1 %v4538_v0 }
0x1358   :  { %3911 = vmatpush3.bf16.msra.mxu1 %v5016_v36 }
0x1359   :  { %3924 = vmatprep.subr.bf16.mxu1 %v4538_v0 }
0x140b   :  { %v1552_v38 = vpop.f32.mrf.mxu1 }
0x140c   :  { %v1598_v40 = vpop.f32.mrf.mxu0 }
0x140d   :  { %v1599_v34 = vadd.f32 %v1598_v40, %v1552_v38  ;;  %v3882_v32 = vpop.f32.mrf.mxu1 }
0x140e   :  { %v3890_v41 = vpop.f32.mrf.mxu0 }
0x140f   :  { %v1604_v42 = vadd.f32 %v5023_v39, %v1599_v34  ;;  %v1555_v43 = vpop.f32.mrf.mxu1 }
0x1410   :  { %v1601_v44 = vpop.f32.mrf.mxu0 }
0x1411   :  { %4233 = vtanh.f32 %v1604_v42  ;;  %v3883_v48 = vpop.f32.mrf.mxu1  ;;  %v3505_v13 = vmul.f32 -1.442695, %v1604_v42 }
0x1412   :  { %v3891_v61 = vpop.f32.mrf.mxu0 }
0x1413   :  { %v1663_v46 = vpop.f32.mrf.mxu1 }
0x1414   :  { %v1669_v47 = vadd.f32 %v1663_v46, %v237_v45  ;;  %v242_v46 = vadd.f32 %v4966_v37, %v4769_v3 }
0x1415   :  { %v3898_v50 = vpop.f32.mrf.mxu1 }
0x1416   :  { %4235 = vtanh.f32 %v1669_v47  ;;  %v3507_v63 = vmul.f32 -1.442695, %v1669_v47 }
0x1417   :  { %v1666_v60 = vpop.f32.mrf.mxu1  ;;  %4237 = vpow2.f32 %v3505_v13 }
0x1418   :  { %4239 = vpow2.f32 %v3507_v63 }
0x1419   :  { %v3899_v49 = vpop.f32.mrf.mxu1 }
0x141e   :  { %v4234_v51 = vpop.eup %4233 }
0x141f   :  { %1614 = vrot.lane.b32.xlu0 %v4234_v51, %s4530_s12 }
0x1423   :  { %v4236_v52 = vpop.eup %4235 }
0x1424   :  { %1679 = vrot.lane.b32.xlu1 %v4236_v52, %s4530_s12  ;;  %v4238_v54 = vpop.eup %4237 }
0x1425   :  { %v1608_v57 = vadd.f32 1.0, %v4238_v54  ;;  %v4240_v62 = vpop.eup %4239 }
0x1426   :  { %v1673_v58 = vadd.f32 1.0, %v4240_v62 }
0x1427   :  { %4241 = vrcp.f32 %v1608_v57 }
0x1428   :  { %4243 = vrcp.f32 %v1673_v58 }
0x1434   :  { %v4242_v22 = vpop.eup %4241 }
0x1435   :  { %v4244_v16 = vpop.eup %4243  ;;  %v1612_v14 = vmul.f32 %v4242_v22, %v4977_v21 }
0x1436   :  { %v1677_v18 = vmul.f32 %v4244_v16, %v4979_v59 }
0x1491   :  { %v1615_v25 = vpop.permute.xlu0 %1614 }
0x1492   :  { %v1617_v15 = vmul.f32 %v4242_v22, %v1615_v25 }
0x1494   :  { %1619 = vrot.lane.b32.xlu0 %v1617_v15, %s4540_s13 }
0x1496   :  { %v1680_v17 = vpop.permute.xlu1 %1679 }
0x1497   :  { %v1682_v20 = vmul.f32 %v4244_v16, %v1680_v17 }
0x1499   :  { %1684 = vrot.lane.b32.xlu1 %v1682_v20, %s4540_s13 }
0x1506   :  { %v1620_v26 = vpop.permute.xlu0 %1619 }
0x1507   :  { %v5033_v27 = vadd.f32 %v1620_v26, %v1612_v14 }
0x1509   :  { %4245 = vtanh.f32 %v5033_v27 }
0x150b   :  { %v1685_v23 = vpop.permute.xlu1 %1684 }
0x150c   :  { %v5037_v28 = vadd.f32 %v1685_v23, %v1677_v18 }
0x150e   :  { %4247 = vtanh.f32 %v5037_v28 }
0x1516   :  { %v4246_v29 = vpop.eup %4245 }
0x1517   :  { %1625 = vrot.lane.b32.xlu0 %v4246_v29, %s4530_s12 }
0x151b   :  { %v4248_v2 = vpop.eup %4247 }
0x151c   :  { %1690 = vrot.lane.b32.xlu1 %v4248_v2, %s4530_s12 }
0x1589   :  { %v1626_v30 = vpop.permute.xlu0 %1625 }
0x158a   :  { %v5042_v21 = vmul.f32 %v4242_v22, %v1626_v30 }
0x158c   :  { %v1695_v38 = vpack.c.bf16 %v5042_v21, %v5042_v21 }
0x158e   :  { %1697 = vrot.lane.b32.xlu0 %v1695_v38, %s4540_s13  ;;  %v1691_v59 = vpop.permute.xlu1 %1690 }
0x158f   :  { %v1693_v40 = vmul.f32 %v4244_v16, %v1691_v59 }
0x1591   :  { %v1694_v34 = vpack.c.bf16 %v1693_v40, %v1693_v40 }
0x1593   :  { %1743 = vrot.lane.b32.xlu1 %v1694_v34, %s4540_s13 }
0x1600   :  { %v1698_v32 = vpop.permute.xlu0 %1697 }
0x1601   :  { %3905 = vmatmul.mubr.msk.bf16.vlgmr.msra.gmra.mxu0 %vm106_vm0, %v1698_v32 }
0x1602   :  { %3917 = vmatpush3.bf16.msra.mxu0 %v4939_v9  ;;  %3920 = vmatprep.mubr.msk.bf16.mxu0 %vm4539_vm1, %v4538_v0 }
0x1603   :  { %3918 = vmatprep.subr.bf16.mxu0 %v4538_v0 }
0x1605   :  { %v1744_v41 = vpop.permute.xlu1 %1743 }
0x1606   :  { %3919 = vmatpush3.bf16.msra.mxu0 %v4945_v31  ;;  %3913 = vmatmul.mubr.msk.bf16.vlgmr.msra.gmra.mxu1 %vm106_vm0, %v1744_v41 }
0x1607   :  { %3925 = vmatpush3.bf16.msra.mxu1 %v4997_v33  ;;  %3932 = vmatprep.subr.bf16.mxu0 %v4538_v0 }
0x1608   :  { %3926 = vmatprep.subr.bf16.mxu1 %v4538_v0  ;;  %3928 = vmatprep.mubr.msk.bf16.mxu1 %vm4539_vm1, %v4538_v0 }
0x1609   :  { %3921 = vmatmul.mubr.msk.bf16.vlgmr.msra.gmra.mxu0 %vm106_vm0, %v1744_v41 }
0x160a   :  { %3933 = vmatpush3.bf16.msra.mxu0 %v5010_v12  ;;  %3936 = vmatprep.mubr.msk.bf16.mxu0 %vm4539_vm1, %v4538_v0 }
0x160b   :  { %3927 = vmatpush3.bf16.msra.mxu1 %v5005_v35  ;;  %3934 = vmatprep.subr.bf16.mxu0 %v4538_v0 }
0x160c   :  { %3940 = vmatprep.subr.bf16.mxu1 %v4538_v0 }
0x160e   :  { %3935 = vmatpush3.bf16.msra.mxu0 %v5016_v36 }
0x160f   :  { %3948 = vmatprep.subr.bf16.mxu0 %v4538_v0 }
0x16c1   :  { %v1736_v42 = vpop.f32.mrf.mxu0 }
0x16c3   :  { %v3906_v43 = vpop.f32.mrf.mxu0 }
0x16c5   :  { %v1739_v44 = vpop.f32.mrf.mxu0 }
0x16c6   :  { %v1782_v48 = vpop.f32.mrf.mxu1 }
0x16c7   :  { %v3907_v45 = vpop.f32.mrf.mxu0  ;;  %v1783_v61 = vadd.f32 %v1782_v48, %v1736_v42 }
0x16c8   :  { %v3914_v47 = vpop.f32.mrf.mxu1 }
0x16c9   :  { %v1788_v50 = vadd.f32 %v5023_v39, %v1783_v61  ;;  %v1847_v60 = vpop.f32.mrf.mxu0 }
0x16ca   :  { %v1853_v49 = vadd.f32 %v1847_v60, %v242_v46  ;;  %v1785_v51 = vpop.f32.mrf.mxu1 }
0x16cb   :  { %4249 = vtanh.f32 %v1788_v50  ;;  %v3922_v52 = vpop.f32.mrf.mxu0  ;;  %v3510_v58 = vmul.f32 -1.442695, %v1788_v50 }
0x16cc   :  { %4251 = vtanh.f32 %v1853_v49  ;;  %v3915_v13 = vpop.f32.mrf.mxu1  ;;  %v3512_v3 = vmul.f32 -1.442695, %v1853_v49 }
0x16cd   :  { %v1850_v63 = vpop.f32.mrf.mxu0  ;;  %4253 = vpow2.f32 %v3510_v58 }
0x16ce   :  { %4255 = vpow2.f32 %v3512_v3  ;;  %v245_v63 = vadd.f32 %v4966_v37, %v4773_v5 }
0x16cf   :  { %v3923_v54 = vpop.f32.mrf.mxu0 }
0x16d8   :  { %v4250_v57 = vpop.eup %4249 }
0x16d9   :  { %v4252_v62 = vpop.eup %4251  ;;  %1798 = vrot.lane.b32.xlu0 %v4250_v57, %s4530_s12 }
0x16da   :  { %1863 = vrot.lane.b32.xlu1 %v4252_v62, %s4530_s12  ;;  %v4254_v22 = vpop.eup %4253 }
0x16db   :  { %v4256_v25 = vpop.eup %4255  ;;  %v1792_v15 = vadd.f32 1.0, %v4254_v22 }
0x16dc   :  { %v1857_v16 = vadd.f32 1.0, %v4256_v25 }
0x16dd   :  { %4257 = vrcp.f32 %v1792_v15 }
0x16de   :  { %4259 = vrcp.f32 %v1857_v16 }
0x16ea   :  { %v4258_v17 = vpop.eup %4257 }
0x16eb   :  { %v4260_v14 = vpop.eup %4259  ;;  %v1796_v29 = vmul.f32 %v4258_v17, %v5033_v27 }
0x16ec   :  { %v1861_v2 = vmul.f32 %v4260_v14, %v5037_v28 }
0x174b   :  { %v1799_v20 = vpop.permute.xlu0 %1798 }
0x174c   :  { %v1864_v26 = vpop.permute.xlu1 %1863  ;;  %v1801_v18 = vmul.f32 %v4258_v17, %v1799_v20 }
0x174d   :  { %v1866_v23 = vmul.f32 %v4260_v14, %v1864_v26 }
0x174e   :  { %1803 = vrot.lane.b32.xlu0 %v1801_v18, %s4540_s13 }
0x174f   :  { %1868 = vrot.lane.b32.xlu1 %v1866_v23, %s4540_s13 }
0x17c0   :  { %v1804_v30 = vpop.permute.xlu0 %1803 }
0x17c1   :  { %v1869_v38 = vpop.permute.xlu1 %1868  ;;  %v5078_v59 = vadd.f32 %v1804_v30, %v1796_v29 }
0x17c2   :  { %v5080_v40 = vadd.f32 %v1869_v38, %v1861_v2 }
0x17c3   :  { %4261 = vtanh.f32 %v5078_v59 }
0x17c4   :  { %4263 = vtanh.f32 %v5080_v40 }
0x17d0   :  { %v4262_v34 = vpop.eup %4261 }
0x17d1   :  { %v4264_v32 = vpop.eup %4263  ;;  %1809 = vrot.lane.b32.xlu0 %v4262_v34, %s4530_s12 }
0x17d2   :  { %1874 = vrot.lane.b32.xlu1 %v4264_v32, %s4530_s12 }
0x1843   :  { %v1810_v41 = vpop.permute.xlu0 %1809 }
0x1844   :  { %v1875_v27 = vpop.permute.xlu1 %1874  ;;  %v5086_v42 = vmul.f32 %v4258_v17, %v1810_v41 }
0x1845   :  { %v1877_v28 = vmul.f32 %v4260_v14, %v1875_v27 }
0x1846   :  { %v1879_v43 = vpack.c.bf16 %v5086_v42, %v5086_v42 }
0x1847   :  { %v1878_v44 = vpack.c.bf16 %v1877_v28, %v1877_v28 }
0x1848   :  { %1881 = vrot.lane.b32.xlu0 %v1879_v43, %s4540_s13 }
0x1849   :  { %1927 = vrot.lane.b32.xlu1 %v1878_v44, %s4540_s13 }
0x18ba   :  { %v1882_v48 = vpop.permute.xlu0 %1881 }
0x18bb   :  { %v1928_v45 = vpop.permute.xlu1 %1927  ;;  %3929 = vmatmul.mubr.msk.bf16.vlgmr.msra.gmra.mxu1 %vm106_vm0, %v1882_v48 }
0x18bc   :  { %3937 = vmatmul.mubr.msk.bf16.vlgmr.msra.gmra.mxu0 %vm106_vm0, %v1928_v45  ;;  %3941 = vmatpush3.bf16.msra.mxu1 %v4939_v9 }
0x18bd   :  { %3942 = vmatprep.subr.bf16.mxu1 %v4538_v0  ;;  %3944 = vmatprep.mubr.msk.bf16.mxu1 %vm4539_vm1, %v4538_v0 }
0x18be   :  { %3949 = vmatpush3.bf16.msra.mxu0 %v4997_v33  ;;  %3952 = vmatprep.mubr.msk.bf16.mxu0 %vm4539_vm1, %v4538_v0 }
0x18bf   :  { %3950 = vmatprep.subr.bf16.mxu0 %v4538_v0 }
0x18c0   :  { %3943 = vmatpush3.bf16.msra.mxu1 %v4945_v31 }
0x18c1   :  { %3956 = vmatprep.subr.bf16.mxu1 %v4538_v0 }
0x18c2   :  { %3951 = vmatpush3.bf16.msra.mxu0 %v5005_v35 }
0x18c3   :  { %3945 = vmatmul.mubr.msk.bf16.vlgmr.msra.gmra.mxu1 %vm106_vm0, %v1928_v45  ;;  %3964 = vmatprep.subr.bf16.mxu0 %v4538_v0 }
0x18c4   :  { %3957 = vmatpush3.bf16.msra.mxu1 %v5010_v12  ;;  %3960 = vmatprep.mubr.msk.bf16.mxu1 %vm4539_vm1, %v4538_v0 }
0x18c5   :  { %3958 = vmatprep.subr.bf16.mxu1 %v4538_v0 }
0x18c8   :  { %3959 = vmatpush3.bf16.msra.mxu1 %v5016_v36 }
0x18c9   :  { %3972 = vmatprep.subr.bf16.mxu1 %v4538_v0 }
0x197b   :  { %v1920_v61 = vpop.f32.mrf.mxu1 }
0x197c   :  { %v1966_v46 = vpop.f32.mrf.mxu0 }
0x197d   :  { %v1967_v47 = vadd.f32 %v1966_v46, %v1920_v61  ;;  %v3930_v50 = vpop.f32.mrf.mxu1 }
0x197e   :  { %v3938_v60 = vpop.f32.mrf.mxu0 }
0x197f   :  { %v1972_v49 = vadd.f32 %v5023_v39, %v1967_v47  ;;  %v1923_v51 = vpop.f32.mrf.mxu1 }
0x1980   :  { %v1969_v52 = vpop.f32.mrf.mxu0 }
0x1981   :  { %4265 = vtanh.f32 %v1972_v49  ;;  %v3931_v13 = vpop.f32.mrf.mxu1  ;;  %v3515_v16 = vmul.f32 -1.442695, %v1972_v49 }
0x1982   :  { %v3939_v54 = vpop.f32.mrf.mxu0 }
0x1983   :  { %v2031_v57 = vpop.f32.mrf.mxu1 }
0x1984   :  { %v2037_v62 = vadd.f32 %v2031_v57, %v245_v63  ;;  %v250_v57 = vadd.f32 %v4966_v37, %v4767_v1 }
0x1985   :  { %v3946_v58 = vpop.f32.mrf.mxu1 }
0x1986   :  { %4267 = vtanh.f32 %v2037_v62  ;;  %v3517_v17 = vmul.f32 -1.442695, %v2037_v62 }
0x1987   :  { %v2034_v3 = vpop.f32.mrf.mxu1  ;;  %4269 = vpow2.f32 %v3515_v16 }
0x1988   :  { %4271 = vpow2.f32 %v3517_v17 }
0x1989   :  { %v3947_v22 = vpop.f32.mrf.mxu1 }
0x198e   :  { %v4266_v25 = vpop.eup %4265 }
0x198f   :  { %1982 = vrot.lane.b32.xlu0 %v4266_v25, %s4530_s12 }
0x1993   :  { %v4268_v15 = vpop.eup %4267 }
0x1994   :  { %2047 = vrot.lane.b32.xlu1 %v4268_v15, %s4530_s12  ;;  %v4270_v20 = vpop.eup %4269 }
0x1995   :  { %v1976_v14 = vadd.f32 1.0, %v4270_v20  ;;  %v4272_v5 = vpop.eup %4271 }
0x1996   :  { %v2041_v26 = vadd.f32 1.0, %v4272_v5 }
0x1997   :  { %4273 = vrcp.f32 %v1976_v14 }
0x1998   :  { %4275 = vrcp.f32 %v2041_v26 }
0x19a4   :  { %v4274_v18 = vpop.eup %4273 }
0x19a5   :  { %v4276_v2 = vpop.eup %4275  ;;  %v1980_v34 = vmul.f32 %v4274_v18, %v5078_v59 }
0x19a6   :  { %v2045_v27 = vmul.f32 %v4276_v2, %v5080_v40 }
0x1a01   :  { %v1983_v23 = vpop.permute.xlu0 %1982 }
0x1a02   :  { %v1985_v29 = vmul.f32 %v4274_v18, %v1983_v23 }
0x1a04   :  { %1987 = vrot.lane.b32.xlu0 %v1985_v29, %s4540_s13 }
0x1a06   :  { %v2048_v30 = vpop.permute.xlu1 %2047 }
0x1a07   :  { %v2050_v38 = vmul.f32 %v4276_v2, %v2048_v30 }
0x1a09   :  { %2052 = vrot.lane.b32.xlu1 %v2050_v38, %s4540_s13 }
0x1a76   :  { %v1988_v32 = vpop.permute.xlu0 %1987 }
0x1a77   :  { %v5121_v41 = vadd.f32 %v1988_v32, %v1980_v34 }
0x1a79   :  { %4277 = vtanh.f32 %v5121_v41 }
0x1a7b   :  { %v2053_v28 = vpop.permute.xlu1 %2052 }
0x1a7c   :  { %v5125_v43 = vadd.f32 %v2053_v28, %v2045_v27 }
0x1a7e   :  { %4279 = vtanh.f32 %v5125_v43 }
0x1a86   :  { %v4278_v44 = vpop.eup %4277 }
0x1a87   :  { %1993 = vrot.lane.b32.xlu0 %v4278_v44, %s4530_s12 }
0x1a8b   :  { %v4280_v48 = vpop.eup %4279 }
0x1a8c   :  { %2058 = vrot.lane.b32.xlu1 %v4280_v48, %s4530_s12 }
0x1af9   :  { %v1994_v45 = vpop.permute.xlu0 %1993 }
0x1afa   :  { %v5130_v59 = vmul.f32 %v4274_v18, %v1994_v45 }
0x1afc   :  { %v2063_v61 = vpack.c.bf16 %v5130_v59, %v5130_v59 }
0x1afe   :  { %2065 = vrot.lane.b32.xlu0 %v2063_v61, %s4540_s13  ;;  %v2059_v40 = vpop.permute.xlu1 %2058 }
0x1aff   :  { %v2061_v46 = vmul.f32 %v4276_v2, %v2059_v40 }
0x1b01   :  { %v2062_v47 = vpack.c.bf16 %v2061_v46, %v2061_v46 }
0x1b03   :  { %2111 = vrot.lane.b32.xlu1 %v2062_v47, %s4540_s13 }
0x1b70   :  { %v2066_v50 = vpop.permute.xlu0 %2065 }
0x1b71   :  { %3953 = vmatmul.mubr.msk.bf16.vlgmr.msra.gmra.mxu0 %vm106_vm0, %v2066_v50 }
0x1b72   :  { %3965 = vmatpush3.bf16.msra.mxu0 %v4939_v9  ;;  %3968 = vmatprep.mubr.msk.bf16.mxu0 %vm4539_vm1, %v4538_v0 }
0x1b73   :  { %3966 = vmatprep.subr.bf16.mxu0 %v4538_v0 }
0x1b75   :  { %v2112_v60 = vpop.permute.xlu1 %2111 }
0x1b76   :  { %3967 = vmatpush3.bf16.msra.mxu0 %v4945_v31  ;;  %3961 = vmatmul.mubr.msk.bf16.vlgmr.msra.gmra.mxu1 %vm106_vm0, %v2112_v60 }
0x1b77   :  { %3973 = vmatpush3.bf16.msra.mxu1 %v4997_v33  ;;  %3980 = vmatprep.subr.bf16.mxu0 %v4538_v0 }
0x1b78   :  { %3974 = vmatprep.subr.bf16.mxu1 %v4538_v0  ;;  %3976 = vmatprep.mubr.msk.bf16.mxu1 %vm4539_vm1, %v4538_v0 }
0x1b79   :  { %3969 = vmatmul.mubr.msk.bf16.vlgmr.msra.gmra.mxu0 %vm106_vm0, %v2112_v60 }
0x1b7a   :  { %3981 = vmatpush3.bf16.msra.mxu0 %v5010_v12  ;;  %3984 = vmatprep.mubr.msk.bf16.mxu0 %vm4539_vm1, %v4538_v0 }
0x1b7b   :  { %3975 = vmatpush3.bf16.msra.mxu1 %v5005_v35  ;;  %3982 = vmatprep.subr.bf16.mxu0 %v4538_v0 }
0x1b7c   :  { %3988 = vmatprep.subr.bf16.mxu1 %v4538_v0 }
0x1b7e   :  { %3983 = vmatpush3.bf16.msra.mxu0 %v5016_v36 }
0x1b7f   :  { %3996 = vmatprep.subr.bf16.mxu0 %v4538_v0 }
0x1c31   :  { %v2104_v49 = vpop.f32.mrf.mxu0 }
0x1c33   :  { %v3954_v51 = vpop.f32.mrf.mxu0 }
0x1c35   :  { %v2107_v52 = vpop.f32.mrf.mxu0 }
0x1c36   :  { %v2150_v13 = vpop.f32.mrf.mxu1 }
0x1c37   :  { %v3955_v63 = vpop.f32.mrf.mxu0  ;;  %v2151_v54 = vadd.f32 %v2150_v13, %v2104_v49 }
0x1c38   :  { %v3962_v62 = vpop.f32.mrf.mxu1 }
0x1c39   :  { %v2156_v58 = vadd.f32 %v5023_v39, %v2151_v54  ;;  %v2215_v3 = vpop.f32.mrf.mxu0 }
0x1c3a   :  { %v2221_v22 = vadd.f32 %v2215_v3, %v250_v57  ;;  %v2153_v25 = vpop.f32.mrf.mxu1 }
0x1c3b   :  { %4281 = vtanh.f32 %v2156_v58  ;;  %v3970_v15 = vpop.f32.mrf.mxu0  ;;  %v3520_v26 = vmul.f32 -1.442695, %v2156_v58 }
0x1c3c   :  { %4283 = vtanh.f32 %v2221_v22  ;;  %v3963_v16 = vpop.f32.mrf.mxu1  ;;  %v3522_v1 = vmul.f32 -1.442695, %v2221_v22 }
0x1c3d   :  { %v2218_v17 = vpop.f32.mrf.mxu0  ;;  %4285 = vpow2.f32 %v3520_v26 }
0x1c3e   :  { %4287 = vpow2.f32 %v3522_v1  ;;  %v253_v17 = vadd.f32 %v4966_v37, %v4771_v4 }
0x1c3f   :  { %v3971_v20 = vpop.f32.mrf.mxu0 }
0x1c48   :  { %v4282_v14 = vpop.eup %4281 }
0x1c49   :  { %v4284_v5 = vpop.eup %4283  ;;  %2166 = vrot.lane.b32.xlu0 %v4282_v14, %s4530_s12 }
0x1c4a   :  { %2231 = vrot.lane.b32.xlu1 %v4284_v5, %s4530_s12  ;;  %v4286_v18 = vpop.eup %4285 }
0x1c4b   :  { %v4288_v23 = vpop.eup %4287  ;;  %v2160_v29 = vadd.f32 1.0, %v4286_v18 }
0x1c4c   :  { %v2225_v2 = vadd.f32 1.0, %v4288_v23 }
0x1c4d   :  { %4289 = vrcp.f32 %v2160_v29 }
0x1c4e   :  { %4291 = vrcp.f32 %v2225_v2 }
0x1c5a   :  { %v4290_v30 = vpop.eup %4289 }
0x1c5b   :  { %v4292_v34 = vpop.eup %4291  ;;  %v2164_v44 = vmul.f32 %v4290_v30, %v5121_v41 }
0x1c5c   :  { %v2229_v48 = vmul.f32 %v4292_v34, %v5125_v43 }
0x1cbb   :  { %v2167_v38 = vpop.permute.xlu0 %2166 }
0x1cbc   :  { %v2232_v32 = vpop.permute.xlu1 %2231  ;;  %v2169_v27 = vmul.f32 %v4290_v30, %v2167_v38 }
0x1cbd   :  { %v2234_v28 = vmul.f32 %v4292_v34, %v2232_v32 }
0x1cbe   :  { %2171 = vrot.lane.b32.xlu0 %v2169_v27, %s4540_s13 }
0x1cbf   :  { %2236 = vrot.lane.b32.xlu1 %v2234_v28, %s4540_s13 }
0x1d30   :  { %v2172_v45 = vpop.permute.xlu0 %2171 }
0x1d31   :  { %v2237_v61 = vpop.permute.xlu1 %2236  ;;  %v5166_v40 = vadd.f32 %v2172_v45, %v2164_v44 }
0x1d32   :  { %v5168_v46 = vadd.f32 %v2237_v61, %v2229_v48 }
0x1d33   :  { %4293 = vtanh.f32 %v5166_v40 }
0x1d34   :  { %4295 = vtanh.f32 %v5168_v46 }
0x1d40   :  { %v4294_v47 = vpop.eup %4293 }
0x1d41   :  { %v4296_v50 = vpop.eup %4295  ;;  %2177 = vrot.lane.b32.xlu0 %v4294_v47, %s4530_s12 }
0x1d42   :  { %2242 = vrot.lane.b32.xlu1 %v4296_v50, %s4530_s12 }
0x1db3   :  { %v2178_v60 = vpop.permute.xlu0 %2177 }
0x1db4   :  { %v2243_v41 = vpop.permute.xlu1 %2242  ;;  %v5174_v49 = vmul.f32 %v4290_v30, %v2178_v60 }
0x1db5   :  { %v2245_v43 = vmul.f32 %v4292_v34, %v2243_v41 }
0x1db6   :  { %v2247_v51 = vpack.c.bf16 %v5174_v49, %v5174_v49 }
0x1db7   :  { %v2246_v52 = vpack.c.bf16 %v2245_v43, %v2245_v43 }
0x1db8   :  { %2249 = vrot.lane.b32.xlu0 %v2247_v51, %s4540_s13 }
0x1db9   :  { %2295 = vrot.lane.b32.xlu1 %v2246_v52, %s4540_s13 }
0x1e2a   :  { %v2250_v13 = vpop.permute.xlu0 %2249 }
0x1e2b   :  { %v2296_v63 = vpop.permute.xlu1 %2295  ;;  %3977 = vmatmul.mubr.msk.bf16.vlgmr.msra.gmra.mxu1 %vm106_vm0, %v2250_v13 }
0x1e2c   :  { %3985 = vmatmul.mubr.msk.bf16.vlgmr.msra.gmra.mxu0 %vm106_vm0, %v2296_v63  ;;  %3989 = vmatpush3.bf16.msra.mxu1 %v4939_v9 }
0x1e2d   :  { %3990 = vmatprep.subr.bf16.mxu1 %v4538_v0  ;;  %3992 = vmatprep.mubr.msk.bf16.mxu1 %vm4539_vm1, %v4538_v0 }
0x1e2e   :  { %3997 = vmatpush3.bf16.msra.mxu0 %v4997_v33  ;;  %4000 = vmatprep.mubr.msk.bf16.mxu0 %vm4539_vm1, %v4538_v0 }
0x1e2f   :  { %3998 = vmatprep.subr.bf16.mxu0 %v4538_v0 }
0x1e30   :  { %3991 = vmatpush3.bf16.msra.mxu1 %v4945_v31 }
0x1e31   :  { %4004 = vmatprep.subr.bf16.mxu1 %v4538_v0 }
0x1e32   :  { %3999 = vmatpush3.bf16.msra.mxu0 %v5005_v35 }
0x1e33   :  { %3993 = vmatmul.mubr.msk.bf16.vlgmr.msra.gmra.mxu1 %vm106_vm0, %v2296_v63  ;;  %4012 = vmatprep.subr.bf16.mxu0 %v4538_v0 }
0x1e34   :  { %4005 = vmatpush3.bf16.msra.mxu1 %v5010_v12  ;;  %4008 = vmatprep.mubr.msk.bf16.mxu1 %vm4539_vm1, %v4538_v0 }
0x1e35   :  { %4006 = vmatprep.subr.bf16.mxu1 %v4538_v0 }
0x1e38   :  { %4007 = vmatpush3.bf16.msra.mxu1 %v5016_v36 }
0x1e39   :  { %4020 = vmatprep.subr.bf16.mxu1 %v4538_v0 }
0x1eeb   :  { %v2288_v54 = vpop.f32.mrf.mxu1 }
0x1eec   :  { %v2334_v57 = vpop.f32.mrf.mxu0 }
0x1eed   :  { %v2335_v62 = vadd.f32 %v2334_v57, %v2288_v54  ;;  %v3978_v58 = vpop.f32.mrf.mxu1 }
0x1eee   :  { %v3986_v3 = vpop.f32.mrf.mxu0 }
0x1eef   :  { %v2340_v22 = vadd.f32 %v5023_v39, %v2335_v62  ;;  %v2291_v25 = vpop.f32.mrf.mxu1 }
0x1ef0   :  { %v2337_v15 = vpop.f32.mrf.mxu0 }
0x1ef1   :  { %4297 = vtanh.f32 %v2340_v22  ;;  %v3979_v16 = vpop.f32.mrf.mxu1  ;;  %v3525_v2 = vmul.f32 -1.442695, %v2340_v22 }
0x1ef2   :  { %v3987_v20 = vpop.f32.mrf.mxu0 }
0x1ef3   :  { %v2399_v14 = vpop.f32.mrf.mxu1 }
0x1ef4   :  { %v2405_v5 = vadd.f32 %v2399_v14, %v253_v17  ;;  %v258_v17 = vadd.f32 %v4966_v37, %v4777_v7 }
0x1ef5   :  { %v3994_v26 = vpop.f32.mrf.mxu1 }
0x1ef6   :  { %4299 = vtanh.f32 %v2405_v5  ;;  %v3527_v30 = vmul.f32 -1.442695, %v2405_v5 }
0x1ef7   :  { %v2402_v1 = vpop.f32.mrf.mxu1  ;;  %4301 = vpow2.f32 %v3525_v2 }
0x1ef8   :  { %4303 = vpow2.f32 %v3527_v30 }
0x1ef9   :  { %v3995_v18 = vpop.f32.mrf.mxu1 }
0x1efe   :  { %v4298_v23 = vpop.eup %4297 }
0x1eff   :  { %2350 = vrot.lane.b32.xlu0 %v4298_v23, %s4530_s12 }
0x1f03   :  { %v4300_v29 = vpop.eup %4299 }
0x1f04   :  { %2415 = vrot.lane.b32.xlu1 %v4300_v29, %s4530_s12  ;;  %v4302_v38 = vpop.eup %4301 }
0x1f05   :  { %v2344_v34 = vadd.f32 1.0, %v4302_v38  ;;  %v4304_v4 = vpop.eup %4303 }
0x1f06   :  { %v2409_v32 = vadd.f32 1.0, %v4304_v4 }
0x1f07   :  { %4305 = vrcp.f32 %v2344_v34 }
0x1f08   :  { %4307 = vrcp.f32 %v2409_v32 }
0x1f14   :  { %v4306_v27 = vpop.eup %4305 }
0x1f15   :  { %v4308_v48 = vpop.eup %4307  ;;  %v2348_v47 = vmul.f32 %v4306_v27, %v5166_v40 }
0x1f16   :  { %v2413_v41 = vmul.f32 %v4308_v48, %v5168_v46 }
0x1f71   :  { %v2351_v28 = vpop.permute.xlu0 %2350 }
0x1f72   :  { %v2353_v44 = vmul.f32 %v4306_v27, %v2351_v28 }
0x1f74   :  { %2355 = vrot.lane.b32.xlu0 %v2353_v44, %s4540_s13 }
0x1f76   :  { %v2416_v45 = vpop.permute.xlu1 %2415 }
0x1f77   :  { %v2418_v61 = vmul.f32 %v4308_v48, %v2416_v45 }
0x1f79   :  { %2420 = vrot.lane.b32.xlu1 %v2418_v61, %s4540_s13 }
0x1fe6   :  { %v2356_v50 = vpop.permute.xlu0 %2355 }
0x1fe7   :  { %v5209_v60 = vadd.f32 %v2356_v50, %v2348_v47 }
0x1fe9   :  { %4309 = vtanh.f32 %v5209_v60 }
0x1feb   :  { %v2421_v43 = vpop.permute.xlu1 %2420 }
0x1fec   :  { %v5213_v51 = vadd.f32 %v2421_v43, %v2413_v41 }
0x1fee   :  { %4311 = vtanh.f32 %v5213_v51 }
0x1ff6   :  { %v4310_v52 = vpop.eup %4309 }
0x1ff7   :  { %2361 = vrot.lane.b32.xlu0 %v4310_v52, %s4530_s12 }
0x1ffb   :  { %v4312_v13 = vpop.eup %4311 }
0x1ffc   :  { %2426 = vrot.lane.b32.xlu1 %v4312_v13, %s4530_s12 }
0x2069   :  { %v2362_v63 = vpop.permute.xlu0 %2361 }
0x206a   :  { %v5218_v40 = vmul.f32 %v4306_v27, %v2362_v63 }
0x206c   :  { %v2431_v54 = vpack.c.bf16 %v5218_v40, %v5218_v40 }
0x206e   :  { %2433 = vrot.lane.b32.xlu0 %v2431_v54, %s4540_s13  ;;  %v2427_v46 = vpop.permute.xlu1 %2426 }
0x206f   :  { %v2429_v57 = vmul.f32 %v4308_v48, %v2427_v46 }
0x2071   :  { %v2430_v62 = vpack.c.bf16 %v2429_v57, %v2429_v57 }
0x2073   :  { %2479 = vrot.lane.b32.xlu1 %v2430_v62, %s4540_s13 }
0x20e0   :  { %v2434_v58 = vpop.permute.xlu0 %2433 }
0x20e1   :  { %4001 = vmatmul.mubr.msk.bf16.vlgmr.msra.gmra.mxu0 %vm106_vm0, %v2434_v58 }
0x20e2   :  { %4013 = vmatpush3.bf16.msra.mxu0 %v4939_v9  ;;  %4016 = vmatprep.mubr.msk.bf16.mxu0 %vm4539_vm1, %v4538_v0 }
0x20e3   :  { %4014 = vmatprep.subr.bf16.mxu0 %v4538_v0 }
0x20e5   :  { %v2480_v3 = vpop.permute.xlu1 %2479 }
0x20e6   :  { %4015 = vmatpush3.bf16.msra.mxu0 %v4945_v31  ;;  %4009 = vmatmul.mubr.msk.bf16.vlgmr.msra.gmra.mxu1 %vm106_vm0, %v2480_v3 }
0x20e7   :  { %4021 = vmatpush3.bf16.msra.mxu1 %v4997_v33  ;;  %4028 = vmatprep.subr.bf16.mxu0 %v4538_v0 }
0x20e8   :  { %4022 = vmatprep.subr.bf16.mxu1 %v4538_v0  ;;  %4024 = vmatprep.mubr.msk.bf16.mxu1 %vm4539_vm1, %v4538_v0 }
0x20e9   :  { %4017 = vmatmul.mubr.msk.bf16.vlgmr.msra.gmra.mxu0 %vm106_vm0, %v2480_v3 }
0x20ea   :  { %4029 = vmatpush3.bf16.msra.mxu0 %v5010_v12  ;;  %4032 = vmatprep.mubr.msk.bf16.mxu0 %vm4539_vm1, %v4538_v0 }
0x20eb   :  { %4023 = vmatpush3.bf16.msra.mxu1 %v5005_v35  ;;  %4030 = vmatprep.subr.bf16.mxu0 %v4538_v0 }
0x20ec   :  { %4036 = vmatprep.subr.bf16.mxu1 %v4538_v0 }
0x20ee   :  { %4031 = vmatpush3.bf16.msra.mxu0 %v5016_v36 }
0x20ef   :  { %4044 = vmatprep.subr.bf16.mxu0 %v4538_v0 }
0x21a1   :  { %v2472_v9 = vpop.f32.mrf.mxu0 }
0x21a3   :  { %v4002_v31 = vpop.f32.mrf.mxu0 }
0x21a5   :  { %v2475_v22 = vpop.f32.mrf.mxu0 }
0x21a6   :  { %v2518_v25 = vpop.f32.mrf.mxu1  ;;  %v5270_v22 = vld [vmem:[#allocation11 + $0x8] sm:$0xff]  }
0x21a7   :  { %v4003_v15 = vpop.f32.mrf.mxu0  ;;  %v2519_v16 = vadd.f32 %v2518_v25, %v2472_v9  ;;  %v5280_v25 = vld [vmem:[#allocation11] sm:$0xff]  }
0x21a8   :  { %v4010_v20 = vpop.f32.mrf.mxu1 }
0x21a9   :  { %v2524_v14 = vadd.f32 %v5023_v39, %v2519_v16  ;;  %v2583_v5 = vpop.f32.mrf.mxu0 }
0x21aa   :  { %v2589_v26 = vadd.f32 %v2583_v5, %v258_v17  ;;  %v2521_v1 = vpop.f32.mrf.mxu1 }
0x21ab   :  { %4313 = vtanh.f32 %v2524_v14  ;;  %v4018_v18 = vpop.f32.mrf.mxu0  ;;  %v3530_v34 = vmul.f32 -1.442695, %v2524_v14 }
0x21ac   :  { %4315 = vtanh.f32 %v2589_v26  ;;  %v4011_v23 = vpop.f32.mrf.mxu1  ;;  %v3532_v7 = vmul.f32 -1.442695, %v2589_v26  ;;  %v5297_v26 = vld [vmem:[%s5501_s3] ss:$0 sm:$0xff] }
0x21ad   :  { %v2586_v29 = vpop.f32.mrf.mxu0  ;;  %4317 = vpow2.f32 %v3530_v34 }
0x21ae   :  { %4319 = vpow2.f32 %v3532_v7 }
0x21af   :  { %v4019_v2 = vpop.f32.mrf.mxu0 }
0x21b8   :  { %v4314_v30 = vpop.eup %4313 }
0x21b9   :  { %v4316_v38 = vpop.eup %4315  ;;  %2534 = vrot.lane.b32.xlu0 %v4314_v30, %s4530_s12 }
0x21ba   :  { %2599 = vrot.lane.b32.xlu1 %v4316_v38, %s4530_s12  ;;  %v4318_v37 = vpop.eup %4317 }
0x21bb   :  { %v4320_v4 = vpop.eup %4319  ;;  %v2528_v32 = vadd.f32 1.0, %v4318_v37 }
0x21bc   :  { %v2593_v27 = vadd.f32 1.0, %v4320_v4 }
0x21bd   :  { %4321 = vrcp.f32 %v2528_v32 }
0x21be   :  { %4323 = vrcp.f32 %v2593_v27 }
0x21ca   :  { %v4322_v28 = vpop.eup %4321 }
0x21cb   :  { %v4324_v48 = vpop.eup %4323  ;;  %v2532_v50 = vmul.f32 %v4322_v28, %v5209_v60 }
0x21cc   :  { %v2597_v41 = vmul.f32 %v4324_v48, %v5213_v51 }
0x222b   :  { %v2535_v44 = vpop.permute.xlu0 %2534 }
0x222c   :  { %v2600_v45 = vpop.permute.xlu1 %2599  ;;  %v2537_v61 = vmul.f32 %v4322_v28, %v2535_v44 }
0x222d   :  { %v2602_v47 = vmul.f32 %v4324_v48, %v2600_v45 }
0x222e   :  { %2539 = vrot.lane.b32.xlu0 %v2537_v61, %s4540_s13 }
0x222f   :  { %2604 = vrot.lane.b32.xlu1 %v2602_v47, %s4540_s13 }
0x22a0   :  { %v2540_v43 = vpop.permute.xlu0 %2539 }
0x22a1   :  { %v2605_v52 = vpop.permute.xlu1 %2604  ;;  %v5254_v13 = vadd.f32 %v2540_v43, %v2532_v50 }
0x22a2   :  { %v5256_v63 = vadd.f32 %v2605_v52, %v2597_v41 }
0x22a3   :  { %4325 = vtanh.f32 %v5254_v13 }
0x22a4   :  { %4327 = vtanh.f32 %v5256_v63 }
0x22b0   :  { %v4326_v54 = vpop.eup %4325 }
0x22b1   :  { %v4328_v46 = vpop.eup %4327  ;;  %2545 = vrot.lane.b32.xlu0 %v4326_v54, %s4530_s12 }
0x22b2   :  { %2610 = vrot.lane.b32.xlu1 %v4328_v46, %s4530_s12 }
0x2323   :  { %v2546_v57 = vpop.permute.xlu0 %2545 }
0x2324   :  { %v2611_v60 = vpop.permute.xlu1 %2610  ;;  %v5262_v62 = vmul.f32 %v4322_v28, %v2546_v57 }
0x2325   :  { %v2613_v51 = vmul.f32 %v4324_v48, %v2611_v60 }
0x2326   :  { %v2615_v58 = vpack.c.bf16 %v5262_v62, %v5262_v62 }
0x2327   :  { %v2614_v3 = vpack.c.bf16 %v2613_v51, %v2613_v51 }
0x2328   :  { %2617 = vrot.lane.b32.xlu0 %v2615_v58, %s4540_s13 }
0x2329   :  { %2663 = vrot.lane.b32.xlu1 %v2614_v3, %s4540_s13 }
0x239a   :  { %v2618_v9 = vpop.permute.xlu0 %2617 }
0x239b   :  { %v2664_v31 = vpop.permute.xlu1 %2663  ;;  %4025 = vmatmul.mubr.msk.bf16.vlgmr.msra.gmra.mxu1 %vm106_vm0, %v2618_v9 }
0x239c   :  { %4033 = vmatmul.mubr.msk.bf16.vlgmr.msra.gmra.mxu0 %vm106_vm0, %v2664_v31  ;;  %4037 = vmatpush3.bf16.msra.mxu1 %v5270_v22 }
0x239d   :  { %4038 = vmatprep.subr.bf16.mxu1 %v4538_v0  ;;  %4040 = vmatprep.mubr.msk.bf16.mxu1 %vm4539_vm1, %v4538_v0 }
0x239e   :  { %4045 = vmatpush3.bf16.msra.mxu0 %v4997_v33  ;;  %4048 = vmatprep.mubr.msk.bf16.mxu0 %vm4539_vm1, %v4538_v0 }
0x239f   :  { %4046 = vmatprep.subr.bf16.mxu0 %v4538_v0 }
0x23a0   :  { %4039 = vmatpush3.bf16.msra.mxu1 %v5280_v25 }
0x23a1   :  { %4052 = vmatprep.subr.bf16.mxu1 %v4538_v0 }
0x23a2   :  { %4047 = vmatpush3.bf16.msra.mxu0 %v5005_v35 }
0x23a3   :  { %4041 = vmatmul.mubr.msk.bf16.vlgmr.msra.gmra.mxu1 %vm106_vm0, %v2664_v31  ;;  %4060 = vmatprep.subr.bf16.mxu0 %v4538_v0 }
0x23a4   :  { %4053 = vmatpush3.bf16.msra.mxu1 %v5010_v12  ;;  %4056 = vmatprep.mubr.msk.bf16.mxu1 %vm4539_vm1, %v4538_v0 }
0x23a5   :  { %4054 = vmatprep.subr.bf16.mxu1 %v4538_v0 }
0x23a8   :  { %4055 = vmatpush3.bf16.msra.mxu1 %v5016_v36  ;;  %v261_v36 = vadd.f32 %v5297_v26, %v4781_v10 }
0x23a9   :  { %4068 = vmatprep.subr.bf16.mxu1 %v4538_v0 }
0x245b   :  { %v2656_v33 = vpop.f32.mrf.mxu1 }
0x245c   :  { %v2702_v15 = vpop.f32.mrf.mxu0 }
0x245d   :  { %v2703_v16 = vadd.f32 %v2702_v15, %v2656_v33  ;;  %v4026_v17 = vpop.f32.mrf.mxu1  ;;  %v5328_v33 = vld [vmem:[#allocation14 + $0x8] sm:$0xff]   ;;  %v5336_v15 = vld [vmem:[#allocation12 + $0x8] sm:$0xff]  }
0x245e   :  { %v4034_v35 = vpop.f32.mrf.mxu0  ;;  %v5346_v17 = vld [vmem:[#allocation12] sm:$0xff]  }
0x245f   :  { %v2708_v20 = vadd.f32 %v5023_v39, %v2703_v16  ;;  %v2659_v14 = vpop.f32.mrf.mxu1  ;;  %v5341_v16 = vld [vmem:[#allocation14] sm:$0xff]  }
0x2460   :  { %v2705_v5 = vpop.f32.mrf.mxu0 }
0x2461   :  { %4329 = vtanh.f32 %v2708_v20  ;;  %v4027_v12 = vpop.f32.mrf.mxu1  ;;  %v3535_v34 = vmul.f32 -1.442695, %v2708_v20 }
0x2462   :  { %v4035_v1 = vpop.f32.mrf.mxu0 }
0x2463   :  { %v2767_v18 = vpop.f32.mrf.mxu1  ;;  %v266_v1 = vadd.f32 %v5297_v26, %v4775_v6 }
0x2464   :  { %v2773_v23 = vadd.f32 %v2767_v18, %v261_v36 }
0x2465   :  { %v4042_v29 = vpop.f32.mrf.mxu1 }
0x2466   :  { %4331 = vtanh.f32 %v2773_v23  ;;  %v3537_v7 = vmul.f32 -1.442695, %v2773_v23  ;;  %v5355_v23 = vld [vmem:[%s5504_s6] ss:$0 sm:$0xff] }
0x2467   :  { %v2770_v2 = vpop.f32.mrf.mxu1  ;;  %4333 = vpow2.f32 %v3535_v34 }
0x2468   :  { %4335 = vpow2.f32 %v3537_v7 }
0x2469   :  { %v4043_v30 = vpop.f32.mrf.mxu1 }
0x246e   :  { %v4330_v39 = vpop.eup %4329 }
0x246f   :  { %2718 = vrot.lane.b32.xlu0 %v4330_v39, %s4530_s12 }
0x2473   :  { %v4332_v38 = vpop.eup %4331 }
0x2474   :  { %2783 = vrot.lane.b32.xlu1 %v4332_v38, %s4530_s12  ;;  %v4334_v37 = vpop.eup %4333 }
0x2475   :  { %v2712_v4 = vadd.f32 1.0, %v4334_v37  ;;  %v4336_v10 = vpop.eup %4335 }
0x2476   :  { %v2777_v32 = vadd.f32 1.0, %v4336_v10 }
0x2477   :  { %4337 = vrcp.f32 %v2712_v4 }
0x2478   :  { %4339 = vrcp.f32 %v2777_v32 }
0x2484   :  { %v4338_v27 = vpop.eup %4337 }
0x2485   :  { %v4340_v48 = vpop.eup %4339  ;;  %v2716_v47 = vmul.f32 %v4338_v27, %v5254_v13 }
0x2486   :  { %v2781_v43 = vmul.f32 %v4340_v48, %v5256_v63 }
0x24e1   :  { %v2719_v28 = vpop.permute.xlu0 %2718 }
0x24e2   :  { %v2721_v44 = vmul.f32 %v4338_v27, %v2719_v28 }
0x24e4   :  { %2723 = vrot.lane.b32.xlu0 %v2721_v44, %s4540_s13 }
0x24e6   :  { %v2784_v45 = vpop.permute.xlu1 %2783 }
0x24e7   :  { %v2786_v61 = vmul.f32 %v4340_v48, %v2784_v45 }
0x24e9   :  { %2788 = vrot.lane.b32.xlu1 %v2786_v61, %s4540_s13 }
0x2556   :  { %v2724_v50 = vpop.permute.xlu0 %2723 }
0x2557   :  { %v5306_v41 = vadd.f32 %v2724_v50, %v2716_v47 }
0x2559   :  { %4341 = vtanh.f32 %v5306_v41 }
0x255b   :  { %v2789_v52 = vpop.permute.xlu1 %2788 }
0x255c   :  { %v5310_v54 = vadd.f32 %v2789_v52, %v2781_v43 }
0x255e   :  { %4343 = vtanh.f32 %v5310_v54 }
0x2566   :  { %v4342_v46 = vpop.eup %4341 }
0x2567   :  { %2729 = vrot.lane.b32.xlu0 %v4342_v46, %s4530_s12 }
0x256b   :  { %v4344_v57 = vpop.eup %4343 }
0x256c   :  { %2794 = vrot.lane.b32.xlu1 %v4344_v57, %s4530_s12 }
0x25d9   :  { %v2730_v60 = vpop.permute.xlu0 %2729 }
0x25da   :  { %v5315_v13 = vmul.f32 %v4338_v27, %v2730_v60 }
0x25dc   :  { %v2799_v51 = vpack.c.bf16 %v5315_v13, %v5315_v13 }
0x25de   :  { %2801 = vrot.lane.b32.xlu0 %v2799_v51, %s4540_s13  ;;  %v2795_v63 = vpop.permute.xlu1 %2794 }
0x25df   :  { %v2797_v58 = vmul.f32 %v4340_v48, %v2795_v63 }
0x25e1   :  { %v2798_v3 = vpack.c.bf16 %v2797_v58, %v2797_v58 }
0x25e3   :  { %2847 = vrot.lane.b32.xlu1 %v2798_v3, %s4540_s13 }
0x2650   :  { %v2802_v9 = vpop.permute.xlu0 %2801 }
0x2651   :  { %4049 = vmatmul.mubr.msk.bf16.vlgmr.msra.gmra.mxu0 %vm106_vm0, %v2802_v9 }
0x2652   :  { %4061 = vmatpush3.bf16.msra.mxu0 %v5270_v22  ;;  %4064 = vmatprep.mubr.msk.bf16.mxu0 %vm4539_vm1, %v4538_v0 }
0x2653   :  { %4062 = vmatprep.subr.bf16.mxu0 %v4538_v0 }
0x2655   :  { %v2848_v31 = vpop.permute.xlu1 %2847 }
0x2656   :  { %4063 = vmatpush3.bf16.msra.mxu0 %v5280_v25  ;;  %4057 = vmatmul.mubr.msk.bf16.vlgmr.msra.gmra.mxu1 %vm106_vm0, %v2848_v31 }
0x2657   :  { %4069 = vmatpush3.bf16.msra.mxu1 %v5328_v33  ;;  %4076 = vmatprep.subr.bf16.mxu0 %v4538_v0 }
0x2658   :  { %4070 = vmatprep.subr.bf16.mxu1 %v4538_v0  ;;  %4072 = vmatprep.mubr.msk.bf16.mxu1 %vm4539_vm1, %v4538_v0 }
0x2659   :  { %4065 = vmatmul.mubr.msk.bf16.vlgmr.msra.gmra.mxu0 %vm106_vm0, %v2848_v31 }
0x265a   :  { %4077 = vmatpush3.bf16.msra.mxu0 %v5336_v15  ;;  %4080 = vmatprep.mubr.msk.bf16.mxu0 %vm4539_vm1, %v4538_v0 }
0x265b   :  { %4071 = vmatpush3.bf16.msra.mxu1 %v5341_v16  ;;  %4078 = vmatprep.subr.bf16.mxu0 %v4538_v0 }
0x265c   :  { %4084 = vmatprep.subr.bf16.mxu1 %v4538_v0 }
0x265e   :  { %4079 = vmatpush3.bf16.msra.mxu0 %v5346_v17 }
0x265f   :  { %4092 = vmatprep.subr.bf16.mxu0 %v4538_v0 }
0x2711   :  { %v2840_v35 = vpop.f32.mrf.mxu0 }
0x2713   :  { %v4050_v20 = vpop.f32.mrf.mxu0 }
0x2715   :  { %v2843_v14 = vpop.f32.mrf.mxu0 }
0x2716   :  { %v2886_v5 = vpop.f32.mrf.mxu1 }
0x2717   :  { %v4051_v12 = vpop.f32.mrf.mxu0  ;;  %v2887_v36 = vadd.f32 %v2886_v5, %v2840_v35 }
0x2718   :  { %v4058_v18 = vpop.f32.mrf.mxu1 }
0x2719   :  { %v2892_v29 = vadd.f32 %v5355_v23, %v2887_v36  ;;  %v2951_v2 = vpop.f32.mrf.mxu0 }
0x271a   :  { %v2957_v30 = vadd.f32 %v2951_v2, %v266_v1  ;;  %v2889_v39 = vpop.f32.mrf.mxu1 }
0x271b   :  { %4345 = vtanh.f32 %v2892_v29  ;;  %v4066_v38 = vpop.f32.mrf.mxu0  ;;  %v3540_v6 = vmul.f32 -1.442695, %v2892_v29 }
0x271c   :  { %4347 = vtanh.f32 %v2957_v30  ;;  %v4059_v34 = vpop.f32.mrf.mxu1  ;;  %v3542_v32 = vmul.f32 -1.442695, %v2957_v30 }
0x271d   :  { %v2954_v7 = vpop.f32.mrf.mxu0  ;;  %4349 = vpow2.f32 %v3540_v6 }
0x271e   :  { %4351 = vpow2.f32 %v3542_v32 }
0x271f   :  { %v4067_v37 = vpop.f32.mrf.mxu0 }
0x2728   :  { %v4346_v4 = vpop.eup %4345 }
0x2729   :  { %v4348_v10 = vpop.eup %4347  ;;  %2902 = vrot.lane.b32.xlu0 %v4346_v4, %s4530_s12 }
0x272a   :  { %2967 = vrot.lane.b32.xlu1 %v4348_v10, %s4530_s12  ;;  %v4350_v27 = vpop.eup %4349 }
0x272b   :  { %v4352_v28 = vpop.eup %4351  ;;  %v2896_v44 = vadd.f32 1.0, %v4350_v27 }
0x272c   :  { %v2961_v48 = vadd.f32 1.0, %v4352_v28 }
0x272d   :  { %4353 = vrcp.f32 %v2896_v44 }
0x272e   :  { %4355 = vrcp.f32 %v2961_v48 }
0x273a   :  { %v4354_v45 = vpop.eup %4353 }
0x273b   :  { %v4356_v47 = vpop.eup %4355  ;;  %v2900_v46 = vmul.f32 %v4354_v45, %v5306_v41 }
0x273c   :  { %v2965_v57 = vmul.f32 %v4356_v47, %v5310_v54 }
0x279b   :  { %v2903_v61 = vpop.permute.xlu0 %2902 }
0x279c   :  { %v2968_v50 = vpop.permute.xlu1 %2967  ;;  %v2905_v43 = vmul.f32 %v4354_v45, %v2903_v61 }
0x279d   :  { %v2970_v52 = vmul.f32 %v4356_v47, %v2968_v50 }
0x279e   :  { %2907 = vrot.lane.b32.xlu0 %v2905_v43, %s4540_s13 }
0x279f   :  { %2972 = vrot.lane.b32.xlu1 %v2970_v52, %s4540_s13 }
0x2810   :  { %v2908_v60 = vpop.permute.xlu0 %2907 }
0x2811   :  { %v2973_v51 = vpop.permute.xlu1 %2972  ;;  %v5364_v63 = vadd.f32 %v2908_v60, %v2900_v46 }
0x2812   :  { %v5366_v58 = vadd.f32 %v2973_v51, %v2965_v57 }
0x2813   :  { %4357 = vtanh.f32 %v5364_v63 }
0x2814   :  { %4359 = vtanh.f32 %v5366_v58 }
0x2820   :  { %v4358_v3 = vpop.eup %4357 }
0x2821   :  { %v4360_v9 = vpop.eup %4359  ;;  %2913 = vrot.lane.b32.xlu0 %v4358_v3, %s4530_s12 }
0x2822   :  { %2978 = vrot.lane.b32.xlu1 %v4360_v9, %s4530_s12 }
0x2893   :  { %v2914_v31 = vpop.permute.xlu0 %2913 }
0x2894   :  { %v2979_v41 = vpop.permute.xlu1 %2978  ;;  %v5372_v35 = vmul.f32 %v4354_v45, %v2914_v31 }
0x2895   :  { %v2981_v54 = vmul.f32 %v4356_v47, %v2979_v41 }
0x2896   :  { %v2983_v20 = vpack.c.bf16 %v5372_v35, %v5372_v35 }
0x2897   :  { %v2982_v14 = vpack.c.bf16 %v2981_v54, %v2981_v54 }
0x2898   :  { %2985 = vrot.lane.b32.xlu0 %v2983_v20, %s4540_s13 }
0x2899   :  { %3031 = vrot.lane.b32.xlu1 %v2982_v14, %s4540_s13 }
0x290a   :  { %v2986_v5 = vpop.permute.xlu0 %2985 }
0x290b   :  { %v3032_v12 = vpop.permute.xlu1 %3031  ;;  %4073 = vmatmul.mubr.msk.bf16.vlgmr.msra.gmra.mxu1 %vm106_vm0, %v2986_v5 }
0x290c   :  { %4081 = vmatmul.mubr.msk.bf16.vlgmr.msra.gmra.mxu0 %vm106_vm0, %v3032_v12  ;;  %4085 = vmatpush3.bf16.msra.mxu1 %v5270_v22 }
0x290d   :  { %4086 = vmatprep.subr.bf16.mxu1 %v4538_v0  ;;  %4088 = vmatprep.mubr.msk.bf16.mxu1 %vm4539_vm1, %v4538_v0 }
0x290e   :  { %4093 = vmatpush3.bf16.msra.mxu0 %v5328_v33  ;;  %4096 = vmatprep.mubr.msk.bf16.mxu0 %vm4539_vm1, %v4538_v0 }
0x290f   :  { %4094 = vmatprep.subr.bf16.mxu0 %v4538_v0 }
0x2910   :  { %4087 = vmatpush3.bf16.msra.mxu1 %v5280_v25 }
0x2911   :  { %4100 = vmatprep.subr.bf16.mxu1 %v4538_v0 }
0x2912   :  { %4095 = vmatpush3.bf16.msra.mxu0 %v5341_v16 }
0x2913   :  { %4089 = vmatmul.mubr.msk.bf16.vlgmr.msra.gmra.mxu1 %vm106_vm0, %v3032_v12 }
0x2914   :  { %4101 = vmatpush3.bf16.msra.mxu1 %v5336_v15  ;;  %4104 = vmatprep.mubr.msk.bf16.mxu1 %vm4539_vm1, %v4538_v0  ;;  %v269_v15 = vadd.f32 %v5297_v26, %v4779_v8 }
0x2915   :  { %4102 = vmatprep.subr.bf16.mxu1 %v4538_v0 }
0x2918   :  { %4103 = vmatpush3.bf16.msra.mxu1 %v5346_v17 }
0x29cb   :  { %v3024_v22 = vpop.f32.mrf.mxu1 }
0x29cc   :  { %v3070_v33 = vpop.f32.mrf.mxu0 }
0x29cd   :  { %v3071_v36 = vadd.f32 %v3070_v33, %v3024_v22  ;;  %v4074_v1 = vpop.f32.mrf.mxu1 }
0x29ce   :  { %v4082_v25 = vpop.f32.mrf.mxu0 }
0x29cf   :  { %v3076_v18 = vadd.f32 %v5355_v23, %v3071_v36  ;;  %v3027_v29 = vpop.f32.mrf.mxu1 }
0x29d0   :  { %v3073_v16 = vpop.f32.mrf.mxu0 }
0x29d1   :  { %4361 = vtanh.f32 %v3076_v18  ;;  %v4075_v2 = vpop.f32.mrf.mxu1  ;;  %v3545_v4 = vmul.f32 -1.442695, %v3076_v18 }
0x29d2   :  { %v4083_v30 = vpop.f32.mrf.mxu0 }
0x29d3   :  { %v3135_v39 = vpop.f32.mrf.mxu1 }
0x29d4   :  { %v3141_v38 = vadd.f32 %v3135_v39, %v269_v15 }
0x29d5   :  { %v4090_v0 = vpop.f32.mrf.mxu1 }
0x29d6   :  { %4363 = vtanh.f32 %v3141_v38  ;;  %v3547_v10 = vmul.f32 -1.442695, %v3141_v38 }
0x29d7   :  { %v3138_v17 = vpop.f32.mrf.mxu1  ;;  %4365 = vpow2.f32 %v3545_v4  ;;  %v3552_v4 = vld [vmem:[%s5505_s7] ss:$0 sm:$0xff]  ;;  %s4542_s7 = smov [#allocation15]  }
0x29d8   :  { %4367 = vpow2.f32 %v3547_v10 }
0x29d9   :  { %v4091_v34 = vpop.f32.mrf.mxu1 }
0x29de   :  { %v4362_v7 = vpop.eup %4361 }
0x29df   :  { %3086 = vrot.lane.b32.xlu0 %v4362_v7, %s4530_s12 }
0x29e3   :  { %v4364_v37 = vpop.eup %4363 }
0x29e4   :  { %3151 = vrot.lane.b32.xlu1 %v4364_v37, %s4530_s12  ;;  %v4366_v6 = vpop.eup %4365 }
0x29e5   :  { %v3080_v32 = vadd.f32 1.0, %v4366_v6  ;;  %v4368_v8 = vpop.eup %4367 }
0x29e6   :  { %v3145_v26 = vadd.f32 1.0, %v4368_v8 }
0x29e7   :  { %4369 = vrcp.f32 %v3080_v32 }
0x29e8   :  { %4371 = vrcp.f32 %v3145_v26 }
0x29f4   :  { %v4370_v27 = vpop.eup %4369 }
0x29f5   :  { %v4372_v48 = vpop.eup %4371  ;;  %v3084_v47 = vmul.f32 %v4370_v27, %v5364_v63 }
0x29f6   :  { %v3149_v52 = vmul.f32 %v4372_v48, %v5366_v58 }
0x2a51   :  { %v3087_v28 = vpop.permute.xlu0 %3086 }
0x2a52   :  { %v3089_v44 = vmul.f32 %v4370_v27, %v3087_v28 }
0x2a54   :  { %3091 = vrot.lane.b32.xlu0 %v3089_v44, %s4540_s13 }
0x2a56   :  { %v3152_v45 = vpop.permute.xlu1 %3151 }
0x2a57   :  { %v3154_v61 = vmul.f32 %v4372_v48, %v3152_v45 }
0x2a59   :  { %3156 = vrot.lane.b32.xlu1 %v3154_v61, %s4540_s13 }
0x2ac6   :  { %v3092_v50 = vpop.permute.xlu0 %3091 }
0x2ac7   :  { %v3094_v43 = vadd.f32 %v3092_v50, %v3084_v47 }
0x2ac9   :  { %4373 = vtanh.f32 %v3094_v43 }
0x2acb   :  { %v3157_v46 = vpop.permute.xlu1 %3156 }
0x2acc   :  { %v5406_v57 = vadd.f32 %v3157_v46, %v3149_v52 }
0x2ace   :  { %4375 = vtanh.f32 %v5406_v57 }
0x2ad6   :  { %v4374_v60 = vpop.eup %4373 }
0x2ad7   :  { %3097 = vrot.lane.b32.xlu0 %v4374_v60, %s4530_s12 }
0x2adb   :  { %v4376_v51 = vpop.eup %4375 }
0x2adc   :  { %3162 = vrot.lane.b32.xlu1 %v4376_v51, %s4530_s12 }
0x2b49   :  { %v3098_v3 = vpop.permute.xlu0 %3097 }
0x2b4a   :  { %v5411_v9 = vmul.f32 %v4370_v27, %v3098_v3 }
0x2b4c   :  { %v3167_v63 = vpack.c.bf16 %v5411_v9, %v5411_v9 }
0x2b4e   :  { %3169 = vrot.lane.b32.xlu0 %v3167_v63, %s4540_s13  ;;  %v3163_v58 = vpop.permute.xlu1 %3162 }
0x2b4f   :  { %v5416_v31 = vmul.f32 %v4372_v48, %v3163_v58 }
0x2b51   :  { %v3166_v41 = vpack.c.bf16 %v5416_v31, %v5416_v31 }
0x2b53   :  { %3215 = vrot.lane.b32.xlu1 %v3166_v41, %s4540_s13 }
0x2bc0   :  { %v3170_v54 = vpop.permute.xlu0 %3169 }
0x2bc1   :  { %4097 = vmatmul.mubr.msk.bf16.vlgmr.msra.gmra.mxu0 %vm106_vm0, %v3170_v54 }
0x2bc5   :  { %v3216_v20 = vpop.permute.xlu1 %3215 }
0x2bc6   :  { %4105 = vmatmul.mubr.msk.bf16.vlgmr.msra.gmra.mxu1 %vm106_vm0, %v3216_v20 }
0x2c81   :  { %v3208_v14 = vpop.f32.mrf.mxu0 }
0x2c83   :  { %v4098_v5 = vpop.f32.mrf.mxu0 }
0x2c85   :  { %v3211_v12 = vpop.f32.mrf.mxu0 }
0x2c86   :  { %v3254_v22 = vpop.f32.mrf.mxu1 }
0x2c87   :  { %v4099_v33 = vpop.f32.mrf.mxu0  ;;  %v3255_v36 = vadd.f32 %v3254_v22, %v3208_v14 }
0x2c88   :  { %v4106_v1 = vpop.f32.mrf.mxu1 }
0x2c89   :  { %v3260_v25 = vadd.f32 %v5355_v23, %v3255_v36  ;;  %v3551_v23 = vld [vmem:[%s5506_s8] ss:$0 sm:$0xff]  ;;  %s3440_s8 = sshll.u32 %s4542_s7, 4  ;;  %s3441_s8 = int_to_ptr.vmem [resolvable:$true] %s3440_s8 }
0x2c8a   :  { %v3257_v18 = vpop.f32.mrf.mxu1  ;;  %p4506_p12 = scmp.lt.s32.totalorder %s3441_s8, %s3441_s8 }
0x2c8b   :  { %4377 = vtanh.f32 %v3260_v25  ;;  %v3550_v2 = vmul.f32 -1.442695, %v3260_v25 }
0x2c8c   :  { %v4107_v29 = vpop.f32.mrf.mxu1 }
0x2c8d   :  { %4379 = vpow2.f32 %v3550_v2 }
0x2c98   :  { %v4378_v16 = vpop.eup %4377 }
0x2c99   :  { %3270 = vrot.lane.b32.xlu0 %v4378_v16, %s4530_s12 }
0x2c9a   :  { %v4380_v15 = vpop.eup %4379 }
0x2c9b   :  { %v3264_v30 = vadd.f32 1.0, %v4380_v15 }
0x2c9d   :  { %4381 = vrcp.f32 %v3264_v30 }
0x2caa   :  { %v4382_v39 = vpop.eup %4381 }
0x2cab   :  { %v3268_v17 = vmul.f32 %v4382_v39, %v3094_v43 }
0x2d0b   :  { %v3271_v38 = vpop.permute.xlu0 %3270 }
0x2d0c   :  { %v3273_v0 = vmul.f32 %v4382_v39, %v3271_v38 }
0x2d0e   :  { %3275 = vrot.lane.b32.xlu1 %v3273_v0, %s4540_s13 }
0x2d12   :  { %3291 = vrot.lane.b32.xlu1 %v3551_v23, %s4541_s27 }
0x2d80   :  { %v3276_v34 = vpop.permute.xlu1 %3275 }
0x2d81   :  { %v3278_v7 = vadd.f32 %v3276_v34, %v3268_v17 }
0x2d83   :  { %4383 = vtanh.f32 %v3278_v7 }
0x2d84   :  { %v3292_v10 = vpop.permute.xlu1 %3291 }
0x2d85   :  { %v3295_v32 = vmul.f32 %v3292_v10, %v4800_v11  ;;  %v3294_v8 = vmul.f32 %v3292_v10, %v4732_v53  ;;  %v3297_v44 = vmul.f32 %v3292_v10, %v4888_v24  ;;  %v3296_v48 = vmul.f32 %v3292_v10, %v4844_v55 }
0x2d86   :  { %v3299_v11 = vmul.f32 %v3292_v10, %v4985_v19  ;;  %v3298_v53 = vmul.f32 %v3292_v10, %v4932_v56  ;;  %v3301_v24 = vmul.f32 %v3292_v10, %v5086_v42  ;;  %v3300_v55 = vmul.f32 %v3292_v10, %v5042_v21 }
0x2d87   :  { %v3303_v19 = vmul.f32 %v3292_v10, %v5174_v49  ;;  %v3302_v56 = vmul.f32 %v3292_v10, %v5130_v59  ;;  %v3305_v42 = vmul.f32 %v3292_v10, %v5262_v62  ;;  %v3304_v21 = vmul.f32 %v3292_v10, %v5218_v40 }
0x2d88   :  { %v3307_v49 = vmul.f32 %v3292_v10, %v5372_v35  ;;  %v3306_v59 = vmul.f32 %v3292_v10, %v5315_v13  ;;  %v3308_v62 = vmul.f32 %v3292_v10, %v5411_v9 }
0x2d90   :  { %v4384_v37 = vpop.eup %4383 }
0x2d91   :  { %3281 = vrot.lane.b32.xlu0 %v4384_v37, %s4530_s12  ;;  %s4501_s12 = scalar_lea.vmem %s3441_s8, 2048 }
0x2d92   :  { %p4502_p11 = scmp.ne.s32.totalorder %s3441_s8, %s4501_s12  ;;  %p4507_p13 = scmp.lt.s32.totalorder %s4501_s12, %s4501_s12 }
0x2d94   :  { %p4508_p0 = por %p4507_p13, %p4506_p12 }
0x2d95   :  { %3316 = vrot.lane.b32.xlu0 %v3552_v4, %s4541_s27 }
0x2d96   :  { %p4509_p1 = pnand %p4508_p0, %p4502_p11 }
0x2e03   :  { %v3282_v6 = vpop.permute.xlu0 %3281 }
0x2e04   :  { %v3284_v63 = vmul.f32 %v4382_v39, %v3282_v6 }
0x2e06   :  { %v3309_v40 = vmul.f32 %v3292_v10, %v3284_v63 }
0x2e07   :  { %v3317_v26 = vpop.permute.xlu0 %3316 }
0x2e08   :  { %v3320_v27 = vadd.f32 %v3317_v26, %v3295_v32  ;;  %v3319_v28 = vadd.f32 %v3317_v26, %v3294_v8  ;;  %v3322_v45 = vadd.f32 %v3317_v26, %v3297_v44  ;;  %v3321_v61 = vadd.f32 %v3317_v26, %v3296_v48 }
0x2e09   :  { %v3324_v47 = vadd.f32 %v3317_v26, %v3299_v11  ;;  %v3323_v50 = vadd.f32 %v3317_v26, %v3298_v53  ;;  %v3326_v43 = vadd.f32 %v3317_v26, %v3301_v24  ;;  %v3325_v52 = vadd.f32 %v3317_v26, %v3300_v55 }
0x2e0a   :  { %3353 = vrot.lane.b32.xlu0 %v3320_v27, %s4540_s13  ;;  %3351 = vrot.lane.b32.xlu1 %v3319_v28, %s4540_s13  ;;  %v3328_v46 = vadd.f32 %v3317_v26, %v3303_v19  ;;  %v3327_v60 = vadd.f32 %v3317_v26, %v3302_v56  ;;  %v3330_v51 = vadd.f32 %v3317_v26, %v3305_v42 }
0x2e0b   :  { %v3329_v3 = vadd.f32 %v3317_v26, %v3304_v21  ;;  %v3332_v58 = vadd.f32 %v3317_v26, %v3307_v49  ;;  %v3331_v41 = vadd.f32 %v3317_v26, %v3306_v59  ;;  %v3333_v54 = vadd.f32 %v3317_v26, %v3308_v62 }
0x2e0c   :  { %v3334_v20 = vadd.f32 %v3317_v26, %v3309_v40 }
0x2e0e   :  { %3357 = vrot.lane.b32.xlu0 %v3322_v45, %s4540_s13  ;;  %3355 = vrot.lane.b32.xlu1 %v3321_v61, %s4540_s13 }
0x2e12   :  { %3361 = vrot.lane.b32.xlu0 %v3324_v47, %s4540_s13  ;;  %3359 = vrot.lane.b32.xlu1 %v3323_v50, %s4540_s13 }
0x2e16   :  { %3365 = vrot.lane.b32.xlu0 %v3326_v43, %s4540_s13  ;;  %3363 = vrot.lane.b32.xlu1 %v3325_v52, %s4540_s13 }
0x2e1a   :  { %3369 = vrot.lane.b32.xlu0 %v3328_v46, %s4540_s13  ;;  %3367 = vrot.lane.b32.xlu1 %v3327_v60, %s4540_s13 }
0x2e1e   :  { %3373 = vrot.lane.b32.xlu0 %v3330_v51, %s4540_s13  ;;  %3371 = vrot.lane.b32.xlu1 %v3329_v3, %s4540_s13 }
0x2e22   :  { %3377 = vrot.lane.b32.xlu0 %v3332_v58, %s4540_s13  ;;  %3375 = vrot.lane.b32.xlu1 %v3331_v41, %s4540_s13 }
0x2e26   :  { %3421 = vrot.lane.b32.xlu0 %v5406_v57, %s4541_s27  ;;  %3379 = vrot.lane.b32.xlu1 %v3333_v54, %s4540_s13 }
0x2e2a   :  { %3381 = vrot.lane.b32.xlu0 %v3334_v20, %s4540_s13  ;;  %3416 = vrot.lane.b32.xlu1 %v5416_v31, %s4540_s13 }
0x2e2e   :  { %3431 = vrot.lane.b32.xlu0 %v3278_v7, %s4541_s27  ;;  %3426 = vrot.lane.b32.xlu1 %v3284_v63, %s4540_s13 }
0x2e7c   :  { %v3354_v13 = vpop.permute.xlu0 %3353  ;;  %v3352_v35 = vpop.permute.xlu1 %3351 }
0x2e7d   :  { %3400 = vst.msk [vmem:[#allocation15 + $0x8] sm:$0xff] %vm106_vm0, %v3354_v13  ;;  %3399 = vst.msk [vmem:[#allocation15] sm:$0xff] %vm106_vm0, %v3352_v35 }
0x2e80   :  { %v3358_v9 = vpop.permute.xlu0 %3357  ;;  %v3356_v57 = vpop.permute.xlu1 %3355 }
0x2e81   :  { %3402 = vst.msk [vmem:[#allocation15 + $0x18] sm:$0xff] %vm106_vm0, %v3358_v9  ;;  %3401 = vst.msk [vmem:[#allocation15 + $0x10] sm:$0xff] %vm106_vm0, %v3356_v57 }
0x2e84   :  { %v3362_v14 = vpop.permute.xlu0 %3361  ;;  %v3360_v5 = vpop.permute.xlu1 %3359 }
0x2e85   :  { %3404 = vst.msk [vmem:[#allocation15 + $0x28] sm:$0xff] %vm106_vm0, %v3362_v14  ;;  %3403 = vst.msk [vmem:[#allocation15 + $0x20] sm:$0xff] %vm106_vm0, %v3360_v5 }
0x2e88   :  { %v3366_v31 = vpop.permute.xlu0 %3365  ;;  %v3364_v12 = vpop.permute.xlu1 %3363 }
0x2e89   :  { %3406 = vst.msk [vmem:[#allocation15 + $0x38] sm:$0xff] %vm106_vm0, %v3366_v31  ;;  %3405 = vst.msk [vmem:[#allocation15 + $0x30] sm:$0xff] %vm106_vm0, %v3364_v12 }
0x2e8c   :  { %v3370_v22 = vpop.permute.xlu0 %3369  ;;  %v3368_v33 = vpop.permute.xlu1 %3367 }
0x2e8d   :  { %3408 = vst.msk [vmem:[#allocation15 + $0x48] sm:$0xff] %vm106_vm0, %v3370_v22  ;;  %3407 = vst.msk [vmem:[#allocation15 + $0x40] sm:$0xff] %vm106_vm0, %v3368_v33 }
0x2e90   :  { %v3374_v36 = vpop.permute.xlu0 %3373  ;;  %v3372_v1 = vpop.permute.xlu1 %3371 }
0x2e91   :  { %3410 = vst.msk [vmem:[#allocation15 + $0x58] sm:$0xff] %vm106_vm0, %v3374_v36  ;;  %3409 = vst.msk [vmem:[#allocation15 + $0x50] sm:$0xff] %vm106_vm0, %v3372_v1 }
0x2e94   :  { %v3378_v25 = vpop.permute.xlu0 %3377  ;;  %v3376_v18 = vpop.permute.xlu1 %3375 }
0x2e95   :  { %3412 = vst.msk [vmem:[#allocation15 + $0x68] sm:$0xff] %vm106_vm0, %v3378_v25  ;;  %3411 = vst.msk [vmem:[#allocation15 + $0x60] sm:$0xff] %vm106_vm0, %v3376_v18 }
0x2e98   :  { %v3422_v29 = vpop.permute.xlu0 %3421  ;;  %v3380_v16 = vpop.permute.xlu1 %3379 }
0x2e99   :  { %3424 = vst.msk [vmem:[#allocation3] sm:$0xff] %vm106_vm0, %v3422_v29  ;;  %3413 = vst.msk [vmem:[#allocation15 + $0x70] sm:$0xff] %vm106_vm0, %v3380_v16 }
0x2e9c   :  { %v3382_v2 = vpop.permute.xlu0 %3381  ;;  %v3417_v15 = vpop.permute.xlu1 %3416 }
0x2e9d   :  { %3414 = vst.msk [vmem:[#allocation15 + $0x78] sm:$0xff] %vm106_vm0, %v3382_v2  ;;  %3419 = vst.msk [vmem:[#allocation2] sm:$0xff] %vm106_vm0, %v3417_v15 }
0x2e9e   :  { %4512 = shalt.err (!%p4509_p1)
}
0x2e9f   :  { %3446 = dma.vmem_to_hbm [thread:$0]  %s3441_s8, 2048, %s5507_s9, [#allocation8], %s4534_s23, %s4534_s23, %s4535_s24  }
0x2ea0   :  { %v3432_v30 = vpop.permute.xlu0 %3431  ;;  %v3427_v39 = vpop.permute.xlu1 %3426 }
0x2ea1   :  { %3434 = vst.msk [vmem:[#allocation5] sm:$0xff] %vm106_vm0, %v3432_v30  ;;  %3429 = vst.msk [vmem:[#allocation4] sm:$0xff] %vm106_vm0, %v3427_v39 }
0x2ea2   :  { %4527 = dma.done.wait [#allocation8], 2048  }
0x2ea3   :  { %4528 = vsyncadd [#allocation8], 4294965248 }
0x2ea4   :  { %3450 = vsyncpa [#allocation7], 1 }
0x2ea5   :  { %3451 = vsyncpa [#allocation10], 1 }
0x2ea6   :  { %3452 = vsyncpa [#allocation13], 1 }
0x2ea7   :  { %3453 = vsyncpa [#allocation8], 1 }

</bundles_post_ra>
